<compile_context>
chip_gen: v5e
topology: v5e:2x2
jax: 0.10.0
libtpu: 0.0.40
codegen_flags: <defaults>
</compile_context>

<pallas_src>
import functools
import math

import jax
import jax.numpy as jnp
from jax.experimental import pallas as pl
from jax.experimental.pallas import tpu as pltpu

# ----------------------------- configuration -----------------------------
PHONEME_SIZE = 12
N_LAYERS = 2            # FFT blocks in encoder and decoder
D_MODEL = 32
HEADS = 2
HIDDEN = 64
N_MELS = 8
N_BINS = 16
POSTNET_KERNEL = 5
POSTNET_LAYERS = 3
EPS = 1e-6
FFT_CONV_KERNEL = 9     # first FFN conv kernel (second FFN conv is 1x1 -> plain matmul)
VP_KERNEL = 3
MAX_POS = 256           # positional-encoding table length (precomputed once)


def _rep_spec(a):
    """Whole-array block, replicated across the (batch) grid."""
    zeros = (0,) * a.ndim
    return pl.BlockSpec(a.shape, lambda b, _z=zeros: _z)


# ----------------------------- in-kernel helpers -----------------------------
def _ln(v, g, b, eps):
    mu = jnp.mean(v, axis=-1, keepdims=True)
    var = jnp.mean(jnp.square(v - mu), axis=-1, keepdims=True)
    return (v - mu) * jax.lax.rsqrt(var + eps) * g + b


def _conv_taps(pad_ref, val, w_ref, n_taps, t, pred_idx=None):
    """'same' 1D conv as n_taps small matmuls over a zero-padded VMEM scratch.

    pad_ref: [t + n_taps - 1, Cin] scratch; val: [t, Cin];
    w_ref: [(P,) n_taps, Cin, Cout] tap-major weights (PyTorch [Cout,Cin,k]
    pre-transposed to [k, Cin, Cout] at init time).
    """
    pad = (n_taps - 1) // 2
    pad_ref[...] = jnp.zeros_like(pad_ref)
    pad_ref[pl.ds(pad, t), :] = val
    acc = jnp.zeros((t, w_ref.shape[-1]), jnp.float32)
    for j in range(n_taps):
        wj = w_ref[pred_idx, j] if pred_idx is not None else w_ref[j]
        acc = acc + jnp.dot(pad_ref[pl.ds(j, t), :], wj,
                            preferred_element_type=jnp.float32)
    return acc


# ----------------------------- fused FFT block -----------------------------
def _fft_block_kernel(x_ref, km_ref, keep_ref,
                      wqkv_ref, bqkv_ref, wo_ref, bo_ref,
                      ln1g_ref, ln1b_ref, c1w_ref, c1b_ref,
                      c2w_ref, c2b_ref, ln2g_ref, ln2b_ref,
                      o_ref, pad_ref, *, T, D, H, K1, eps):
    dh = D // H
    scale = 1.0 / math.sqrt(dh)
    x = x_ref[0]                        # [T, D]
    neg = km_ref[0] * (-1e9)            # [1, T]  (1.0 at key padding)
    keep = keep_ref[0]                  # [T, 1]  (1.0 at valid positions)

    # --- multi-head self-attention with fused QKV projection ---
    qkv = jnp.dot(x, wqkv_ref[...], preferred_element_type=jnp.float32)
    qkv = qkv + bqkv_ref[...]           # [T, 3D]
    heads = []
    for h in range(H):
        q = qkv[:, h * dh:(h + 1) * dh] * scale
        k = qkv[:, D + h * dh:D + (h + 1) * dh]
        v = qkv[:, 2 * D + h * dh:2 * D + (h + 1) * dh]
        s = jax.lax.dot_general(q, k, (((1,), (1,)), ((), ())),
                                preferred_element_type=jnp.float32)   # [T, T]
        s = s + neg
        s = s - jnp.max(s, axis=-1, keepdims=True)
        p = jnp.exp(s)
        p = p * pl.reciprocal(jnp.sum(p, axis=-1, keepdims=True), approx=True)
        heads.append(jnp.dot(p, v, preferred_element_type=jnp.float32))
    att = jnp.concatenate(heads, axis=-1)                              # [T, D]
    a = jnp.dot(att, wo_ref[...], preferred_element_type=jnp.float32) + bo_ref[...]

    # --- add & norm 1 + padding-mask fill ---
    y = _ln(a + x, ln1g_ref[...], ln1b_ref[...], eps) * keep

    # --- conv FFN: K1-tap conv -> relu -> 1x1 conv (plain matmul) ---
    h1 = _conv_taps(pad_ref, y, c1w_ref, K1, T)
    h1 = jnp.maximum(h1 + c1b_ref[...], 0.0)                           # [T, HID]
    h2 = jnp.dot(h1, c2w_ref[...], preferred_element_type=jnp.float32) + c2b_ref[...]

    # --- add & norm 2 + padding-mask fill ---
    o_ref[0] = _ln(h2 + y, ln2g_ref[...], ln2b_ref[...], eps) * keep


def fft_block(x, key_mask, keep, p):
    B, T, D = x.shape
    K1 = p["c1_w"].shape[0]
    weights = [p["wqkv"], p["bqkv"], p["wo"], p["bo"],
               p["ln1_g"], p["ln1_b"], p["c1_w"], p["c1_b"],
               p["c2_w"], p["c2_b"], p["ln2_g"], p["ln2_b"]]
    kern = functools.partial(_fft_block_kernel, T=T, D=D, H=HEADS, K1=K1, eps=EPS)
    return pl.pallas_call(
        kern,
        out_shape=jax.ShapeDtypeStruct((B, T, D), jnp.float32),
        grid=(B,),
        in_specs=[pl.BlockSpec((1, T, D), lambda b: (b, 0, 0)),
                  pl.BlockSpec((1, 1, T), lambda b: (b, 0, 0)),
                  pl.BlockSpec((1, T, 1), lambda b: (b, 0, 0))]
                 + [_rep_spec(a) for a in weights],
        out_specs=pl.BlockSpec((1, T, D), lambda b: (b, 0, 0)),
        scratch_shapes=[pltpu.VMEM((T + K1 - 1, D), jnp.float32)],
        compiler_params=pltpu.CompilerParams(
            dimension_semantics=("parallel",)),
    )(x, key_mask, keep, *weights)


# ------------------- fused variance predictors (dur/pitch/energy) -------------------
def _var_pred_kernel(x_ref, keep_ref,
                     c1w_ref, c1b_ref, ln1g_ref, ln1b_ref,
                     c2w_ref, c2b_ref, ln2g_ref, ln2b_ref,
                     linw_ref, linb_ref,
                     o_ref, padd_ref, padh_ref, *, T, K, eps):
    x = x_ref[0]                        # [T, D]
    keep = keep_ref[0]                  # [T, 1]
    cols = []
    for i in range(3):                  # 0: duration, 1: pitch, 2: energy
        h = _conv_taps(padd_ref, x, c1w_ref, K, T, pred_idx=i)
        h = jnp.maximum(h + c1b_ref[i], 0.0)
        h = _ln(h, ln1g_ref[i], ln1b_ref[i], eps)
        h = _conv_taps(padh_ref, h, c2w_ref, K, T, pred_idx=i)
        h = jnp.maximum(h + c2b_ref[i], 0.0)
        h = _ln(h, ln2g_ref[i], ln2b_ref[i], eps)
        col = jnp.dot(h, linw_ref[i], preferred_element_type=jnp.float32)
        cols.append((col + linb_ref[i]) * keep)
    o_ref[0] = jnp.concatenate(cols, axis=-1)            # [T, 3]


def variance_predictors(x, keep, vp):
    B, T, D = x.shape
    HID = vp["c1_w"].shape[-1]
    K = vp["c1_w"].shape[1]
    weights = [vp["c1_w"], vp["c1_b"], vp["ln1_g"], vp["ln1_b"],
               vp["c2_w"], vp["c2_b"], vp["ln2_g"], vp["ln2_b"],
               vp["lin_w"], vp["lin_b"]]
    kern = functools.partial(_var_pred_kernel, T=T, K=K, eps=EPS)
    out = pl.pallas_call(
        kern,
        out_shape=jax.ShapeDtypeStruct((B, T, 3), jnp.float32),
        grid=(B,),
        in_specs=[pl.BlockSpec((1, T, D), lambda b: (b, 0, 0)),
                  pl.BlockSpec((1, T, 1), lambda b: (b, 0, 0))]
                 + [_rep_spec(a) for a in weights],
        out_specs=pl.BlockSpec((1, T, 3), lambda b: (b, 0, 0)),
        scratch_shapes=[pltpu.VMEM((T + K - 1, D), jnp.float32),
                        pltpu.VMEM((T + K - 1, HID), jnp.float32)],
        compiler_params=pltpu.CompilerParams(
            dimension_semantics=("parallel",)),
    )(x, keep, *weights)
    return out[..., 0], out[..., 1], out[..., 2]   # log_dur, pitch, energy


# ------------------------- fused mel linear + postnet -------------------------
def _mel_postnet_kernel(x_ref, keep_ref, melw_ref, melb_ref,
                        p0w_ref, p0b_ref, p1w_ref, p1b_ref, p2w_ref, p2b_ref,
                        o_ref, padm_ref, padh_ref, *, T, K):
    x = x_ref[0]                        # [T, D]
    keep = keep_ref[0]                  # [T, 1]
    mel = jnp.dot(x, melw_ref[...], preferred_element_type=jnp.float32) + melb_ref[...]
    # postnet: (n_mels->hidden, tanh) -> (hidden->hidden, tanh) -> (hidden->n_mels)
    # TODO(synk): BatchNorm1d of the Tacotron-style postnet omitted
    #             (eval-mode identity with default running stats).
    r = jnp.tanh(_conv_taps(padm_ref, mel, p0w_ref, K, T) + p0b_ref[...])
    r = jnp.tanh(_conv_taps(padh_ref, r, p1w_ref, K, T) + p1b_ref[...])
    r = _conv_taps(padh_ref, r, p2w_ref, K, T) + p2b_ref[...]
    o_ref[0] = (mel + r) * keep
    # Dropout layers are eval-mode identities (not applied).


def mel_postnet(x, keep, params):
    B, T, D = x.shape
    weights = [params["mel_w"], params["mel_b"],
               params["pn0_w"], params["pn0_b"],
               params["pn1_w"], params["pn1_b"],
               params["pn2_w"], params["pn2_b"]]
    kern = functools.partial(_mel_postnet_kernel, T=T, K=POSTNET_KERNEL)
    return pl.pallas_call(
        kern,
        out_shape=jax.ShapeDtypeStruct((B, T, N_MELS), jnp.float32),
        grid=(B,),
        in_specs=[pl.BlockSpec((1, T, D), lambda b: (b, 0, 0)),
                  pl.BlockSpec((1, T, 1), lambda b: (b, 0, 0))]
                 + [_rep_spec(a) for a in weights],
        out_specs=pl.BlockSpec((1, T, N_MELS), lambda b: (b, 0, 0)),
        scratch_shapes=[pltpu.VMEM((T + POSTNET_KERNEL - 1, N_MELS), jnp.float32),
                        pltpu.VMEM((T + POSTNET_KERNEL - 1, HIDDEN), jnp.float32)],
        compiler_params=pltpu.CompilerParams(
            dimension_semantics=("parallel",)),
    )(x, keep, *weights)


# ----------------------------- plain-JAX glue -----------------------------
def length_regulate(x, dur, max_len):
    """Expand phoneme frames by integer durations (gather glue)."""
    cum = jnp.cumsum(dur, axis=1)                                 # [B, T]
    mel_len = cum[:, -1]
    frame_idx = jnp.arange(max_len)
    idx = jnp.sum(frame_idx[None, :, None] >= cum[:, None, :], axis=-1)
    idx = jnp.clip(idx, 0, x.shape[1] - 1)
    out = jnp.take_along_axis(x, idx[..., None], axis=1)
    return out, mel_len


def build_positional_encoding(max_len, d):
    pos = jnp.arange(max_len, dtype=jnp.float32)[:, None]
    i = jnp.arange(d // 2, dtype=jnp.float32)[None, :]
    angle = pos / jnp.power(10000.0, 2.0 * i / d)
    pe = jnp.zeros((max_len, d), jnp.float32)
    pe = pe.at[:, 0::2].set(jnp.sin(angle))
    pe = pe.at[:, 1::2].set(jnp.cos(angle))
    return pe


# ----------------------------- full forward -----------------------------
def fastspeech2_forward(params, tokens, max_mel_len, pitch_targets=None,
                        energy_targets=None, duration_targets=None,
                        p_control=1.0, e_control=1.0, d_control=1.0):
    B, T = tokens.shape
    mask_f = (tokens == 0).astype(jnp.float32)              # 1.0 at padding
    key_mask = mask_f[:, None, :]                            # [B, 1, T]
    keep = (1.0 - mask_f)[:, :, None]                        # [B, T, 1]

    # phoneme embedding + (precomputed) positional encoding
    x = jnp.take(params["phoneme_emb"], tokens, axis=0)      # [B, T, D]
    x = x + params["pe"][None, :T]

    # encoder (fused FFT blocks)
    for blk in params["encoder"]:
        x = fft_block(x, key_mask, keep, blk)

    # variance adaptor: one fused kernel for duration/pitch/energy predictors
    log_dur_pred, pitch_pred, energy_pred = variance_predictors(x, keep, params["vp"])

    pitch_val = pitch_targets if pitch_targets is not None else pitch_pred * p_control
    energy_val = energy_targets if energy_targets is not None else energy_pred * e_control
    pitch_idx = jnp.digitize(pitch_val, params["pitch_bins"])
    energy_idx = jnp.digitize(energy_val, params["energy_bins"])
    x = x + jnp.take(params["pitch_emb"], pitch_idx, axis=0)
    x = x + jnp.take(params["energy_emb"], energy_idx, axis=0)

    if duration_targets is not None:
        dur_rounded = duration_targets
    else:
        dur_rounded = jnp.clip(
            jnp.round((jnp.exp(log_dur_pred) - 1.0) * d_control), 0.0, None
        ).astype(jnp.int32)
        dur_rounded = dur_rounded * (1 - (mask_f > 0).astype(jnp.int32))

    # length regulation (gather glue) + mel masks
    x, mel_len = length_regulate(x, dur_rounded, max_mel_len)
    mel_mask_f = (jnp.arange(max_mel_len)[None, :] >= mel_len[:, None]).astype(jnp.float32)
    mel_key_mask = mel_mask_f[:, None, :]
    mel_keep = (1.0 - mel_mask_f)[:, :, None]

    # decoder (fused FFT blocks) + fused mel linear / postnet
    x = x + params["pe"][None, :max_mel_len]
    for blk in params["decoder"]:
        x = fft_block(x, mel_key_mask, mel_keep, blk)

    mel = mel_postnet(x, mel_keep, params)
    return mel


# ----------------------------- parameter init -----------------------------
def init_params(key):
    keys = iter(jax.random.split(key, 128))

    def w(*shape, scale=0.05):
        return jax.random.normal(next(keys), shape, jnp.float32) * scale

    def fft_block_params():
        # PyTorch layouts pre-transformed for the fused kernel:
        #   wq/wk/wv [D,D] -> wqkv [D,3D];  Conv1d [Cout,Cin,k] -> tap-major [k,Cin,Cout];
        #   the 1x1 FFN conv collapses to a [HID,D] matmul.
        return dict(
            wqkv=w(D_MODEL, 3 * D_MODEL), bqkv=jnp.zeros((1, 3 * D_MODEL), jnp.float32),
            wo=w(D_MODEL, D_MODEL), bo=jnp.zeros((1, D_MODEL), jnp.float32),
            ln1_g=jnp.ones((1, D_MODEL), jnp.float32),
            ln1_b=jnp.zeros((1, D_MODEL), jnp.float32),
            c1_w=w(FFT_CONV_KERNEL, D_MODEL, HIDDEN),
            c1_b=jnp.zeros((1, HIDDEN), jnp.float32),
            c2_w=w(HIDDEN, D_MODEL), c2_b=jnp.zeros((1, D_MODEL), jnp.float32),
            ln2_g=jnp.ones((1, D_MODEL), jnp.float32),
            ln2_b=jnp.zeros((1, D_MODEL), jnp.float32),
        )

    vp = dict(  # stacked (duration, pitch, energy) predictors
        c1_w=w(3, VP_KERNEL, D_MODEL, HIDDEN),
        c1_b=jnp.zeros((3, 1, HIDDEN), jnp.float32),
        ln1_g=jnp.ones((3, 1, HIDDEN), jnp.float32),
        ln1_b=jnp.zeros((3, 1, HIDDEN), jnp.float32),
        c2_w=w(3, VP_KERNEL, HIDDEN, HIDDEN),
        c2_b=jnp.zeros((3, 1, HIDDEN), jnp.float32),
        ln2_g=jnp.ones((3, 1, HIDDEN), jnp.float32),
        ln2_b=jnp.zeros((3, 1, HIDDEN), jnp.float32),
        lin_w=w(3, HIDDEN, 1),
        lin_b=jnp.zeros((3, 1, 1), jnp.float32),
    )

    return dict(
        phoneme_emb=w(PHONEME_SIZE, D_MODEL, scale=0.1),
        pe=build_positional_encoding(MAX_POS, D_MODEL),
        encoder=[fft_block_params() for _ in range(N_LAYERS)],
        decoder=[fft_block_params() for _ in range(N_LAYERS)],
        vp=vp,
        # TODO(synk): real pitch/energy min/max come from dataset stats; synthetic range used.
        pitch_bins=jnp.linspace(-3.0, 3.0, N_BINS - 1),
        energy_bins=jnp.linspace(-3.0, 3.0, N_BINS - 1),
        pitch_emb=w(N_BINS, D_MODEL, scale=0.1),
        energy_emb=w(N_BINS, D_MODEL, scale=0.1),
        mel_w=w(D_MODEL, N_MELS), mel_b=jnp.zeros((1, N_MELS), jnp.float32),
        pn0_w=w(POSTNET_KERNEL, N_MELS, HIDDEN), pn0_b=jnp.zeros((1, HIDDEN), jnp.float32),
        pn1_w=w(POSTNET_KERNEL, HIDDEN, HIDDEN), pn1_b=jnp.zeros((1, HIDDEN), jnp.float32),
        pn2_w=w(POSTNET_KERNEL, HIDDEN, N_MELS), pn2_b=jnp.zeros((1, N_MELS), jnp.float32),
    )


# ----------------------------- main -----------------------------
if __name__ == "__main__":
    params = init_params(jax.random.PRNGKey(42))

    key = jax.random.PRNGKey(0)
    B, T = 2, 8
    max_mel_len = 16
    tokens = jnp.array([[1, 2, 3, 4, 5, 6, 7, 8],
                        [2, 4, 6, 8, 3, 5, 0, 0]], dtype=jnp.int32)
    keep_tok = (tokens != 0).astype(jnp.float32)
    kp, ke = jax.random.split(key)
    pitch_targets = jax.random.normal(kp, (B, T), jnp.float32) * keep_tok
    energy_targets = jax.random.normal(ke, (B, T), jnp.float32) * keep_tok
    duration_targets = jnp.array([[2, 2, 2, 2, 2, 2, 2, 2],
                                  [3, 3, 2, 2, 2, 2, 0, 0]], dtype=jnp.int32)

    fwd = jax.jit(fastspeech2_forward, static_argnames=("max_mel_len",))
    mel = fwd(params, tokens, max_mel_len=max_mel_len,
              pitch_targets=pitch_targets,
              energy_targets=energy_targets,
              duration_targets=duration_targets)
    jax.block_until_ready(mel)
    assert mel.shape == (B, max_mel_len, N_MELS), mel.shape
    assert bool(jnp.all(jnp.isfinite(mel)))
    print("KERNEL_OK")
</pallas_src>

<mosaic_0001>
module attributes {stable_mosaic.version = 11 : i64} {
  func.func @_fft_block_kernel(%arg0: i32, %arg1: memref<1x8x32xf32, #tpu.memory_space<vmem>>, %arg2: memref<1x1x8xf32, #tpu.memory_space<vmem>>, %arg3: memref<1x8x1xf32, #tpu.memory_space<vmem>>, %arg4: memref<32x96xf32, #tpu.memory_space<vmem>>, %arg5: memref<1x96xf32, #tpu.memory_space<vmem>>, %arg6: memref<32x32xf32, #tpu.memory_space<vmem>>, %arg7: memref<1x32xf32, #tpu.memory_space<vmem>>, %arg8: memref<1x32xf32, #tpu.memory_space<vmem>>, %arg9: memref<1x32xf32, #tpu.memory_space<vmem>>, %arg10: memref<9x32x64xf32, #tpu.memory_space<vmem>>, %arg11: memref<1x64xf32, #tpu.memory_space<vmem>>, %arg12: memref<64x32xf32, #tpu.memory_space<vmem>>, %arg13: memref<1x32xf32, #tpu.memory_space<vmem>>, %arg14: memref<1x32xf32, #tpu.memory_space<vmem>>, %arg15: memref<1x32xf32, #tpu.memory_space<vmem>>, %arg16: memref<1x8x32xf32, #tpu.memory_space<vmem>>, %arg17: memref<16x32xf32, #tpu.memory_space<vmem>>) attributes {dimension_semantics = [#tpu.dimension_semantics<parallel>], iteration_bounds = array<i64: 2>, scalar_prefetch = 0 : i64, scratch_operands = 1 : i64, tpu.core_type = #tpu.core_type<tc>, window_params = [{transform_indices = @transform_0, window_bounds = array<i64: 1, 8, 32>}, {transform_indices = @transform_1, window_bounds = array<i64: 1, 1, 8>}, {transform_indices = @transform_2, window_bounds = array<i64: 1, 8, 1>}, {pipeline_mode = #tpu.pipeline_mode<synchronous>, transform_indices = @transform_3, window_bounds = array<i64: 32, 96>}, {pipeline_mode = #tpu.pipeline_mode<synchronous>, transform_indices = @transform_4, window_bounds = array<i64: 1, 96>}, {pipeline_mode = #tpu.pipeline_mode<synchronous>, transform_indices = @transform_5, window_bounds = array<i64: 32, 32>}, {pipeline_mode = #tpu.pipeline_mode<synchronous>, transform_indices = @transform_6, window_bounds = array<i64: 1, 32>}, {pipeline_mode = #tpu.pipeline_mode<synchronous>, transform_indices = @transform_7, window_bounds = array<i64: 1, 32>}, {pipeline_mode = #tpu.pipeline_mode<synchronous>, transform_indices = @transform_8, window_bounds = array<i64: 1, 32>}, {pipeline_mode = #tpu.pipeline_mode<synchronous>, transform_indices = @transform_9, window_bounds = array<i64: 9, 32, 64>}, {pipeline_mode = #tpu.pipeline_mode<synchronous>, transform_indices = @transform_10, window_bounds = array<i64: 1, 64>}, {pipeline_mode = #tpu.pipeline_mode<synchronous>, transform_indices = @transform_11, window_bounds = array<i64: 64, 32>}, {pipeline_mode = #tpu.pipeline_mode<synchronous>, transform_indices = @transform_12, window_bounds = array<i64: 1, 32>}, {pipeline_mode = #tpu.pipeline_mode<synchronous>, transform_indices = @transform_13, window_bounds = array<i64: 1, 32>}, {pipeline_mode = #tpu.pipeline_mode<synchronous>, transform_indices = @transform_14, window_bounds = array<i64: 1, 32>}, {transform_indices = @transform_15, window_bounds = array<i64: 1, 8, 32>}]} {
    %c0 = arith.constant 0 : index
    %c0_0 = arith.constant 0 : index
    %c0_1 = arith.constant 0 : index
    %0 = vector.load %arg1[%c0, %c0_0, %c0_1] : memref<1x8x32xf32, #tpu.memory_space<vmem>>, vector<1x8x32xf32>
    %1 = vector.shape_cast %0 : vector<1x8x32xf32> to vector<8x32xf32>
    %c0_2 = arith.constant 0 : index
    %c0_3 = arith.constant 0 : index
    %c0_4 = arith.constant 0 : index
    %2 = vector.load %arg2[%c0_2, %c0_3, %c0_4] : memref<1x1x8xf32, #tpu.memory_space<vmem>>, vector<1x1x8xf32>
    %3 = vector.shape_cast %2 : vector<1x1x8xf32> to vector<1x8xf32>
    %cst = arith.constant -1.000000e+09 : f32
    %4 = vector.broadcast %cst : f32 to vector<1x8xf32>
    %5 = arith.mulf %3, %4 : vector<1x8xf32>
    %c0_5 = arith.constant 0 : index
    %c0_6 = arith.constant 0 : index
    %c0_7 = arith.constant 0 : index
    %6 = vector.load %arg3[%c0_5, %c0_6, %c0_7] : memref<1x8x1xf32, #tpu.memory_space<vmem>>, vector<1x8x1xf32>
    %7 = vector.shape_cast %6 : vector<1x8x1xf32> to vector<8x1xf32>
    %c0_8 = arith.constant 0 : index
    %c0_9 = arith.constant 0 : index
    %8 = vector.load %arg4[%c0_8, %c0_9] : memref<32x96xf32, #tpu.memory_space<vmem>>, vector<32x96xf32>
    %cst_10 = arith.constant dense<0.000000e+00> : vector<8x96xf32>
    %9 = tpu.matmul %1, %8, %cst_10 {dimension_numbers = #tpu.dot_dimension_numbers<[1], [0], [0], [1], [0, 0, 1, 1], [], []>} : vector<8x32xf32>, vector<32x96xf32>, vector<8x96xf32> -> vector<8x96xf32>
    %c0_11 = arith.constant 0 : index
    %c0_12 = arith.constant 0 : index
    %10 = vector.load %arg5[%c0_11, %c0_12] : memref<1x96xf32, #tpu.memory_space<vmem>>, vector<1x96xf32>
    %11 = vector.broadcast %10 : vector<1x96xf32> to vector<8x96xf32>
    %12 = arith.addf %9, %11 : vector<8x96xf32>
    %13 = vector.extract_strided_slice %12 {offsets = [0, 0], sizes = [8, 16], strides = [1, 1]} : vector<8x96xf32> to vector<8x16xf32>
    %cst_13 = arith.constant 2.500000e-01 : f32
    %14 = vector.broadcast %cst_13 : f32 to vector<8x16xf32>
    %15 = arith.mulf %13, %14 : vector<8x16xf32>
    %16 = vector.extract_strided_slice %12 {offsets = [0, 32], sizes = [8, 16], strides = [1, 1]} : vector<8x96xf32> to vector<8x16xf32>
    %17 = vector.extract_strided_slice %12 {offsets = [0, 64], sizes = [8, 16], strides = [1, 1]} : vector<8x96xf32> to vector<8x16xf32>
    %cst_14 = arith.constant dense<0.000000e+00> : vector<8x8xf32>
    %18 = tpu.matmul %15, %16, %cst_14 {dimension_numbers = #tpu.dot_dimension_numbers<[1], [1], [0], [0], [0, 0, 1, 0], [], []>} : vector<8x16xf32>, vector<8x16xf32>, vector<8x8xf32> -> vector<8x8xf32>
    %19 = vector.broadcast %5 : vector<1x8xf32> to vector<8x8xf32>
    %20 = arith.addf %18, %19 : vector<8x8xf32>
    %cst_15 = arith.constant dense<0xFF800000> : vector<8xf32>
    %21 = vector.multi_reduction <maximumf>, %20, %cst_15 [1] : vector<8x8xf32> to vector<8xf32>
    %22 = vector.shape_cast %21 : vector<8xf32> to vector<8x1xf32>
    %23 = vector.broadcast %22 : vector<8x1xf32> to vector<8x8xf32>
    %24 = arith.subf %20, %23 : vector<8x8xf32>
    %25 = math.exp %24 : vector<8x8xf32>
    %cst_16 = arith.constant dense<0.000000e+00> : vector<8xf32>
    %26 = vector.multi_reduction <add>, %25, %cst_16 [1] : vector<8x8xf32> to vector<8xf32>
    %27 = vector.shape_cast %26 : vector<8xf32> to vector<8x1xf32>
    %28 = tpu.reciprocal %27 {approx = true} : vector<8x1xf32> -> vector<8x1xf32>
    %29 = vector.broadcast %28 : vector<8x1xf32> to vector<8x8xf32>
    %30 = arith.mulf %25, %29 : vector<8x8xf32>
    %cst_17 = arith.constant dense<0.000000e+00> : vector<8x16xf32>
    %31 = tpu.matmul %30, %17, %cst_17 {dimension_numbers = #tpu.dot_dimension_numbers<[1], [0], [0], [1], [0, 0, 1, 1], [], []>} : vector<8x8xf32>, vector<8x16xf32>, vector<8x16xf32> -> vector<8x16xf32>
    %32 = vector.extract_strided_slice %12 {offsets = [0, 16], sizes = [8, 16], strides = [1, 1]} : vector<8x96xf32> to vector<8x16xf32>
    %cst_18 = arith.constant 2.500000e-01 : f32
    %33 = vector.broadcast %cst_18 : f32 to vector<8x16xf32>
    %34 = arith.mulf %32, %33 : vector<8x16xf32>
    %35 = vector.extract_strided_slice %12 {offsets = [0, 48], sizes = [8, 16], strides = [1, 1]} : vector<8x96xf32> to vector<8x16xf32>
    %36 = vector.extract_strided_slice %12 {offsets = [0, 80], sizes = [8, 16], strides = [1, 1]} : vector<8x96xf32> to vector<8x16xf32>
    %cst_19 = arith.constant dense<0.000000e+00> : vector<8x8xf32>
    %37 = tpu.matmul %34, %35, %cst_19 {dimension_numbers = #tpu.dot_dimension_numbers<[1], [1], [0], [0], [0, 0, 1, 0], [], []>} : vector<8x16xf32>, vector<8x16xf32>, vector<8x8xf32> -> vector<8x8xf32>
    %38 = vector.broadcast %5 : vector<1x8xf32> to vector<8x8xf32>
    %39 = arith.addf %37, %38 : vector<8x8xf32>
    %cst_20 = arith.constant dense<0xFF800000> : vector<8xf32>
    %40 = vector.multi_reduction <maximumf>, %39, %cst_20 [1] : vector<8x8xf32> to vector<8xf32>
    %41 = vector.shape_cast %40 : vector<8xf32> to vector<8x1xf32>
    %42 = vector.broadcast %41 : vector<8x1xf32> to vector<8x8xf32>
    %43 = arith.subf %39, %42 : vector<8x8xf32>
    %44 = math.exp %43 : vector<8x8xf32>
    %cst_21 = arith.constant dense<0.000000e+00> : vector<8xf32>
    %45 = vector.multi_reduction <add>, %44, %cst_21 [1] : vector<8x8xf32> to vector<8xf32>
    %46 = vector.shape_cast %45 : vector<8xf32> to vector<8x1xf32>
    %47 = tpu.reciprocal %46 {approx = true} : vector<8x1xf32> -> vector<8x1xf32>
    %48 = vector.broadcast %47 : vector<8x1xf32> to vector<8x8xf32>
    %49 = arith.mulf %44, %48 : vector<8x8xf32>
    %cst_22 = arith.constant dense<0.000000e+00> : vector<8x16xf32>
    %50 = tpu.matmul %49, %36, %cst_22 {dimension_numbers = #tpu.dot_dimension_numbers<[1], [0], [0], [1], [0, 0, 1, 1], [], []>} : vector<8x8xf32>, vector<8x16xf32>, vector<8x16xf32> -> vector<8x16xf32>
    %51 = tpu.concatenate %31, %50 in 1 : vector<8x16xf32>, vector<8x16xf32> -> vector<8x32xf32>
    %c0_23 = arith.constant 0 : index
    %c0_24 = arith.constant 0 : index
    %52 = vector.load %arg6[%c0_23, %c0_24] : memref<32x32xf32, #tpu.memory_space<vmem>>, vector<32x32xf32>
    %cst_25 = arith.constant dense<0.000000e+00> : vector<8x32xf32>
    %53 = tpu.matmul %51, %52, %cst_25 {dimension_numbers = #tpu.dot_dimension_numbers<[1], [0], [0], [1], [0, 0, 1, 1], [], []>} : vector<8x32xf32>, vector<32x32xf32>, vector<8x32xf32> -> vector<8x32xf32>
    %c0_26 = arith.constant 0 : index
    %c0_27 = arith.constant 0 : index
    %54 = vector.load %arg7[%c0_26, %c0_27] : memref<1x32xf32, #tpu.memory_space<vmem>>, vector<1x32xf32>
    %55 = vector.broadcast %54 : vector<1x32xf32> to vector<8x32xf32>
    %56 = arith.addf %53, %55 : vector<8x32xf32>
    %57 = arith.addf %56, %1 : vector<8x32xf32>
    %c0_28 = arith.constant 0 : index
    %c0_29 = arith.constant 0 : index
    %58 = vector.load %arg8[%c0_28, %c0_29] : memref<1x32xf32, #tpu.memory_space<vmem>>, vector<1x32xf32>
    %c0_30 = arith.constant 0 : index
    %c0_31 = arith.constant 0 : index
    %59 = vector.load %arg9[%c0_30, %c0_31] : memref<1x32xf32, #tpu.memory_space<vmem>>, vector<1x32xf32>
    %cst_32 = arith.constant dense<0.000000e+00> : vector<8xf32>
    %60 = vector.multi_reduction <add>, %57, %cst_32 [1] : vector<8x32xf32> to vector<8xf32>
    %61 = vector.shape_cast %60 : vector<8xf32> to vector<8x1xf32>
    %cst_33 = arith.constant 3.200000e+01 : f32
    %62 = vector.broadcast %cst_33 : f32 to vector<8x1xf32>
    %63 = arith.divf %61, %62 : vector<8x1xf32>
    %64 = vector.broadcast %63 : vector<8x1xf32> to vector<8x32xf32>
    %65 = arith.subf %57, %64 : vector<8x32xf32>
    %66 = arith.mulf %65, %65 : vector<8x32xf32>
    %cst_34 = arith.constant dense<0.000000e+00> : vector<8xf32>
    %67 = vector.multi_reduction <add>, %66, %cst_34 [1] : vector<8x32xf32> to vector<8xf32>
    %68 = vector.shape_cast %67 : vector<8xf32> to vector<8x1xf32>
    %cst_35 = arith.constant 3.200000e+01 : f32
    %69 = vector.broadcast %cst_35 : f32 to vector<8x1xf32>
    %70 = arith.divf %68, %69 : vector<8x1xf32>
    %71 = vector.broadcast %63 : vector<8x1xf32> to vector<8x32xf32>
    %72 = arith.subf %57, %71 : vector<8x32xf32>
    %cst_36 = arith.constant 9.99999997E-7 : f32
    %73 = vector.broadcast %cst_36 : f32 to vector<8x1xf32>
    %74 = arith.addf %70, %73 : vector<8x1xf32>
    %75 = math.rsqrt %74 : vector<8x1xf32>
    %76 = vector.broadcast %75 : vector<8x1xf32> to vector<8x32xf32>
    %77 = arith.mulf %72, %76 : vector<8x32xf32>
    %78 = vector.broadcast %58 : vector<1x32xf32> to vector<8x32xf32>
    %79 = arith.mulf %77, %78 : vector<8x32xf32>
    %80 = vector.broadcast %59 : vector<1x32xf32> to vector<8x32xf32>
    %81 = arith.addf %79, %80 : vector<8x32xf32>
    %82 = vector.broadcast %7 : vector<8x1xf32> to vector<8x32xf32>
    %83 = arith.mulf %81, %82 : vector<8x32xf32>
    %cst_37 = arith.constant 0.000000e+00 : f32
    %84 = vector.broadcast %cst_37 : f32 to vector<16x32xf32>
    %c0_38 = arith.constant 0 : index
    %c0_39 = arith.constant 0 : index
    %85 = vector.load %arg17[%c0_38, %c0_39] : memref<16x32xf32, #tpu.memory_space<vmem>>, vector<16x32xf32>
    tpu.vector_store %arg17[%c0_38, %c0_39], %84 {strides = array<i32>} : memref<16x32xf32, #tpu.memory_space<vmem>>, vector<16x32xf32>,
    %c4 = arith.constant 4 : index
    %c0_40 = arith.constant 0 : index
    %86 = vector.load %arg17[%c4, %c0_40] : memref<16x32xf32, #tpu.memory_space<vmem>>, vector<8x32xf32>
    tpu.vector_store %arg17[%c4, %c0_40], %83 {strides = array<i32>} : memref<16x32xf32, #tpu.memory_space<vmem>>, vector<8x32xf32>,
    %cst_41 = arith.constant 0.000000e+00 : f32
    %87 = vector.broadcast %cst_41 : f32 to vector<8x64xf32>
    %c0_42 = arith.constant 0 : index
    %c0_43 = arith.constant 0 : index
    %c0_44 = arith.constant 0 : index
    %88 = vector.load %arg10[%c0_42, %c0_43, %c0_44] : memref<9x32x64xf32, #tpu.memory_space<vmem>>, vector<1x32x64xf32>
    %89 = vector.shape_cast %88 : vector<1x32x64xf32> to vector<32x64xf32>
    %c0_45 = arith.constant 0 : index
    %c0_46 = arith.constant 0 : index
    %90 = vector.load %arg17[%c0_45, %c0_46] : memref<16x32xf32, #tpu.memory_space<vmem>>, vector<8x32xf32>
    %cst_47 = arith.constant dense<0.000000e+00> : vector<8x64xf32>
    %91 = tpu.matmul %90, %89, %cst_47 {dimension_numbers = #tpu.dot_dimension_numbers<[1], [0], [0], [1], [0, 0, 1, 1], [], []>} : vector<8x32xf32>, vector<32x64xf32>, vector<8x64xf32> -> vector<8x64xf32>
    %92 = arith.addf %87, %91 : vector<8x64xf32>
    %c1 = arith.constant 1 : index
    %c0_48 = arith.constant 0 : index
    %c0_49 = arith.constant 0 : index
    %93 = vector.load %arg10[%c1, %c0_48, %c0_49] : memref<9x32x64xf32, #tpu.memory_space<vmem>>, vector<1x32x64xf32>
    %94 = vector.shape_cast %93 : vector<1x32x64xf32> to vector<32x64xf32>
    %c1_50 = arith.constant 1 : index
    %c0_51 = arith.constant 0 : index
    %95 = vector.load %arg17[%c1_50, %c0_51] : memref<16x32xf32, #tpu.memory_space<vmem>>, vector<8x32xf32>
    %cst_52 = arith.constant dense<0.000000e+00> : vector<8x64xf32>
    %96 = tpu.matmul %95, %94, %cst_52 {dimension_numbers = #tpu.dot_dimension_numbers<[1], [0], [0], [1], [0, 0, 1, 1], [], []>} : vector<8x32xf32>, vector<32x64xf32>, vector<8x64xf32> -> vector<8x64xf32>
    %97 = arith.addf %92, %96 : vector<8x64xf32>
    %c2 = arith.constant 2 : index
    %c0_53 = arith.constant 0 : index
    %c0_54 = arith.constant 0 : index
    %98 = vector.load %arg10[%c2, %c0_53, %c0_54] : memref<9x32x64xf32, #tpu.memory_space<vmem>>, vector<1x32x64xf32>
    %99 = vector.shape_cast %98 : vector<1x32x64xf32> to vector<32x64xf32>
    %c2_55 = arith.constant 2 : index
    %c0_56 = arith.constant 0 : index
    %100 = vector.load %arg17[%c2_55, %c0_56] : memref<16x32xf32, #tpu.memory_space<vmem>>, vector<8x32xf32>
    %cst_57 = arith.constant dense<0.000000e+00> : vector<8x64xf32>
    %101 = tpu.matmul %100, %99, %cst_57 {dimension_numbers = #tpu.dot_dimension_numbers<[1], [0], [0], [1], [0, 0, 1, 1], [], []>} : vector<8x32xf32>, vector<32x64xf32>, vector<8x64xf32> -> vector<8x64xf32>
    %102 = arith.addf %97, %101 : vector<8x64xf32>
    %c3 = arith.constant 3 : index
    %c0_58 = arith.constant 0 : index
    %c0_59 = arith.constant 0 : index
    %103 = vector.load %arg10[%c3, %c0_58, %c0_59] : memref<9x32x64xf32, #tpu.memory_space<vmem>>, vector<1x32x64xf32>
    %104 = vector.shape_cast %103 : vector<1x32x64xf32> to vector<32x64xf32>
    %c3_60 = arith.constant 3 : index
    %c0_61 = arith.constant 0 : index
    %105 = vector.load %arg17[%c3_60, %c0_61] : memref<16x32xf32, #tpu.memory_space<vmem>>, vector<8x32xf32>
    %cst_62 = arith.constant dense<0.000000e+00> : vector<8x64xf32>
    %106 = tpu.matmul %105, %104, %cst_62 {dimension_numbers = #tpu.dot_dimension_numbers<[1], [0], [0], [1], [0, 0, 1, 1], [], []>} : vector<8x32xf32>, vector<32x64xf32>, vector<8x64xf32> -> vector<8x64xf32>
    %107 = arith.addf %102, %106 : vector<8x64xf32>
    %c4_63 = arith.constant 4 : index
    %c0_64 = arith.constant 0 : index
    %c0_65 = arith.constant 0 : index
    %108 = vector.load %arg10[%c4_63, %c0_64, %c0_65] : memref<9x32x64xf32, #tpu.memory_space<vmem>>, vector<1x32x64xf32>
    %109 = vector.shape_cast %108 : vector<1x32x64xf32> to vector<32x64xf32>
    %c4_66 = arith.constant 4 : index
    %c0_67 = arith.constant 0 : index
    %110 = vector.load %arg17[%c4_66, %c0_67] : memref<16x32xf32, #tpu.memory_space<vmem>>, vector<8x32xf32>
    %cst_68 = arith.constant dense<0.000000e+00> : vector<8x64xf32>
    %111 = tpu.matmul %110, %109, %cst_68 {dimension_numbers = #tpu.dot_dimension_numbers<[1], [0], [0], [1], [0, 0, 1, 1], [], []>} : vector<8x32xf32>, vector<32x64xf32>, vector<8x64xf32> -> vector<8x64xf32>
    %112 = arith.addf %107, %111 : vector<8x64xf32>
    %c5 = arith.constant 5 : index
    %c0_69 = arith.constant 0 : index
    %c0_70 = arith.constant 0 : index
    %113 = vector.load %arg10[%c5, %c0_69, %c0_70] : memref<9x32x64xf32, #tpu.memory_space<vmem>>, vector<1x32x64xf32>
    %114 = vector.shape_cast %113 : vector<1x32x64xf32> to vector<32x64xf32>
    %c5_71 = arith.constant 5 : index
    %c0_72 = arith.constant 0 : index
    %115 = vector.load %arg17[%c5_71, %c0_72] : memref<16x32xf32, #tpu.memory_space<vmem>>, vector<8x32xf32>
    %cst_73 = arith.constant dense<0.000000e+00> : vector<8x64xf32>
    %116 = tpu.matmul %115, %114, %cst_73 {dimension_numbers = #tpu.dot_dimension_numbers<[1], [0], [0], [1], [0, 0, 1, 1], [], []>} : vector<8x32xf32>, vector<32x64xf32>, vector<8x64xf32> -> vector<8x64xf32>
    %117 = arith.addf %112, %116 : vector<8x64xf32>
    %c6 = arith.constant 6 : index
    %c0_74 = arith.constant 0 : index
    %c0_75 = arith.constant 0 : index
    %118 = vector.load %arg10[%c6, %c0_74, %c0_75] : memref<9x32x64xf32, #tpu.memory_space<vmem>>, vector<1x32x64xf32>
    %119 = vector.shape_cast %118 : vector<1x32x64xf32> to vector<32x64xf32>
    %c6_76 = arith.constant 6 : index
    %c0_77 = arith.constant 0 : index
    %120 = vector.load %arg17[%c6_76, %c0_77] : memref<16x32xf32, #tpu.memory_space<vmem>>, vector<8x32xf32>
    %cst_78 = arith.constant dense<0.000000e+00> : vector<8x64xf32>
    %121 = tpu.matmul %120, %119, %cst_78 {dimension_numbers = #tpu.dot_dimension_numbers<[1], [0], [0], [1], [0, 0, 1, 1], [], []>} : vector<8x32xf32>, vector<32x64xf32>, vector<8x64xf32> -> vector<8x64xf32>
    %122 = arith.addf %117, %121 : vector<8x64xf32>
    %c7 = arith.constant 7 : index
    %c0_79 = arith.constant 0 : index
    %c0_80 = arith.constant 0 : index
    %123 = vector.load %arg10[%c7, %c0_79, %c0_80] : memref<9x32x64xf32, #tpu.memory_space<vmem>>, vector<1x32x64xf32>
    %124 = vector.shape_cast %123 : vector<1x32x64xf32> to vector<32x64xf32>
    %c7_81 = arith.constant 7 : index
    %c0_82 = arith.constant 0 : index
    %125 = vector.load %arg17[%c7_81, %c0_82] : memref<16x32xf32, #tpu.memory_space<vmem>>, vector<8x32xf32>
    %cst_83 = arith.constant dense<0.000000e+00> : vector<8x64xf32>
    %126 = tpu.matmul %125, %124, %cst_83 {dimension_numbers = #tpu.dot_dimension_numbers<[1], [0], [0], [1], [0, 0, 1, 1], [], []>} : vector<8x32xf32>, vector<32x64xf32>, vector<8x64xf32> -> vector<8x64xf32>
    %127 = arith.addf %122, %126 : vector<8x64xf32>
    %c8 = arith.constant 8 : index
    %c0_84 = arith.constant 0 : index
    %c0_85 = arith.constant 0 : index
    %128 = vector.load %arg10[%c8, %c0_84, %c0_85] : memref<9x32x64xf32, #tpu.memory_space<vmem>>, vector<1x32x64xf32>
    %129 = vector.shape_cast %128 : vector<1x32x64xf32> to vector<32x64xf32>
    %c8_86 = arith.constant 8 : index
    %c0_87 = arith.constant 0 : index
    %130 = vector.load %arg17[%c8_86, %c0_87] : memref<16x32xf32, #tpu.memory_space<vmem>>, vector<8x32xf32>
    %cst_88 = arith.constant dense<0.000000e+00> : vector<8x64xf32>
    %131 = tpu.matmul %130, %129, %cst_88 {dimension_numbers = #tpu.dot_dimension_numbers<[1], [0], [0], [1], [0, 0, 1, 1], [], []>} : vector<8x32xf32>, vector<32x64xf32>, vector<8x64xf32> -> vector<8x64xf32>
    %132 = arith.addf %127, %131 : vector<8x64xf32>
    %c0_89 = arith.constant 0 : index
    %c0_90 = arith.constant 0 : index
    %133 = vector.load %arg11[%c0_89, %c0_90] : memref<1x64xf32, #tpu.memory_space<vmem>>, vector<1x64xf32>
    %134 = vector.broadcast %133 : vector<1x64xf32> to vector<8x64xf32>
    %135 = arith.addf %132, %134 : vector<8x64xf32>
    %cst_91 = arith.constant 0.000000e+00 : f32
    %136 = vector.broadcast %cst_91 : f32 to vector<8x64xf32>
    %137 = arith.maximumf %135, %136 : vector<8x64xf32>
    %c0_92 = arith.constant 0 : index
    %c0_93 = arith.constant 0 : index
    %138 = vector.load %arg12[%c0_92, %c0_93] : memref<64x32xf32, #tpu.memory_space<vmem>>, vector<64x32xf32>
    %cst_94 = arith.constant dense<0.000000e+00> : vector<8x32xf32>
    %139 = tpu.matmul %137, %138, %cst_94 {dimension_numbers = #tpu.dot_dimension_numbers<[1], [0], [0], [1], [0, 0, 1, 1], [], []>} : vector<8x64xf32>, vector<64x32xf32>, vector<8x32xf32> -> vector<8x32xf32>
    %c0_95 = arith.constant 0 : index
    %c0_96 = arith.constant 0 : index
    %140 = vector.load %arg13[%c0_95, %c0_96] : memref<1x32xf32, #tpu.memory_space<vmem>>, vector<1x32xf32>
    %141 = vector.broadcast %140 : vector<1x32xf32> to vector<8x32xf32>
    %142 = arith.addf %139, %141 : vector<8x32xf32>
    %143 = arith.addf %142, %83 : vector<8x32xf32>
    %c0_97 = arith.constant 0 : index
    %c0_98 = arith.constant 0 : index
    %144 = vector.load %arg14[%c0_97, %c0_98] : memref<1x32xf32, #tpu.memory_space<vmem>>, vector<1x32xf32>
    %c0_99 = arith.constant 0 : index
    %c0_100 = arith.constant 0 : index
    %145 = vector.load %arg15[%c0_99, %c0_100] : memref<1x32xf32, #tpu.memory_space<vmem>>, vector<1x32xf32>
    %cst_101 = arith.constant dense<0.000000e+00> : vector<8xf32>
    %146 = vector.multi_reduction <add>, %143, %cst_101 [1] : vector<8x32xf32> to vector<8xf32>
    %147 = vector.shape_cast %146 : vector<8xf32> to vector<8x1xf32>
    %cst_102 = arith.constant 3.200000e+01 : f32
    %148 = vector.broadcast %cst_102 : f32 to vector<8x1xf32>
    %149 = arith.divf %147, %148 : vector<8x1xf32>
    %150 = vector.broadcast %149 : vector<8x1xf32> to vector<8x32xf32>
    %151 = arith.subf %143, %150 : vector<8x32xf32>
    %152 = arith.mulf %151, %151 : vector<8x32xf32>
    %cst_103 = arith.constant dense<0.000000e+00> : vector<8xf32>
    %153 = vector.multi_reduction <add>, %152, %cst_103 [1] : vector<8x32xf32> to vector<8xf32>
    %154 = vector.shape_cast %153 : vector<8xf32> to vector<8x1xf32>
    %cst_104 = arith.constant 3.200000e+01 : f32
    %155 = vector.broadcast %cst_104 : f32 to vector<8x1xf32>
    %156 = arith.divf %154, %155 : vector<8x1xf32>
    %157 = vector.broadcast %149 : vector<8x1xf32> to vector<8x32xf32>
    %158 = arith.subf %143, %157 : vector<8x32xf32>
    %cst_105 = arith.constant 9.99999997E-7 : f32
    %159 = vector.broadcast %cst_105 : f32 to vector<8x1xf32>
    %160 = arith.addf %156, %159 : vector<8x1xf32>
    %161 = math.rsqrt %160 : vector<8x1xf32>
    %162 = vector.broadcast %161 : vector<8x1xf32> to vector<8x32xf32>
    %163 = arith.mulf %158, %162 : vector<8x32xf32>
    %164 = vector.broadcast %144 : vector<1x32xf32> to vector<8x32xf32>
    %165 = arith.mulf %163, %164 : vector<8x32xf32>
    %166 = vector.broadcast %145 : vector<1x32xf32> to vector<8x32xf32>
    %167 = arith.addf %165, %166 : vector<8x32xf32>
    %168 = vector.broadcast %7 : vector<8x1xf32> to vector<8x32xf32>
    %169 = arith.mulf %167, %168 : vector<8x32xf32>
    %c0_106 = arith.constant 0 : index
    %c0_107 = arith.constant 0 : index
    %c0_108 = arith.constant 0 : index
    %170 = vector.load %arg16[%c0_106, %c0_107, %c0_108] : memref<1x8x32xf32, #tpu.memory_space<vmem>>, vector<1x8x32xf32>
    %171 = vector.shape_cast %170 : vector<1x8x32xf32> to vector<8x32xf32>
    %172 = vector.shape_cast %169 : vector<8x32xf32> to vector<1x8x32xf32>
    tpu.vector_store %arg16[%c0_106, %c0_107, %c0_108], %172 {strides = array<i32>} : memref<1x8x32xf32, #tpu.memory_space<vmem>>, vector<1x8x32xf32>,
    return
  }
  func.func @transform_0(%arg0: i32) -> (i32, i32, i32) {
    %c0_i32 = arith.constant 0 : i32
    %c0_i32_0 = arith.constant 0 : i32
    %c0_i32_1 = arith.constant 0 : i32
    return %arg0, %c0_i32, %c0_i32_0 : i32, i32, i32
  }
  func.func @transform_1(%arg0: i32) -> (i32, i32, i32) {
    %c0_i32 = arith.constant 0 : i32
    %c0_i32_0 = arith.constant 0 : i32
    %c0_i32_1 = arith.constant 0 : i32
    return %arg0, %c0_i32, %c0_i32_0 : i32, i32, i32
  }
  func.func @transform_2(%arg0: i32) -> (i32, i32, i32) {
    %c0_i32 = arith.constant 0 : i32
    %c0_i32_0 = arith.constant 0 : i32
    %c0_i32_1 = arith.constant 0 : i32
    return %arg0, %c0_i32, %c0_i32_0 : i32, i32, i32
  }
  func.func @transform_3(%arg0: i32) -> (i32, i32) {
    %c0_i32 = arith.constant 0 : i32
    %c0_i32_0 = arith.constant 0 : i32
    %c0_i32_1 = arith.constant 0 : i32
    return %c0_i32, %c0_i32_0 : i32, i32
  }
  func.func @transform_4(%arg0: i32) -> (i32, i32) {
    %c0_i32 = arith.constant 0 : i32
    %c0_i32_0 = arith.constant 0 : i32
    %c0_i32_1 = arith.constant 0 : i32
    return %c0_i32, %c0_i32_0 : i32, i32
  }
  func.func @transform_5(%arg0: i32) -> (i32, i32) {
    %c0_i32 = arith.constant 0 : i32
    %c0_i32_0 = arith.constant 0 : i32
    %c0_i32_1 = arith.constant 0 : i32
    return %c0_i32, %c0_i32_0 : i32, i32
  }
  func.func @transform_6(%arg0: i32) -> (i32, i32) {
    %c0_i32 = arith.constant 0 : i32
    %c0_i32_0 = arith.constant 0 : i32
    %c0_i32_1 = arith.constant 0 : i32
    return %c0_i32, %c0_i32_0 : i32, i32
  }
  func.func @transform_7(%arg0: i32) -> (i32, i32) {
    %c0_i32 = arith.constant 0 : i32
    %c0_i32_0 = arith.constant 0 : i32
    %c0_i32_1 = arith.constant 0 : i32
    return %c0_i32, %c0_i32_0 : i32, i32
  }
  func.func @transform_8(%arg0: i32) -> (i32, i32) {
    %c0_i32 = arith.constant 0 : i32
    %c0_i32_0 = arith.constant 0 : i32
    %c0_i32_1 = arith.constant 0 : i32
    return %c0_i32, %c0_i32_0 : i32, i32
  }
  func.func @transform_9(%arg0: i32) -> (i32, i32, i32) {
    %c0_i32 = arith.constant 0 : i32
    %c0_i32_0 = arith.constant 0 : i32
    %c0_i32_1 = arith.constant 0 : i32
    %c0_i32_2 = arith.constant 0 : i32
    return %c0_i32, %c0_i32_0, %c0_i32_1 : i32, i32, i32
  }
  func.func @transform_10(%arg0: i32) -> (i32, i32) {
    %c0_i32 = arith.constant 0 : i32
    %c0_i32_0 = arith.constant 0 : i32
    %c0_i32_1 = arith.constant 0 : i32
    return %c0_i32, %c0_i32_0 : i32, i32
  }
  func.func @transform_11(%arg0: i32) -> (i32, i32) {
    %c0_i32 = arith.constant 0 : i32
    %c0_i32_0 = arith.constant 0 : i32
    %c0_i32_1 = arith.constant 0 : i32
    return %c0_i32, %c0_i32_0 : i32, i32
  }
  func.func @transform_12(%arg0: i32) -> (i32, i32) {
    %c0_i32 = arith.constant 0 : i32
    %c0_i32_0 = arith.constant 0 : i32
    %c0_i32_1 = arith.constant 0 : i32
    return %c0_i32, %c0_i32_0 : i32, i32
  }
  func.func @transform_13(%arg0: i32) -> (i32, i32) {
    %c0_i32 = arith.constant 0 : i32
    %c0_i32_0 = arith.constant 0 : i32
    %c0_i32_1 = arith.constant 0 : i32
    return %c0_i32, %c0_i32_0 : i32, i32
  }
  func.func @transform_14(%arg0: i32) -> (i32, i32) {
    %c0_i32 = arith.constant 0 : i32
    %c0_i32_0 = arith.constant 0 : i32
    %c0_i32_1 = arith.constant 0 : i32
    return %c0_i32, %c0_i32_0 : i32, i32
  }
  func.func @transform_15(%arg0: i32) -> (i32, i32, i32) {
    %c0_i32 = arith.constant 0 : i32
    %c0_i32_0 = arith.constant 0 : i32
    %c0_i32_1 = arith.constant 0 : i32
    return %arg0, %c0_i32, %c0_i32_0 : i32, i32, i32
  }
}

module attributes {stable_mosaic.version = 11 : i64} {
  func.func @_fft_block_kernel(%arg0: i32, %arg1: memref<1x16x32xf32, #tpu.memory_space<vmem>>, %arg2: memref<1x1x16xf32, #tpu.memory_space<vmem>>, %arg3: memref<1x16x1xf32, #tpu.memory_space<vmem>>, %arg4: memref<32x96xf32, #tpu.memory_space<vmem>>, %arg5: memref<1x96xf32, #tpu.memory_space<vmem>>, %arg6: memref<32x32xf32, #tpu.memory_space<vmem>>, %arg7: memref<1x32xf32, #tpu.memory_space<vmem>>, %arg8: memref<1x32xf32, #tpu.memory_space<vmem>>, %arg9: memref<1x32xf32, #tpu.memory_space<vmem>>, %arg10: memref<9x32x64xf32, #tpu.memory_space<vmem>>, %arg11: memref<1x64xf32, #tpu.memory_space<vmem>>, %arg12: memref<64x32xf32, #tpu.memory_space<vmem>>, %arg13: memref<1x32xf32, #tpu.memory_space<vmem>>, %arg14: memref<1x32xf32, #tpu.memory_space<vmem>>, %arg15: memref<1x32xf32, #tpu.memory_space<vmem>>, %arg16: memref<1x16x32xf32, #tpu.memory_space<vmem>>, %arg17: memref<24x32xf32, #tpu.memory_space<vmem>>) attributes {dimension_semantics = [#tpu.dimension_semantics<parallel>], iteration_bounds = array<i64: 2>, scalar_prefetch = 0 : i64, scratch_operands = 1 : i64, tpu.core_type = #tpu.core_type<tc>, window_params = [{transform_indices = @transform_0, window_bounds = array<i64: 1, 16, 32>}, {transform_indices = @transform_1, window_bounds = array<i64: 1, 1, 16>}, {transform_indices = @transform_2, window_bounds = array<i64: 1, 16, 1>}, {pipeline_mode = #tpu.pipeline_mode<synchronous>, transform_indices = @transform_3, window_bounds = array<i64: 32, 96>}, {pipeline_mode = #tpu.pipeline_mode<synchronous>, transform_indices = @transform_4, window_bounds = array<i64: 1, 96>}, {pipeline_mode = #tpu.pipeline_mode<synchronous>, transform_indices = @transform_5, window_bounds = array<i64: 32, 32>}, {pipeline_mode = #tpu.pipeline_mode<synchronous>, transform_indices = @transform_6, window_bounds = array<i64: 1, 32>}, {pipeline_mode = #tpu.pipeline_mode<synchronous>, transform_indices = @transform_7, window_bounds = array<i64: 1, 32>}, {pipeline_mode = #tpu.pipeline_mode<synchronous>, transform_indices = @transform_8, window_bounds = array<i64: 1, 32>}, {pipeline_mode = #tpu.pipeline_mode<synchronous>, transform_indices = @transform_9, window_bounds = array<i64: 9, 32, 64>}, {pipeline_mode = #tpu.pipeline_mode<synchronous>, transform_indices = @transform_10, window_bounds = array<i64: 1, 64>}, {pipeline_mode = #tpu.pipeline_mode<synchronous>, transform_indices = @transform_11, window_bounds = array<i64: 64, 32>}, {pipeline_mode = #tpu.pipeline_mode<synchronous>, transform_indices = @transform_12, window_bounds = array<i64: 1, 32>}, {pipeline_mode = #tpu.pipeline_mode<synchronous>, transform_indices = @transform_13, window_bounds = array<i64: 1, 32>}, {pipeline_mode = #tpu.pipeline_mode<synchronous>, transform_indices = @transform_14, window_bounds = array<i64: 1, 32>}, {transform_indices = @transform_15, window_bounds = array<i64: 1, 16, 32>}]} {
    %c0 = arith.constant 0 : index
    %c0_0 = arith.constant 0 : index
    %c0_1 = arith.constant 0 : index
    %0 = vector.load %arg1[%c0, %c0_0, %c0_1] : memref<1x16x32xf32, #tpu.memory_space<vmem>>, vector<1x16x32xf32>
    %1 = vector.shape_cast %0 : vector<1x16x32xf32> to vector<16x32xf32>
    %c0_2 = arith.constant 0 : index
    %c0_3 = arith.constant 0 : index
    %c0_4 = arith.constant 0 : index
    %2 = vector.load %arg2[%c0_2, %c0_3, %c0_4] : memref<1x1x16xf32, #tpu.memory_space<vmem>>, vector<1x1x16xf32>
    %3 = vector.shape_cast %2 : vector<1x1x16xf32> to vector<1x16xf32>
    %cst = arith.constant -1.000000e+09 : f32
    %4 = vector.broadcast %cst : f32 to vector<1x16xf32>
    %5 = arith.mulf %3, %4 : vector<1x16xf32>
    %c0_5 = arith.constant 0 : index
    %c0_6 = arith.constant 0 : index
    %c0_7 = arith.constant 0 : index
    %6 = vector.load %arg3[%c0_5, %c0_6, %c0_7] : memref<1x16x1xf32, #tpu.memory_space<vmem>>, vector<1x16x1xf32>
    %7 = vector.shape_cast %6 : vector<1x16x1xf32> to vector<16x1xf32>
    %c0_8 = arith.constant 0 : index
    %c0_9 = arith.constant 0 : index
    %8 = vector.load %arg4[%c0_8, %c0_9] : memref<32x96xf32, #tpu.memory_space<vmem>>, vector<32x96xf32>
    %cst_10 = arith.constant dense<0.000000e+00> : vector<16x96xf32>
    %9 = tpu.matmul %1, %8, %cst_10 {dimension_numbers = #tpu.dot_dimension_numbers<[1], [0], [0], [1], [0, 0, 1, 1], [], []>} : vector<16x32xf32>, vector<32x96xf32>, vector<16x96xf32> -> vector<16x96xf32>
    %c0_11 = arith.constant 0 : index
    %c0_12 = arith.constant 0 : index
    %10 = vector.load %arg5[%c0_11, %c0_12] : memref<1x96xf32, #tpu.memory_space<vmem>>, vector<1x96xf32>
    %11 = vector.broadcast %10 : vector<1x96xf32> to vector<16x96xf32>
    %12 = arith.addf %9, %11 : vector<16x96xf32>
    %13 = vector.extract_strided_slice %12 {offsets = [0, 0], sizes = [16, 16], strides = [1, 1]} : vector<16x96xf32> to vector<16x16xf32>
    %cst_13 = arith.constant 2.500000e-01 : f32
    %14 = vector.broadcast %cst_13 : f32 to vector<16x16xf32>
    %15 = arith.mulf %13, %14 : vector<16x16xf32>
    %16 = vector.extract_strided_slice %12 {offsets = [0, 32], sizes = [16, 16], strides = [1, 1]} : vector<16x96xf32> to vector<16x16xf32>
    %17 = vector.extract_strided_slice %12 {offsets = [0, 64], sizes = [16, 16], strides = [1, 1]} : vector<16x96xf32> to vector<16x16xf32>
    %cst_14 = arith.constant dense<0.000000e+00> : vector<16x16xf32>
    %18 = tpu.matmul %15, %16, %cst_14 {dimension_numbers = #tpu.dot_dimension_numbers<[1], [1], [0], [0], [0, 0, 1, 0], [], []>} : vector<16x16xf32>, vector<16x16xf32>, vector<16x16xf32> -> vector<16x16xf32>
    %19 = vector.broadcast %5 : vector<1x16xf32> to vector<16x16xf32>
    %20 = arith.addf %18, %19 : vector<16x16xf32>
    %cst_15 = arith.constant dense<0xFF800000> : vector<16xf32>
    %21 = vector.multi_reduction <maximumf>, %20, %cst_15 [1] : vector<16x16xf32> to vector<16xf32>
    %22 = vector.shape_cast %21 : vector<16xf32> to vector<16x1xf32>
    %23 = vector.broadcast %22 : vector<16x1xf32> to vector<16x16xf32>
    %24 = arith.subf %20, %23 : vector<16x16xf32>
    %25 = math.exp %24 : vector<16x16xf32>
    %cst_16 = arith.constant dense<0.000000e+00> : vector<16xf32>
    %26 = vector.multi_reduction <add>, %25, %cst_16 [1] : vector<16x16xf32> to vector<16xf32>
    %27 = vector.shape_cast %26 : vector<16xf32> to vector<16x1xf32>
    %28 = tpu.reciprocal %27 {approx = true} : vector<16x1xf32> -> vector<16x1xf32>
    %29 = vector.broadcast %28 : vector<16x1xf32> to vector<16x16xf32>
    %30 = arith.mulf %25, %29 : vector<16x16xf32>
    %cst_17 = arith.constant dense<0.000000e+00> : vector<16x16xf32>
    %31 = tpu.matmul %30, %17, %cst_17 {dimension_numbers = #tpu.dot_dimension_numbers<[1], [0], [0], [1], [0, 0, 1, 1], [], []>} : vector<16x16xf32>, vector<16x16xf32>, vector<16x16xf32> -> vector<16x16xf32>
    %32 = vector.extract_strided_slice %12 {offsets = [0, 16], sizes = [16, 16], strides = [1, 1]} : vector<16x96xf32> to vector<16x16xf32>
    %cst_18 = arith.constant 2.500000e-01 : f32
    %33 = vector.broadcast %cst_18 : f32 to vector<16x16xf32>
    %34 = arith.mulf %32, %33 : vector<16x16xf32>
    %35 = vector.extract_strided_slice %12 {offsets = [0, 48], sizes = [16, 16], strides = [1, 1]} : vector<16x96xf32> to vector<16x16xf32>
    %36 = vector.extract_strided_slice %12 {offsets = [0, 80], sizes = [16, 16], strides = [1, 1]} : vector<16x96xf32> to vector<16x16xf32>
    %cst_19 = arith.constant dense<0.000000e+00> : vector<16x16xf32>
    %37 = tpu.matmul %34, %35, %cst_19 {dimension_numbers = #tpu.dot_dimension_numbers<[1], [1], [0], [0], [0, 0, 1, 0], [], []>} : vector<16x16xf32>, vector<16x16xf32>, vector<16x16xf32> -> vector<16x16xf32>
    %38 = vector.broadcast %5 : vector<1x16xf32> to vector<16x16xf32>
    %39 = arith.addf %37, %38 : vector<16x16xf32>
    %cst_20 = arith.constant dense<0xFF800000> : vector<16xf32>
    %40 = vector.multi_reduction <maximumf>, %39, %cst_20 [1] : vector<16x16xf32> to vector<16xf32>
    %41 = vector.shape_cast %40 : vector<16xf32> to vector<16x1xf32>
    %42 = vector.broadcast %41 : vector<16x1xf32> to vector<16x16xf32>
    %43 = arith.subf %39, %42 : vector<16x16xf32>
    %44 = math.exp %43 : vector<16x16xf32>
    %cst_21 = arith.constant dense<0.000000e+00> : vector<16xf32>
    %45 = vector.multi_reduction <add>, %44, %cst_21 [1] : vector<16x16xf32> to vector<16xf32>
    %46 = vector.shape_cast %45 : vector<16xf32> to vector<16x1xf32>
    %47 = tpu.reciprocal %46 {approx = true} : vector<16x1xf32> -> vector<16x1xf32>
    %48 = vector.broadcast %47 : vector<16x1xf32> to vector<16x16xf32>
    %49 = arith.mulf %44, %48 : vector<16x16xf32>
    %cst_22 = arith.constant dense<0.000000e+00> : vector<16x16xf32>
    %50 = tpu.matmul %49, %36, %cst_22 {dimension_numbers = #tpu.dot_dimension_numbers<[1], [0], [0], [1], [0, 0, 1, 1], [], []>} : vector<16x16xf32>, vector<16x16xf32>, vector<16x16xf32> -> vector<16x16xf32>
    %51 = tpu.concatenate %31, %50 in 1 : vector<16x16xf32>, vector<16x16xf32> -> vector<16x32xf32>
    %c0_23 = arith.constant 0 : index
    %c0_24 = arith.constant 0 : index
    %52 = vector.load %arg6[%c0_23, %c0_24] : memref<32x32xf32, #tpu.memory_space<vmem>>, vector<32x32xf32>
    %cst_25 = arith.constant dense<0.000000e+00> : vector<16x32xf32>
    %53 = tpu.matmul %51, %52, %cst_25 {dimension_numbers = #tpu.dot_dimension_numbers<[1], [0], [0], [1], [0, 0, 1, 1], [], []>} : vector<16x32xf32>, vector<32x32xf32>, vector<16x32xf32> -> vector<16x32xf32>
    %c0_26 = arith.constant 0 : index
    %c0_27 = arith.constant 0 : index
    %54 = vector.load %arg7[%c0_26, %c0_27] : memref<1x32xf32, #tpu.memory_space<vmem>>, vector<1x32xf32>
    %55 = vector.broadcast %54 : vector<1x32xf32> to vector<16x32xf32>
    %56 = arith.addf %53, %55 : vector<16x32xf32>
    %57 = arith.addf %56, %1 : vector<16x32xf32>
    %c0_28 = arith.constant 0 : index
    %c0_29 = arith.constant 0 : index
    %58 = vector.load %arg8[%c0_28, %c0_29] : memref<1x32xf32, #tpu.memory_space<vmem>>, vector<1x32xf32>
    %c0_30 = arith.constant 0 : index
    %c0_31 = arith.constant 0 : index
    %59 = vector.load %arg9[%c0_30, %c0_31] : memref<1x32xf32, #tpu.memory_space<vmem>>, vector<1x32xf32>
    %cst_32 = arith.constant dense<0.000000e+00> : vector<16xf32>
    %60 = vector.multi_reduction <add>, %57, %cst_32 [1] : vector<16x32xf32> to vector<16xf32>
    %61 = vector.shape_cast %60 : vector<16xf32> to vector<16x1xf32>
    %cst_33 = arith.constant 3.200000e+01 : f32
    %62 = vector.broadcast %cst_33 : f32 to vector<16x1xf32>
    %63 = arith.divf %61, %62 : vector<16x1xf32>
    %64 = vector.broadcast %63 : vector<16x1xf32> to vector<16x32xf32>
    %65 = arith.subf %57, %64 : vector<16x32xf32>
    %66 = arith.mulf %65, %65 : vector<16x32xf32>
    %cst_34 = arith.constant dense<0.000000e+00> : vector<16xf32>
    %67 = vector.multi_reduction <add>, %66, %cst_34 [1] : vector<16x32xf32> to vector<16xf32>
    %68 = vector.shape_cast %67 : vector<16xf32> to vector<16x1xf32>
    %cst_35 = arith.constant 3.200000e+01 : f32
    %69 = vector.broadcast %cst_35 : f32 to vector<16x1xf32>
    %70 = arith.divf %68, %69 : vector<16x1xf32>
    %71 = vector.broadcast %63 : vector<16x1xf32> to vector<16x32xf32>
    %72 = arith.subf %57, %71 : vector<16x32xf32>
    %cst_36 = arith.constant 9.99999997E-7 : f32
    %73 = vector.broadcast %cst_36 : f32 to vector<16x1xf32>
    %74 = arith.addf %70, %73 : vector<16x1xf32>
    %75 = math.rsqrt %74 : vector<16x1xf32>
    %76 = vector.broadcast %75 : vector<16x1xf32> to vector<16x32xf32>
    %77 = arith.mulf %72, %76 : vector<16x32xf32>
    %78 = vector.broadcast %58 : vector<1x32xf32> to vector<16x32xf32>
    %79 = arith.mulf %77, %78 : vector<16x32xf32>
    %80 = vector.broadcast %59 : vector<1x32xf32> to vector<16x32xf32>
    %81 = arith.addf %79, %80 : vector<16x32xf32>
    %82 = vector.broadcast %7 : vector<16x1xf32> to vector<16x32xf32>
    %83 = arith.mulf %81, %82 : vector<16x32xf32>
    %cst_37 = arith.constant 0.000000e+00 : f32
    %84 = vector.broadcast %cst_37 : f32 to vector<24x32xf32>
    %c0_38 = arith.constant 0 : index
    %c0_39 = arith.constant 0 : index
    %85 = vector.load %arg17[%c0_38, %c0_39] : memref<24x32xf32, #tpu.memory_space<vmem>>, vector<24x32xf32>
    tpu.vector_store %arg17[%c0_38, %c0_39], %84 {strides = array<i32>} : memref<24x32xf32, #tpu.memory_space<vmem>>, vector<24x32xf32>,
    %c4 = arith.constant 4 : index
    %c0_40 = arith.constant 0 : index
    %86 = vector.load %arg17[%c4, %c0_40] : memref<24x32xf32, #tpu.memory_space<vmem>>, vector<16x32xf32>
    tpu.vector_store %arg17[%c4, %c0_40], %83 {strides = array<i32>} : memref<24x32xf32, #tpu.memory_space<vmem>>, vector<16x32xf32>,
    %cst_41 = arith.constant 0.000000e+00 : f32
    %87 = vector.broadcast %cst_41 : f32 to vector<16x64xf32>
    %c0_42 = arith.constant 0 : index
    %c0_43 = arith.constant 0 : index
    %c0_44 = arith.constant 0 : index
    %88 = vector.load %arg10[%c0_42, %c0_43, %c0_44] : memref<9x32x64xf32, #tpu.memory_space<vmem>>, vector<1x32x64xf32>
    %89 = vector.shape_cast %88 : vector<1x32x64xf32> to vector<32x64xf32>
    %c0_45 = arith.constant 0 : index
    %c0_46 = arith.constant 0 : index
    %90 = vector.load %arg17[%c0_45, %c0_46] : memref<24x32xf32, #tpu.memory_space<vmem>>, vector<16x32xf32>
    %cst_47 = arith.constant dense<0.000000e+00> : vector<16x64xf32>
    %91 = tpu.matmul %90, %89, %cst_47 {dimension_numbers = #tpu.dot_dimension_numbers<[1], [0], [0], [1], [0, 0, 1, 1], [], []>} : vector<16x32xf32>, vector<32x64xf32>, vector<16x64xf32> -> vector<16x64xf32>
    %92 = arith.addf %87, %91 : vector<16x64xf32>
    %c1 = arith.constant 1 : index
    %c0_48 = arith.constant 0 : index
    %c0_49 = arith.constant 0 : index
    %93 = vector.load %arg10[%c1, %c0_48, %c0_49] : memref<9x32x64xf32, #tpu.memory_space<vmem>>, vector<1x32x64xf32>
    %94 = vector.shape_cast %93 : vector<1x32x64xf32> to vector<32x64xf32>
    %c1_50 = arith.constant 1 : index
    %c0_51 = arith.constant 0 : index
    %95 = vector.load %arg17[%c1_50, %c0_51] : memref<24x32xf32, #tpu.memory_space<vmem>>, vector<16x32xf32>
    %cst_52 = arith.constant dense<0.000000e+00> : vector<16x64xf32>
    %96 = tpu.matmul %95, %94, %cst_52 {dimension_numbers = #tpu.dot_dimension_numbers<[1], [0], [0], [1], [0, 0, 1, 1], [], []>} : vector<16x32xf32>, vector<32x64xf32>, vector<16x64xf32> -> vector<16x64xf32>
    %97 = arith.addf %92, %96 : vector<16x64xf32>
    %c2 = arith.constant 2 : index
    %c0_53 = arith.constant 0 : index
    %c0_54 = arith.constant 0 : index
    %98 = vector.load %arg10[%c2, %c0_53, %c0_54] : memref<9x32x64xf32, #tpu.memory_space<vmem>>, vector<1x32x64xf32>
    %99 = vector.shape_cast %98 : vector<1x32x64xf32> to vector<32x64xf32>
    %c2_55 = arith.constant 2 : index
    %c0_56 = arith.constant 0 : index
    %100 = vector.load %arg17[%c2_55, %c0_56] : memref<24x32xf32, #tpu.memory_space<vmem>>, vector<16x32xf32>
    %cst_57 = arith.constant dense<0.000000e+00> : vector<16x64xf32>
    %101 = tpu.matmul %100, %99, %cst_57 {dimension_numbers = #tpu.dot_dimension_numbers<[1], [0], [0], [1], [0, 0, 1, 1], [], []>} : vector<16x32xf32>, vector<32x64xf32>, vector<16x64xf32> -> vector<16x64xf32>
    %102 = arith.addf %97, %101 : vector<16x64xf32>
    %c3 = arith.constant 3 : index
    %c0_58 = arith.constant 0 : index
    %c0_59 = arith.constant 0 : index
    %103 = vector.load %arg10[%c3, %c0_58, %c0_59] : memref<9x32x64xf32, #tpu.memory_space<vmem>>, vector<1x32x64xf32>
    %104 = vector.shape_cast %103 : vector<1x32x64xf32> to vector<32x64xf32>
    %c3_60 = arith.constant 3 : index
    %c0_61 = arith.constant 0 : index
    %105 = vector.load %arg17[%c3_60, %c0_61] : memref<24x32xf32, #tpu.memory_space<vmem>>, vector<16x32xf32>
    %cst_62 = arith.constant dense<0.000000e+00> : vector<16x64xf32>
    %106 = tpu.matmul %105, %104, %cst_62 {dimension_numbers = #tpu.dot_dimension_numbers<[1], [0], [0], [1], [0, 0, 1, 1], [], []>} : vector<16x32xf32>, vector<32x64xf32>, vector<16x64xf32> -> vector<16x64xf32>
    %107 = arith.addf %102, %106 : vector<16x64xf32>
    %c4_63 = arith.constant 4 : index
    %c0_64 = arith.constant 0 : index
    %c0_65 = arith.constant 0 : index
    %108 = vector.load %arg10[%c4_63, %c0_64, %c0_65] : memref<9x32x64xf32, #tpu.memory_space<vmem>>, vector<1x32x64xf32>
    %109 = vector.shape_cast %108 : vector<1x32x64xf32> to vector<32x64xf32>
    %c4_66 = arith.constant 4 : index
    %c0_67 = arith.constant 0 : index
    %110 = vector.load %arg17[%c4_66, %c0_67] : memref<24x32xf32, #tpu.memory_space<vmem>>, vector<16x32xf32>
    %cst_68 = arith.constant dense<0.000000e+00> : vector<16x64xf32>
    %111 = tpu.matmul %110, %109, %cst_68 {dimension_numbers = #tpu.dot_dimension_numbers<[1], [0], [0], [1], [0, 0, 1, 1], [], []>} : vector<16x32xf32>, vector<32x64xf32>, vector<16x64xf32> -> vector<16x64xf32>
    %112 = arith.addf %107, %111 : vector<16x64xf32>
    %c5 = arith.constant 5 : index
    %c0_69 = arith.constant 0 : index
    %c0_70 = arith.constant 0 : index
    %113 = vector.load %arg10[%c5, %c0_69, %c0_70] : memref<9x32x64xf32, #tpu.memory_space<vmem>>, vector<1x32x64xf32>
    %114 = vector.shape_cast %113 : vector<1x32x64xf32> to vector<32x64xf32>
    %c5_71 = arith.constant 5 : index
    %c0_72 = arith.constant 0 : index
    %115 = vector.load %arg17[%c5_71, %c0_72] : memref<24x32xf32, #tpu.memory_space<vmem>>, vector<16x32xf32>
    %cst_73 = arith.constant dense<0.000000e+00> : vector<16x64xf32>
    %116 = tpu.matmul %115, %114, %cst_73 {dimension_numbers = #tpu.dot_dimension_numbers<[1], [0], [0], [1], [0, 0, 1, 1], [], []>} : vector<16x32xf32>, vector<32x64xf32>, vector<16x64xf32> -> vector<16x64xf32>
    %117 = arith.addf %112, %116 : vector<16x64xf32>
    %c6 = arith.constant 6 : index
    %c0_74 = arith.constant 0 : index
    %c0_75 = arith.constant 0 : index
    %118 = vector.load %arg10[%c6, %c0_74, %c0_75] : memref<9x32x64xf32, #tpu.memory_space<vmem>>, vector<1x32x64xf32>
    %119 = vector.shape_cast %118 : vector<1x32x64xf32> to vector<32x64xf32>
    %c6_76 = arith.constant 6 : index
    %c0_77 = arith.constant 0 : index
    %120 = vector.load %arg17[%c6_76, %c0_77] : memref<24x32xf32, #tpu.memory_space<vmem>>, vector<16x32xf32>
    %cst_78 = arith.constant dense<0.000000e+00> : vector<16x64xf32>
    %121 = tpu.matmul %120, %119, %cst_78 {dimension_numbers = #tpu.dot_dimension_numbers<[1], [0], [0], [1], [0, 0, 1, 1], [], []>} : vector<16x32xf32>, vector<32x64xf32>, vector<16x64xf32> -> vector<16x64xf32>
    %122 = arith.addf %117, %121 : vector<16x64xf32>
    %c7 = arith.constant 7 : index
    %c0_79 = arith.constant 0 : index
    %c0_80 = arith.constant 0 : index
    %123 = vector.load %arg10[%c7, %c0_79, %c0_80] : memref<9x32x64xf32, #tpu.memory_space<vmem>>, vector<1x32x64xf32>
    %124 = vector.shape_cast %123 : vector<1x32x64xf32> to vector<32x64xf32>
    %c7_81 = arith.constant 7 : index
    %c0_82 = arith.constant 0 : index
    %125 = vector.load %arg17[%c7_81, %c0_82] : memref<24x32xf32, #tpu.memory_space<vmem>>, vector<16x32xf32>
    %cst_83 = arith.constant dense<0.000000e+00> : vector<16x64xf32>
    %126 = tpu.matmul %125, %124, %cst_83 {dimension_numbers = #tpu.dot_dimension_numbers<[1], [0], [0], [1], [0, 0, 1, 1], [], []>} : vector<16x32xf32>, vector<32x64xf32>, vector<16x64xf32> -> vector<16x64xf32>
    %127 = arith.addf %122, %126 : vector<16x64xf32>
    %c8 = arith.constant 8 : index
    %c0_84 = arith.constant 0 : index
    %c0_85 = arith.constant 0 : index
    %128 = vector.load %arg10[%c8, %c0_84, %c0_85] : memref<9x32x64xf32, #tpu.memory_space<vmem>>, vector<1x32x64xf32>
    %129 = vector.shape_cast %128 : vector<1x32x64xf32> to vector<32x64xf32>
    %c8_86 = arith.constant 8 : index
    %c0_87 = arith.constant 0 : index
    %130 = vector.load %arg17[%c8_86, %c0_87] : memref<24x32xf32, #tpu.memory_space<vmem>>, vector<16x32xf32>
    %cst_88 = arith.constant dense<0.000000e+00> : vector<16x64xf32>
    %131 = tpu.matmul %130, %129, %cst_88 {dimension_numbers = #tpu.dot_dimension_numbers<[1], [0], [0], [1], [0, 0, 1, 1], [], []>} : vector<16x32xf32>, vector<32x64xf32>, vector<16x64xf32> -> vector<16x64xf32>
    %132 = arith.addf %127, %131 : vector<16x64xf32>
    %c0_89 = arith.constant 0 : index
    %c0_90 = arith.constant 0 : index
    %133 = vector.load %arg11[%c0_89, %c0_90] : memref<1x64xf32, #tpu.memory_space<vmem>>, vector<1x64xf32>
    %134 = vector.broadcast %133 : vector<1x64xf32> to vector<16x64xf32>
    %135 = arith.addf %132, %134 : vector<16x64xf32>
    %cst_91 = arith.constant 0.000000e+00 : f32
    %136 = vector.broadcast %cst_91 : f32 to vector<16x64xf32>
    %137 = arith.maximumf %135, %136 : vector<16x64xf32>
    %c0_92 = arith.constant 0 : index
    %c0_93 = arith.constant 0 : index
    %138 = vector.load %arg12[%c0_92, %c0_93] : memref<64x32xf32, #tpu.memory_space<vmem>>, vector<64x32xf32>
    %cst_94 = arith.constant dense<0.000000e+00> : vector<16x32xf32>
    %139 = tpu.matmul %137, %138, %cst_94 {dimension_numbers = #tpu.dot_dimension_numbers<[1], [0], [0], [1], [0, 0, 1, 1], [], []>} : vector<16x64xf32>, vector<64x32xf32>, vector<16x32xf32> -> vector<16x32xf32>
    %c0_95 = arith.constant 0 : index
    %c0_96 = arith.constant 0 : index
    %140 = vector.load %arg13[%c0_95, %c0_96] : memref<1x32xf32, #tpu.memory_space<vmem>>, vector<1x32xf32>
    %141 = vector.broadcast %140 : vector<1x32xf32> to vector<16x32xf32>
    %142 = arith.addf %139, %141 : vector<16x32xf32>
    %143 = arith.addf %142, %83 : vector<16x32xf32>
    %c0_97 = arith.constant 0 : index
    %c0_98 = arith.constant 0 : index
    %144 = vector.load %arg14[%c0_97, %c0_98] : memref<1x32xf32, #tpu.memory_space<vmem>>, vector<1x32xf32>
    %c0_99 = arith.constant 0 : index
    %c0_100 = arith.constant 0 : index
    %145 = vector.load %arg15[%c0_99, %c0_100] : memref<1x32xf32, #tpu.memory_space<vmem>>, vector<1x32xf32>
    %cst_101 = arith.constant dense<0.000000e+00> : vector<16xf32>
    %146 = vector.multi_reduction <add>, %143, %cst_101 [1] : vector<16x32xf32> to vector<16xf32>
    %147 = vector.shape_cast %146 : vector<16xf32> to vector<16x1xf32>
    %cst_102 = arith.constant 3.200000e+01 : f32
    %148 = vector.broadcast %cst_102 : f32 to vector<16x1xf32>
    %149 = arith.divf %147, %148 : vector<16x1xf32>
    %150 = vector.broadcast %149 : vector<16x1xf32> to vector<16x32xf32>
    %151 = arith.subf %143, %150 : vector<16x32xf32>
    %152 = arith.mulf %151, %151 : vector<16x32xf32>
    %cst_103 = arith.constant dense<0.000000e+00> : vector<16xf32>
    %153 = vector.multi_reduction <add>, %152, %cst_103 [1] : vector<16x32xf32> to vector<16xf32>
    %154 = vector.shape_cast %153 : vector<16xf32> to vector<16x1xf32>
    %cst_104 = arith.constant 3.200000e+01 : f32
    %155 = vector.broadcast %cst_104 : f32 to vector<16x1xf32>
    %156 = arith.divf %154, %155 : vector<16x1xf32>
    %157 = vector.broadcast %149 : vector<16x1xf32> to vector<16x32xf32>
    %158 = arith.subf %143, %157 : vector<16x32xf32>
    %cst_105 = arith.constant 9.99999997E-7 : f32
    %159 = vector.broadcast %cst_105 : f32 to vector<16x1xf32>
    %160 = arith.addf %156, %159 : vector<16x1xf32>
    %161 = math.rsqrt %160 : vector<16x1xf32>
    %162 = vector.broadcast %161 : vector<16x1xf32> to vector<16x32xf32>
    %163 = arith.mulf %158, %162 : vector<16x32xf32>
    %164 = vector.broadcast %144 : vector<1x32xf32> to vector<16x32xf32>
    %165 = arith.mulf %163, %164 : vector<16x32xf32>
    %166 = vector.broadcast %145 : vector<1x32xf32> to vector<16x32xf32>
    %167 = arith.addf %165, %166 : vector<16x32xf32>
    %168 = vector.broadcast %7 : vector<16x1xf32> to vector<16x32xf32>
    %169 = arith.mulf %167, %168 : vector<16x32xf32>
    %c0_106 = arith.constant 0 : index
    %c0_107 = arith.constant 0 : index
    %c0_108 = arith.constant 0 : index
    %170 = vector.load %arg16[%c0_106, %c0_107, %c0_108] : memref<1x16x32xf32, #tpu.memory_space<vmem>>, vector<1x16x32xf32>
    %171 = vector.shape_cast %170 : vector<1x16x32xf32> to vector<16x32xf32>
    %172 = vector.shape_cast %169 : vector<16x32xf32> to vector<1x16x32xf32>
    tpu.vector_store %arg16[%c0_106, %c0_107, %c0_108], %172 {strides = array<i32>} : memref<1x16x32xf32, #tpu.memory_space<vmem>>, vector<1x16x32xf32>,
    return
  }
  func.func @transform_0(%arg0: i32) -> (i32, i32, i32) {
    %c0_i32 = arith.constant 0 : i32
    %c0_i32_0 = arith.constant 0 : i32
    %c0_i32_1 = arith.constant 0 : i32
    return %arg0, %c0_i32, %c0_i32_0 : i32, i32, i32
  }
  func.func @transform_1(%arg0: i32) -> (i32, i32, i32) {
    %c0_i32 = arith.constant 0 : i32
    %c0_i32_0 = arith.constant 0 : i32
    %c0_i32_1 = arith.constant 0 : i32
    return %arg0, %c0_i32, %c0_i32_0 : i32, i32, i32
  }
  func.func @transform_2(%arg0: i32) -> (i32, i32, i32) {
    %c0_i32 = arith.constant 0 : i32
    %c0_i32_0 = arith.constant 0 : i32
    %c0_i32_1 = arith.constant 0 : i32
    return %arg0, %c0_i32, %c0_i32_0 : i32, i32, i32
  }
  func.func @transform_3(%arg0: i32) -> (i32, i32) {
    %c0_i32 = arith.constant 0 : i32
    %c0_i32_0 = arith.constant 0 : i32
    %c0_i32_1 = arith.constant 0 : i32
    return %c0_i32, %c0_i32_0 : i32, i32
  }
  func.func @transform_4(%arg0: i32) -> (i32, i32) {
    %c0_i32 = arith.constant 0 : i32
    %c0_i32_0 = arith.constant 0 : i32
    %c0_i32_1 = arith.constant 0 : i32
    return %c0_i32, %c0_i32_0 : i32, i32
  }
  func.func @transform_5(%arg0: i32) -> (i32, i32) {
    %c0_i32 = arith.constant 0 : i32
    %c0_i32_0 = arith.constant 0 : i32
    %c0_i32_1 = arith.constant 0 : i32
    return %c0_i32, %c0_i32_0 : i32, i32
  }
  func.func @transform_6(%arg0: i32) -> (i32, i32) {
    %c0_i32 = arith.constant 0 : i32
    %c0_i32_0 = arith.constant 0 : i32
    %c0_i32_1 = arith.constant 0 : i32
    return %c0_i32, %c0_i32_0 : i32, i32
  }
  func.func @transform_7(%arg0: i32) -> (i32, i32) {
    %c0_i32 = arith.constant 0 : i32
    %c0_i32_0 = arith.constant 0 : i32
    %c0_i32_1 = arith.constant 0 : i32
    return %c0_i32, %c0_i32_0 : i32, i32
  }
  func.func @transform_8(%arg0: i32) -> (i32, i32) {
    %c0_i32 = arith.constant 0 : i32
    %c0_i32_0 = arith.constant 0 : i32
    %c0_i32_1 = arith.constant 0 : i32
    return %c0_i32, %c0_i32_0 : i32, i32
  }
  func.func @transform_9(%arg0: i32) -> (i32, i32, i32) {
    %c0_i32 = arith.constant 0 : i32
    %c0_i32_0 = arith.constant 0 : i32
    %c0_i32_1 = arith.constant 0 : i32
    %c0_i32_2 = arith.constant 0 : i32
    return %c0_i32, %c0_i32_0, %c0_i32_1 : i32, i32, i32
  }
  func.func @transform_10(%arg0: i32) -> (i32, i32) {
    %c0_i32 = arith.constant 0 : i32
    %c0_i32_0 = arith.constant 0 : i32
    %c0_i32_1 = arith.constant 0 : i32
    return %c0_i32, %c0_i32_0 : i32, i32
  }
  func.func @transform_11(%arg0: i32) -> (i32, i32) {
    %c0_i32 = arith.constant 0 : i32
    %c0_i32_0 = arith.constant 0 : i32
    %c0_i32_1 = arith.constant 0 : i32
    return %c0_i32, %c0_i32_0 : i32, i32
  }
  func.func @transform_12(%arg0: i32) -> (i32, i32) {
    %c0_i32 = arith.constant 0 : i32
    %c0_i32_0 = arith.constant 0 : i32
    %c0_i32_1 = arith.constant 0 : i32
    return %c0_i32, %c0_i32_0 : i32, i32
  }
  func.func @transform_13(%arg0: i32) -> (i32, i32) {
    %c0_i32 = arith.constant 0 : i32
    %c0_i32_0 = arith.constant 0 : i32
    %c0_i32_1 = arith.constant 0 : i32
    return %c0_i32, %c0_i32_0 : i32, i32
  }
  func.func @transform_14(%arg0: i32) -> (i32, i32) {
    %c0_i32 = arith.constant 0 : i32
    %c0_i32_0 = arith.constant 0 : i32
    %c0_i32_1 = arith.constant 0 : i32
    return %c0_i32, %c0_i32_0 : i32, i32
  }
  func.func @transform_15(%arg0: i32) -> (i32, i32, i32) {
    %c0_i32 = arith.constant 0 : i32
    %c0_i32_0 = arith.constant 0 : i32
    %c0_i32_1 = arith.constant 0 : i32
    return %arg0, %c0_i32, %c0_i32_0 : i32, i32, i32
  }
}

module attributes {stable_mosaic.version = 11 : i64} {
  func.func @_fft_block_kernel(%arg0: i32, %arg1: memref<1x16x32xf32, #tpu.memory_space<vmem>>, %arg2: memref<1x1x16xf32, #tpu.memory_space<vmem>>, %arg3: memref<1x16x1xf32, #tpu.memory_space<vmem>>, %arg4: memref<32x96xf32, #tpu.memory_space<vmem>>, %arg5: memref<1x96xf32, #tpu.memory_space<vmem>>, %arg6: memref<32x32xf32, #tpu.memory_space<vmem>>, %arg7: memref<1x32xf32, #tpu.memory_space<vmem>>, %arg8: memref<1x32xf32, #tpu.memory_space<vmem>>, %arg9: memref<1x32xf32, #tpu.memory_space<vmem>>, %arg10: memref<9x32x64xf32, #tpu.memory_space<vmem>>, %arg11: memref<1x64xf32, #tpu.memory_space<vmem>>, %arg12: memref<64x32xf32, #tpu.memory_space<vmem>>, %arg13: memref<1x32xf32, #tpu.memory_space<vmem>>, %arg14: memref<1x32xf32, #tpu.memory_space<vmem>>, %arg15: memref<1x32xf32, #tpu.memory_space<vmem>>, %arg16: memref<1x16x32xf32, #tpu.memory_space<vmem>>, %arg17: memref<24x32xf32, #tpu.memory_space<vmem>>) attributes {dimension_semantics = [#tpu.dimension_semantics<parallel>], iteration_bounds = array<i64: 2>, scalar_prefetch = 0 : i64, scratch_operands = 1 : i64, tpu.core_type = #tpu.core_type<tc>, window_params = [{transform_indices = @transform_0, window_bounds = array<i64: 1, 16, 32>}, {transform_indices = @transform_1, window_bounds = array<i64: 1, 1, 16>}, {transform_indices = @transform_2, window_bounds = array<i64: 1, 16, 1>}, {pipeline_mode = #tpu.pipeline_mode<synchronous>, transform_indices = @transform_3, window_bounds = array<i64: 32, 96>}, {pipeline_mode = #tpu.pipeline_mode<synchronous>, transform_indices = @transform_4, window_bounds = array<i64: 1, 96>}, {pipeline_mode = #tpu.pipeline_mode<synchronous>, transform_indices = @transform_5, window_bounds = array<i64: 32, 32>}, {pipeline_mode = #tpu.pipeline_mode<synchronous>, transform_indices = @transform_6, window_bounds = array<i64: 1, 32>}, {pipeline_mode = #tpu.pipeline_mode<synchronous>, transform_indices = @transform_7, window_bounds = array<i64: 1, 32>}, {pipeline_mode = #tpu.pipeline_mode<synchronous>, transform_indices = @transform_8, window_bounds = array<i64: 1, 32>}, {pipeline_mode = #tpu.pipeline_mode<synchronous>, transform_indices = @transform_9, window_bounds = array<i64: 9, 32, 64>}, {pipeline_mode = #tpu.pipeline_mode<synchronous>, transform_indices = @transform_10, window_bounds = array<i64: 1, 64>}, {pipeline_mode = #tpu.pipeline_mode<synchronous>, transform_indices = @transform_11, window_bounds = array<i64: 64, 32>}, {pipeline_mode = #tpu.pipeline_mode<synchronous>, transform_indices = @transform_12, window_bounds = array<i64: 1, 32>}, {pipeline_mode = #tpu.pipeline_mode<synchronous>, transform_indices = @transform_13, window_bounds = array<i64: 1, 32>}, {pipeline_mode = #tpu.pipeline_mode<synchronous>, transform_indices = @transform_14, window_bounds = array<i64: 1, 32>}, {transform_indices = @transform_15, window_bounds = array<i64: 1, 16, 32>}]} {
    %c0 = arith.constant 0 : index
    %c0_0 = arith.constant 0 : index
    %c0_1 = arith.constant 0 : index
    %0 = vector.load %arg1[%c0, %c0_0, %c0_1] : memref<1x16x32xf32, #tpu.memory_space<vmem>>, vector<1x16x32xf32>
    %1 = vector.shape_cast %0 : vector<1x16x32xf32> to vector<16x32xf32>
    %c0_2 = arith.constant 0 : index
    %c0_3 = arith.constant 0 : index
    %c0_4 = arith.constant 0 : index
    %2 = vector.load %arg2[%c0_2, %c0_3, %c0_4] : memref<1x1x16xf32, #tpu.memory_space<vmem>>, vector<1x1x16xf32>
    %3 = vector.shape_cast %2 : vector<1x1x16xf32> to vector<1x16xf32>
    %cst = arith.constant -1.000000e+09 : f32
    %4 = vector.broadcast %cst : f32 to vector<1x16xf32>
    %5 = arith.mulf %3, %4 : vector<1x16xf32>
    %c0_5 = arith.constant 0 : index
    %c0_6 = arith.constant 0 : index
    %c0_7 = arith.constant 0 : index
    %6 = vector.load %arg3[%c0_5, %c0_6, %c0_7] : memref<1x16x1xf32, #tpu.memory_space<vmem>>, vector<1x16x1xf32>
    %7 = vector.shape_cast %6 : vector<1x16x1xf32> to vector<16x1xf32>
    %c0_8 = arith.constant 0 : index
    %c0_9 = arith.constant 0 : index
    %8 = vector.load %arg4[%c0_8, %c0_9] : memref<32x96xf32, #tpu.memory_space<vmem>>, vector<32x96xf32>
    %cst_10 = arith.constant dense<0.000000e+00> : vector<16x96xf32>
    %9 = tpu.matmul %1, %8, %cst_10 {dimension_numbers = #tpu.dot_dimension_numbers<[1], [0], [0], [1], [0, 0, 1, 1], [], []>} : vector<16x32xf32>, vector<32x96xf32>, vector<16x96xf32> -> vector<16x96xf32>
    %c0_11 = arith.constant 0 : index
    %c0_12 = arith.constant 0 : index
    %10 = vector.load %arg5[%c0_11, %c0_12] : memref<1x96xf32, #tpu.memory_space<vmem>>, vector<1x96xf32>
    %11 = vector.broadcast %10 : vector<1x96xf32> to vector<16x96xf32>
    %12 = arith.addf %9, %11 : vector<16x96xf32>
    %13 = vector.extract_strided_slice %12 {offsets = [0, 0], sizes = [16, 16], strides = [1, 1]} : vector<16x96xf32> to vector<16x16xf32>
    %cst_13 = arith.constant 2.500000e-01 : f32
    %14 = vector.broadcast %cst_13 : f32 to vector<16x16xf32>
    %15 = arith.mulf %13, %14 : vector<16x16xf32>
    %16 = vector.extract_strided_slice %12 {offsets = [0, 32], sizes = [16, 16], strides = [1, 1]} : vector<16x96xf32> to vector<16x16xf32>
    %17 = vector.extract_strided_slice %12 {offsets = [0, 64], sizes = [16, 16], strides = [1, 1]} : vector<16x96xf32> to vector<16x16xf32>
    %cst_14 = arith.constant dense<0.000000e+00> : vector<16x16xf32>
    %18 = tpu.matmul %15, %16, %cst_14 {dimension_numbers = #tpu.dot_dimension_numbers<[1], [1], [0], [0], [0, 0, 1, 0], [], []>} : vector<16x16xf32>, vector<16x16xf32>, vector<16x16xf32> -> vector<16x16xf32>
    %19 = vector.broadcast %5 : vector<1x16xf32> to vector<16x16xf32>
    %20 = arith.addf %18, %19 : vector<16x16xf32>
    %cst_15 = arith.constant dense<0xFF800000> : vector<16xf32>
    %21 = vector.multi_reduction <maximumf>, %20, %cst_15 [1] : vector<16x16xf32> to vector<16xf32>
    %22 = vector.shape_cast %21 : vector<16xf32> to vector<16x1xf32>
    %23 = vector.broadcast %22 : vector<16x1xf32> to vector<16x16xf32>
    %24 = arith.subf %20, %23 : vector<16x16xf32>
    %25 = math.exp %24 : vector<16x16xf32>
    %cst_16 = arith.constant dense<0.000000e+00> : vector<16xf32>
    %26 = vector.multi_reduction <add>, %25, %cst_16 [1] : vector<16x16xf32> to vector<16xf32>
    %27 = vector.shape_cast %26 : vector<16xf32> to vector<16x1xf32>
    %28 = tpu.reciprocal %27 {approx = true} : vector<16x1xf32> -> vector<16x1xf32>
    %29 = vector.broadcast %28 : vector<16x1xf32> to vector<16x16xf32>
    %30 = arith.mulf %25, %29 : vector<16x16xf32>
    %cst_17 = arith.constant dense<0.000000e+00> : vector<16x16xf32>
    %31 = tpu.matmul %30, %17, %cst_17 {dimension_numbers = #tpu.dot_dimension_numbers<[1], [0], [0], [1], [0, 0, 1, 1], [], []>} : vector<16x16xf32>, vector<16x16xf32>, vector<16x16xf32> -> vector<16x16xf32>
    %32 = vector.extract_strided_slice %12 {offsets = [0, 16], sizes = [16, 16], strides = [1, 1]} : vector<16x96xf32> to vector<16x16xf32>
    %cst_18 = arith.constant 2.500000e-01 : f32
    %33 = vector.broadcast %cst_18 : f32 to vector<16x16xf32>
    %34 = arith.mulf %32, %33 : vector<16x16xf32>
    %35 = vector.extract_strided_slice %12 {offsets = [0, 48], sizes = [16, 16], strides = [1, 1]} : vector<16x96xf32> to vector<16x16xf32>
    %36 = vector.extract_strided_slice %12 {offsets = [0, 80], sizes = [16, 16], strides = [1, 1]} : vector<16x96xf32> to vector<16x16xf32>
    %cst_19 = arith.constant dense<0.000000e+00> : vector<16x16xf32>
    %37 = tpu.matmul %34, %35, %cst_19 {dimension_numbers = #tpu.dot_dimension_numbers<[1], [1], [0], [0], [0, 0, 1, 0], [], []>} : vector<16x16xf32>, vector<16x16xf32>, vector<16x16xf32> -> vector<16x16xf32>
    %38 = vector.broadcast %5 : vector<1x16xf32> to vector<16x16xf32>
    %39 = arith.addf %37, %38 : vector<16x16xf32>
    %cst_20 = arith.constant dense<0xFF800000> : vector<16xf32>
    %40 = vector.multi_reduction <maximumf>, %39, %cst_20 [1] : vector<16x16xf32> to vector<16xf32>
    %41 = vector.shape_cast %40 : vector<16xf32> to vector<16x1xf32>
    %42 = vector.broadcast %41 : vector<16x1xf32> to vector<16x16xf32>
    %43 = arith.subf %39, %42 : vector<16x16xf32>
    %44 = math.exp %43 : vector<16x16xf32>
    %cst_21 = arith.constant dense<0.000000e+00> : vector<16xf32>
    %45 = vector.multi_reduction <add>, %44, %cst_21 [1] : vector<16x16xf32> to vector<16xf32>
    %46 = vector.shape_cast %45 : vector<16xf32> to vector<16x1xf32>
    %47 = tpu.reciprocal %46 {approx = true} : vector<16x1xf32> -> vector<16x1xf32>
    %48 = vector.broadcast %47 : vector<16x1xf32> to vector<16x16xf32>
    %49 = arith.mulf %44, %48 : vector<16x16xf32>
    %cst_22 = arith.constant dense<0.000000e+00> : vector<16x16xf32>
    %50 = tpu.matmul %49, %36, %cst_22 {dimension_numbers = #tpu.dot_dimension_numbers<[1], [0], [0], [1], [0, 0, 1, 1], [], []>} : vector<16x16xf32>, vector<16x16xf32>, vector<16x16xf32> -> vector<16x16xf32>
    %51 = tpu.concatenate %31, %50 in 1 : vector<16x16xf32>, vector<16x16xf32> -> vector<16x32xf32>
    %c0_23 = arith.constant 0 : index
    %c0_24 = arith.constant 0 : index
    %52 = vector.load %arg6[%c0_23, %c0_24] : memref<32x32xf32, #tpu.memory_space<vmem>>, vector<32x32xf32>
    %cst_25 = arith.constant dense<0.000000e+00> : vector<16x32xf32>
    %53 = tpu.matmul %51, %52, %cst_25 {dimension_numbers = #tpu.dot_dimension_numbers<[1], [0], [0], [1], [0, 0, 1, 1], [], []>} : vector<16x32xf32>, vector<32x32xf32>, vector<16x32xf32> -> vector<16x32xf32>
    %c0_26 = arith.constant 0 : index
    %c0_27 = arith.constant 0 : index
    %54 = vector.load %arg7[%c0_26, %c0_27] : memref<1x32xf32, #tpu.memory_space<vmem>>, vector<1x32xf32>
    %55 = vector.broadcast %54 : vector<1x32xf32> to vector<16x32xf32>
    %56 = arith.addf %53, %55 : vector<16x32xf32>
    %57 = arith.addf %56, %1 : vector<16x32xf32>
    %c0_28 = arith.constant 0 : index
    %c0_29 = arith.constant 0 : index
    %58 = vector.load %arg8[%c0_28, %c0_29] : memref<1x32xf32, #tpu.memory_space<vmem>>, vector<1x32xf32>
    %c0_30 = arith.constant 0 : index
    %c0_31 = arith.constant 0 : index
    %59 = vector.load %arg9[%c0_30, %c0_31] : memref<1x32xf32, #tpu.memory_space<vmem>>, vector<1x32xf32>
    %cst_32 = arith.constant dense<0.000000e+00> : vector<16xf32>
    %60 = vector.multi_reduction <add>, %57, %cst_32 [1] : vector<16x32xf32> to vector<16xf32>
    %61 = vector.shape_cast %60 : vector<16xf32> to vector<16x1xf32>
    %cst_33 = arith.constant 3.200000e+01 : f32
    %62 = vector.broadcast %cst_33 : f32 to vector<16x1xf32>
    %63 = arith.divf %61, %62 : vector<16x1xf32>
    %64 = vector.broadcast %63 : vector<16x1xf32> to vector<16x32xf32>
    %65 = arith.subf %57, %64 : vector<16x32xf32>
    %66 = arith.mulf %65, %65 : vector<16x32xf32>
    %cst_34 = arith.constant dense<0.000000e+00> : vector<16xf32>
    %67 = vector.multi_reduction <add>, %66, %cst_34 [1] : vector<16x32xf32> to vector<16xf32>
    %68 = vector.shape_cast %67 : vector<16xf32> to vector<16x1xf32>
    %cst_35 = arith.constant 3.200000e+01 : f32
    %69 = vector.broadcast %cst_35 : f32 to vector<16x1xf32>
    %70 = arith.divf %68, %69 : vector<16x1xf32>
    %71 = vector.broadcast %63 : vector<16x1xf32> to vector<16x32xf32>
    %72 = arith.subf %57, %71 : vector<16x32xf32>
    %cst_36 = arith.constant 9.99999997E-7 : f32
    %73 = vector.broadcast %cst_36 : f32 to vector<16x1xf32>
    %74 = arith.addf %70, %73 : vector<16x1xf32>
    %75 = math.rsqrt %74 : vector<16x1xf32>
    %76 = vector.broadcast %75 : vector<16x1xf32> to vector<16x32xf32>
    %77 = arith.mulf %72, %76 : vector<16x32xf32>
    %78 = vector.broadcast %58 : vector<1x32xf32> to vector<16x32xf32>
    %79 = arith.mulf %77, %78 : vector<16x32xf32>
    %80 = vector.broadcast %59 : vector<1x32xf32> to vector<16x32xf32>
    %81 = arith.addf %79, %80 : vector<16x32xf32>
    %82 = vector.broadcast %7 : vector<16x1xf32> to vector<16x32xf32>
    %83 = arith.mulf %81, %82 : vector<16x32xf32>
    %cst_37 = arith.constant 0.000000e+00 : f32
    %84 = vector.broadcast %cst_37 : f32 to vector<24x32xf32>
    %c0_38 = arith.constant 0 : index
    %c0_39 = arith.constant 0 : index
    %85 = vector.load %arg17[%c0_38, %c0_39] : memref<24x32xf32, #tpu.memory_space<vmem>>, vector<24x32xf32>
    tpu.vector_store %arg17[%c0_38, %c0_39], %84 {strides = array<i32>} : memref<24x32xf32, #tpu.memory_space<vmem>>, vector<24x32xf32>,
    %c4 = arith.constant 4 : index
    %c0_40 = arith.constant 0 : index
    %86 = vector.load %arg17[%c4, %c0_40] : memref<24x32xf32, #tpu.memory_space<vmem>>, vector<16x32xf32>
    tpu.vector_store %arg17[%c4, %c0_40], %83 {strides = array<i32>} : memref<24x32xf32, #tpu.memory_space<vmem>>, vector<16x32xf32>,
    %cst_41 = arith.constant 0.000000e+00 : f32
    %87 = vector.broadcast %cst_41 : f32 to vector<16x64xf32>
    %c0_42 = arith.constant 0 : index
    %c0_43 = arith.constant 0 : index
    %c0_44 = arith.constant 0 : index
    %88 = vector.load %arg10[%c0_42, %c0_43, %c0_44] : memref<9x32x64xf32, #tpu.memory_space<vmem>>, vector<1x32x64xf32>
    %89 = vector.shape_cast %88 : vector<1x32x64xf32> to vector<32x64xf32>
    %c0_45 = arith.constant 0 : index
    %c0_46 = arith.constant 0 : index
    %90 = vector.load %arg17[%c0_45, %c0_46] : memref<24x32xf32, #tpu.memory_space<vmem>>, vector<16x32xf32>
    %cst_47 = arith.constant dense<0.000000e+00> : vector<16x64xf32>
    %91 = tpu.matmul %90, %89, %cst_47 {dimension_numbers = #tpu.dot_dimension_numbers<[1], [0], [0], [1], [0, 0, 1, 1], [], []>} : vector<16x32xf32>, vector<32x64xf32>, vector<16x64xf32> -> vector<16x64xf32>
    %92 = arith.addf %87, %91 : vector<16x64xf32>
    %c1 = arith.constant 1 : index
    %c0_48 = arith.constant 0 : index
    %c0_49 = arith.constant 0 : index
    %93 = vector.load %arg10[%c1, %c0_48, %c0_49] : memref<9x32x64xf32, #tpu.memory_space<vmem>>, vector<1x32x64xf32>
    %94 = vector.shape_cast %93 : vector<1x32x64xf32> to vector<32x64xf32>
    %c1_50 = arith.constant 1 : index
    %c0_51 = arith.constant 0 : index
    %95 = vector.load %arg17[%c1_50, %c0_51] : memref<24x32xf32, #tpu.memory_space<vmem>>, vector<16x32xf32>
    %cst_52 = arith.constant dense<0.000000e+00> : vector<16x64xf32>
    %96 = tpu.matmul %95, %94, %cst_52 {dimension_numbers = #tpu.dot_dimension_numbers<[1], [0], [0], [1], [0, 0, 1, 1], [], []>} : vector<16x32xf32>, vector<32x64xf32>, vector<16x64xf32> -> vector<16x64xf32>
    %97 = arith.addf %92, %96 : vector<16x64xf32>
    %c2 = arith.constant 2 : index
    %c0_53 = arith.constant 0 : index
    %c0_54 = arith.constant 0 : index
    %98 = vector.load %arg10[%c2, %c0_53, %c0_54] : memref<9x32x64xf32, #tpu.memory_space<vmem>>, vector<1x32x64xf32>
    %99 = vector.shape_cast %98 : vector<1x32x64xf32> to vector<32x64xf32>
    %c2_55 = arith.constant 2 : index
    %c0_56 = arith.constant 0 : index
    %100 = vector.load %arg17[%c2_55, %c0_56] : memref<24x32xf32, #tpu.memory_space<vmem>>, vector<16x32xf32>
    %cst_57 = arith.constant dense<0.000000e+00> : vector<16x64xf32>
    %101 = tpu.matmul %100, %99, %cst_57 {dimension_numbers = #tpu.dot_dimension_numbers<[1], [0], [0], [1], [0, 0, 1, 1], [], []>} : vector<16x32xf32>, vector<32x64xf32>, vector<16x64xf32> -> vector<16x64xf32>
    %102 = arith.addf %97, %101 : vector<16x64xf32>
    %c3 = arith.constant 3 : index
    %c0_58 = arith.constant 0 : index
    %c0_59 = arith.constant 0 : index
    %103 = vector.load %arg10[%c3, %c0_58, %c0_59] : memref<9x32x64xf32, #tpu.memory_space<vmem>>, vector<1x32x64xf32>
    %104 = vector.shape_cast %103 : vector<1x32x64xf32> to vector<32x64xf32>
    %c3_60 = arith.constant 3 : index
    %c0_61 = arith.constant 0 : index
    %105 = vector.load %arg17[%c3_60, %c0_61] : memref<24x32xf32, #tpu.memory_space<vmem>>, vector<16x32xf32>
    %cst_62 = arith.constant dense<0.000000e+00> : vector<16x64xf32>
    %106 = tpu.matmul %105, %104, %cst_62 {dimension_numbers = #tpu.dot_dimension_numbers<[1], [0], [0], [1], [0, 0, 1, 1], [], []>} : vector<16x32xf32>, vector<32x64xf32>, vector<16x64xf32> -> vector<16x64xf32>
    %107 = arith.addf %102, %106 : vector<16x64xf32>
    %c4_63 = arith.constant 4 : index
    %c0_64 = arith.constant 0 : index
    %c0_65 = arith.constant 0 : index
    %108 = vector.load %arg10[%c4_63, %c0_64, %c0_65] : memref<9x32x64xf32, #tpu.memory_space<vmem>>, vector<1x32x64xf32>
    %109 = vector.shape_cast %108 : vector<1x32x64xf32> to vector<32x64xf32>
    %c4_66 = arith.constant 4 : index
    %c0_67 = arith.constant 0 : index
    %110 = vector.load %arg17[%c4_66, %c0_67] : memref<24x32xf32, #tpu.memory_space<vmem>>, vector<16x32xf32>
    %cst_68 = arith.constant dense<0.000000e+00> : vector<16x64xf32>
    %111 = tpu.matmul %110, %109, %cst_68 {dimension_numbers = #tpu.dot_dimension_numbers<[1], [0], [0], [1], [0, 0, 1, 1], [], []>} : vector<16x32xf32>, vector<32x64xf32>, vector<16x64xf32> -> vector<16x64xf32>
    %112 = arith.addf %107, %111 : vector<16x64xf32>
    %c5 = arith.constant 5 : index
    %c0_69 = arith.constant 0 : index
    %c0_70 = arith.constant 0 : index
    %113 = vector.load %arg10[%c5, %c0_69, %c0_70] : memref<9x32x64xf32, #tpu.memory_space<vmem>>, vector<1x32x64xf32>
    %114 = vector.shape_cast %113 : vector<1x32x64xf32> to vector<32x64xf32>
    %c5_71 = arith.constant 5 : index
    %c0_72 = arith.constant 0 : index
    %115 = vector.load %arg17[%c5_71, %c0_72] : memref<24x32xf32, #tpu.memory_space<vmem>>, vector<16x32xf32>
    %cst_73 = arith.constant dense<0.000000e+00> : vector<16x64xf32>
    %116 = tpu.matmul %115, %114, %cst_73 {dimension_numbers = #tpu.dot_dimension_numbers<[1], [0], [0], [1], [0, 0, 1, 1], [], []>} : vector<16x32xf32>, vector<32x64xf32>, vector<16x64xf32> -> vector<16x64xf32>
    %117 = arith.addf %112, %116 : vector<16x64xf32>
    %c6 = arith.constant 6 : index
    %c0_74 = arith.constant 0 : index
    %c0_75 = arith.constant 0 : index
    %118 = vector.load %arg10[%c6, %c0_74, %c0_75] : memref<9x32x64xf32, #tpu.memory_space<vmem>>, vector<1x32x64xf32>
    %119 = vector.shape_cast %118 : vector<1x32x64xf32> to vector<32x64xf32>
    %c6_76 = arith.constant 6 : index
    %c0_77 = arith.constant 0 : index
    %120 = vector.load %arg17[%c6_76, %c0_77] : memref<24x32xf32, #tpu.memory_space<vmem>>, vector<16x32xf32>
    %cst_78 = arith.constant dense<0.000000e+00> : vector<16x64xf32>
    %121 = tpu.matmul %120, %119, %cst_78 {dimension_numbers = #tpu.dot_dimension_numbers<[1], [0], [0], [1], [0, 0, 1, 1], [], []>} : vector<16x32xf32>, vector<32x64xf32>, vector<16x64xf32> -> vector<16x64xf32>
    %122 = arith.addf %117, %121 : vector<16x64xf32>
    %c7 = arith.constant 7 : index
    %c0_79 = arith.constant 0 : index
    %c0_80 = arith.constant 0 : index
    %123 = vector.load %arg10[%c7, %c0_79, %c0_80] : memref<9x32x64xf32, #tpu.memory_space<vmem>>, vector<1x32x64xf32>
    %124 = vector.shape_cast %123 : vector<1x32x64xf32> to vector<32x64xf32>
    %c7_81 = arith.constant 7 : index
    %c0_82 = arith.constant 0 : index
    %125 = vector.load %arg17[%c7_81, %c0_82] : memref<24x32xf32, #tpu.memory_space<vmem>>, vector<16x32xf32>
    %cst_83 = arith.constant dense<0.000000e+00> : vector<16x64xf32>
    %126 = tpu.matmul %125, %124, %cst_83 {dimension_numbers = #tpu.dot_dimension_numbers<[1], [0], [0], [1], [0, 0, 1, 1], [], []>} : vector<16x32xf32>, vector<32x64xf32>, vector<16x64xf32> -> vector<16x64xf32>
    %127 = arith.addf %122, %126 : vector<16x64xf32>
    %c8 = arith.constant 8 : index
    %c0_84 = arith.constant 0 : index
    %c0_85 = arith.constant 0 : index
    %128 = vector.load %arg10[%c8, %c0_84, %c0_85] : memref<9x32x64xf32, #tpu.memory_space<vmem>>, vector<1x32x64xf32>
    %129 = vector.shape_cast %128 : vector<1x32x64xf32> to vector<32x64xf32>
    %c8_86 = arith.constant 8 : index
    %c0_87 = arith.constant 0 : index
    %130 = vector.load %arg17[%c8_86, %c0_87] : memref<24x32xf32, #tpu.memory_space<vmem>>, vector<16x32xf32>
    %cst_88 = arith.constant dense<0.000000e+00> : vector<16x64xf32>
    %131 = tpu.matmul %130, %129, %cst_88 {dimension_numbers = #tpu.dot_dimension_numbers<[1], [0], [0], [1], [0, 0, 1, 1], [], []>} : vector<16x32xf32>, vector<32x64xf32>, vector<16x64xf32> -> vector<16x64xf32>
    %132 = arith.addf %127, %131 : vector<16x64xf32>
    %c0_89 = arith.constant 0 : index
    %c0_90 = arith.constant 0 : index
    %133 = vector.load %arg11[%c0_89, %c0_90] : memref<1x64xf32, #tpu.memory_space<vmem>>, vector<1x64xf32>
    %134 = vector.broadcast %133 : vector<1x64xf32> to vector<16x64xf32>
    %135 = arith.addf %132, %134 : vector<16x64xf32>
    %cst_91 = arith.constant 0.000000e+00 : f32
    %136 = vector.broadcast %cst_91 : f32 to vector<16x64xf32>
    %137 = arith.maximumf %135, %136 : vector<16x64xf32>
    %c0_92 = arith.constant 0 : index
    %c0_93 = arith.constant 0 : index
    %138 = vector.load %arg12[%c0_92, %c0_93] : memref<64x32xf32, #tpu.memory_space<vmem>>, vector<64x32xf32>
    %cst_94 = arith.constant dense<0.000000e+00> : vector<16x32xf32>
    %139 = tpu.matmul %137, %138, %cst_94 {dimension_numbers = #tpu.dot_dimension_numbers<[1], [0], [0], [1], [0, 0, 1, 1], [], []>} : vector<16x64xf32>, vector<64x32xf32>, vector<16x32xf32> -> vector<16x32xf32>
    %c0_95 = arith.constant 0 : index
    %c0_96 = arith.constant 0 : index
    %140 = vector.load %arg13[%c0_95, %c0_96] : memref<1x32xf32, #tpu.memory_space<vmem>>, vector<1x32xf32>
    %141 = vector.broadcast %140 : vector<1x32xf32> to vector<16x32xf32>
    %142 = arith.addf %139, %141 : vector<16x32xf32>
    %143 = arith.addf %142, %83 : vector<16x32xf32>
    %c0_97 = arith.constant 0 : index
    %c0_98 = arith.constant 0 : index
    %144 = vector.load %arg14[%c0_97, %c0_98] : memref<1x32xf32, #tpu.memory_space<vmem>>, vector<1x32xf32>
    %c0_99 = arith.constant 0 : index
    %c0_100 = arith.constant 0 : index
    %145 = vector.load %arg15[%c0_99, %c0_100] : memref<1x32xf32, #tpu.memory_space<vmem>>, vector<1x32xf32>
    %cst_101 = arith.constant dense<0.000000e+00> : vector<16xf32>
    %146 = vector.multi_reduction <add>, %143, %cst_101 [1] : vector<16x32xf32> to vector<16xf32>
    %147 = vector.shape_cast %146 : vector<16xf32> to vector<16x1xf32>
    %cst_102 = arith.constant 3.200000e+01 : f32
    %148 = vector.broadcast %cst_102 : f32 to vector<16x1xf32>
    %149 = arith.divf %147, %148 : vector<16x1xf32>
    %150 = vector.broadcast %149 : vector<16x1xf32> to vector<16x32xf32>
    %151 = arith.subf %143, %150 : vector<16x32xf32>
    %152 = arith.mulf %151, %151 : vector<16x32xf32>
    %cst_103 = arith.constant dense<0.000000e+00> : vector<16xf32>
    %153 = vector.multi_reduction <add>, %152, %cst_103 [1] : vector<16x32xf32> to vector<16xf32>
    %154 = vector.shape_cast %153 : vector<16xf32> to vector<16x1xf32>
    %cst_104 = arith.constant 3.200000e+01 : f32
    %155 = vector.broadcast %cst_104 : f32 to vector<16x1xf32>
    %156 = arith.divf %154, %155 : vector<16x1xf32>
    %157 = vector.broadcast %149 : vector<16x1xf32> to vector<16x32xf32>
    %158 = arith.subf %143, %157 : vector<16x32xf32>
    %cst_105 = arith.constant 9.99999997E-7 : f32
    %159 = vector.broadcast %cst_105 : f32 to vector<16x1xf32>
    %160 = arith.addf %156, %159 : vector<16x1xf32>
    %161 = math.rsqrt %160 : vector<16x1xf32>
    %162 = vector.broadcast %161 : vector<16x1xf32> to vector<16x32xf32>
    %163 = arith.mulf %158, %162 : vector<16x32xf32>
    %164 = vector.broadcast %144 : vector<1x32xf32> to vector<16x32xf32>
    %165 = arith.mulf %163, %164 : vector<16x32xf32>
    %166 = vector.broadcast %145 : vector<1x32xf32> to vector<16x32xf32>
    %167 = arith.addf %165, %166 : vector<16x32xf32>
    %168 = vector.broadcast %7 : vector<16x1xf32> to vector<16x32xf32>
    %169 = arith.mulf %167, %168 : vector<16x32xf32>
    %c0_106 = arith.constant 0 : index
    %c0_107 = arith.constant 0 : index
    %c0_108 = arith.constant 0 : index
    %170 = vector.load %arg16[%c0_106, %c0_107, %c0_108] : memref<1x16x32xf32, #tpu.memory_space<vmem>>, vector<1x16x32xf32>
    %171 = vector.shape_cast %170 : vector<1x16x32xf32> to vector<16x32xf32>
    %172 = vector.shape_cast %169 : vector<16x32xf32> to vector<1x16x32xf32>
    tpu.vector_store %arg16[%c0_106, %c0_107, %c0_108], %172 {strides = array<i32>} : memref<1x16x32xf32, #tpu.memory_space<vmem>>, vector<1x16x32xf32>,
    return
  }
  func.func @transform_0(%arg0: i32) -> (i32, i32, i32) {
    %c0_i32 = arith.constant 0 : i32
    %c0_i32_0 = arith.constant 0 : i32
    %c0_i32_1 = arith.constant 0 : i32
    return %arg0, %c0_i32, %c0_i32_0 : i32, i32, i32
  }
  func.func @transform_1(%arg0: i32) -> (i32, i32, i32) {
    %c0_i32 = arith.constant 0 : i32
    %c0_i32_0 = arith.constant 0 : i32
    %c0_i32_1 = arith.constant 0 : i32
    return %arg0, %c0_i32, %c0_i32_0 : i32, i32, i32
  }
  func.func @transform_2(%arg0: i32) -> (i32, i32, i32) {
    %c0_i32 = arith.constant 0 : i32
    %c0_i32_0 = arith.constant 0 : i32
    %c0_i32_1 = arith.constant 0 : i32
    return %arg0, %c0_i32, %c0_i32_0 : i32, i32, i32
  }
  func.func @transform_3(%arg0: i32) -> (i32, i32) {
    %c0_i32 = arith.constant 0 : i32
    %c0_i32_0 = arith.constant 0 : i32
    %c0_i32_1 = arith.constant 0 : i32
    return %c0_i32, %c0_i32_0 : i32, i32
  }
  func.func @transform_4(%arg0: i32) -> (i32, i32) {
    %c0_i32 = arith.constant 0 : i32
    %c0_i32_0 = arith.constant 0 : i32
    %c0_i32_1 = arith.constant 0 : i32
    return %c0_i32, %c0_i32_0 : i32, i32
  }
  func.func @transform_5(%arg0: i32) -> (i32, i32) {
    %c0_i32 = arith.constant 0 : i32
    %c0_i32_0 = arith.constant 0 : i32
    %c0_i32_1 = arith.constant 0 : i32
    return %c0_i32, %c0_i32_0 : i32, i32
  }
  func.func @transform_6(%arg0: i32) -> (i32, i32) {
    %c0_i32 = arith.constant 0 : i32
    %c0_i32_0 = arith.constant 0 : i32
    %c0_i32_1 = arith.constant 0 : i32
    return %c0_i32, %c0_i32_0 : i32, i32
  }
  func.func @transform_7(%arg0: i32) -> (i32, i32) {
    %c0_i32 = arith.constant 0 : i32
    %c0_i32_0 = arith.constant 0 : i32
    %c0_i32_1 = arith.constant 0 : i32
    return %c0_i32, %c0_i32_0 : i32, i32
  }
  func.func @transform_8(%arg0: i32) -> (i32, i32) {
    %c0_i32 = arith.constant 0 : i32
    %c0_i32_0 = arith.constant 0 : i32
    %c0_i32_1 = arith.constant 0 : i32
    return %c0_i32, %c0_i32_0 : i32, i32
  }
  func.func @transform_9(%arg0: i32) -> (i32, i32, i32) {
    %c0_i32 = arith.constant 0 : i32
    %c0_i32_0 = arith.constant 0 : i32
    %c0_i32_1 = arith.constant 0 : i32
    %c0_i32_2 = arith.constant 0 : i32
    return %c0_i32, %c0_i32_0, %c0_i32_1 : i32, i32, i32
  }
  func.func @transform_10(%arg0: i32) -> (i32, i32) {
    %c0_i32 = arith.constant 0 : i32
    %c0_i32_0 = arith.constant 0 : i32
    %c0_i32_1 = arith.constant 0 : i32
    return %c0_i32, %c0_i32_0 : i32, i32
  }
  func.func @transform_11(%arg0: i32) -> (i32, i32) {
    %c0_i32 = arith.constant 0 : i32
    %c0_i32_0 = arith.constant 0 : i32
    %c0_i32_1 = arith.constant 0 : i32
    return %c0_i32, %c0_i32_0 : i32, i32
  }
  func.func @transform_12(%arg0: i32) -> (i32, i32) {
    %c0_i32 = arith.constant 0 : i32
    %c0_i32_0 = arith.constant 0 : i32
    %c0_i32_1 = arith.constant 0 : i32
    return %c0_i32, %c0_i32_0 : i32, i32
  }
  func.func @transform_13(%arg0: i32) -> (i32, i32) {
    %c0_i32 = arith.constant 0 : i32
    %c0_i32_0 = arith.constant 0 : i32
    %c0_i32_1 = arith.constant 0 : i32
    return %c0_i32, %c0_i32_0 : i32, i32
  }
  func.func @transform_14(%arg0: i32) -> (i32, i32) {
    %c0_i32 = arith.constant 0 : i32
    %c0_i32_0 = arith.constant 0 : i32
    %c0_i32_1 = arith.constant 0 : i32
    return %c0_i32, %c0_i32_0 : i32, i32
  }
  func.func @transform_15(%arg0: i32) -> (i32, i32, i32) {
    %c0_i32 = arith.constant 0 : i32
    %c0_i32_0 = arith.constant 0 : i32
    %c0_i32_1 = arith.constant 0 : i32
    return %arg0, %c0_i32, %c0_i32_0 : i32, i32, i32
  }
}

module attributes {stable_mosaic.version = 11 : i64} {
  func.func @_mel_postnet_kernel(%arg0: i32, %arg1: memref<1x16x32xf32, #tpu.memory_space<vmem>>, %arg2: memref<1x16x1xf32, #tpu.memory_space<vmem>>, %arg3: memref<32x8xf32, #tpu.memory_space<vmem>>, %arg4: memref<1x8xf32, #tpu.memory_space<vmem>>, %arg5: memref<5x8x64xf32, #tpu.memory_space<vmem>>, %arg6: memref<1x64xf32, #tpu.memory_space<vmem>>, %arg7: memref<5x64x64xf32, #tpu.memory_space<vmem>>, %arg8: memref<1x64xf32, #tpu.memory_space<vmem>>, %arg9: memref<5x64x8xf32, #tpu.memory_space<vmem>>, %arg10: memref<1x8xf32, #tpu.memory_space<vmem>>, %arg11: memref<1x16x8xf32, #tpu.memory_space<vmem>>, %arg12: memref<20x8xf32, #tpu.memory_space<vmem>>, %arg13: memref<20x64xf32, #tpu.memory_space<vmem>>) attributes {dimension_semantics = [#tpu.dimension_semantics<parallel>], iteration_bounds = array<i64: 2>, scalar_prefetch = 0 : i64, scratch_operands = 2 : i64, tpu.core_type = #tpu.core_type<tc>, window_params = [{transform_indices = @transform_0, window_bounds = array<i64: 1, 16, 32>}, {transform_indices = @transform_1, window_bounds = array<i64: 1, 16, 1>}, {pipeline_mode = #tpu.pipeline_mode<synchronous>, transform_indices = @transform_2, window_bounds = array<i64: 32, 8>}, {pipeline_mode = #tpu.pipeline_mode<synchronous>, transform_indices = @transform_3, window_bounds = array<i64: 1, 8>}, {pipeline_mode = #tpu.pipeline_mode<synchronous>, transform_indices = @transform_4, window_bounds = array<i64: 5, 8, 64>}, {pipeline_mode = #tpu.pipeline_mode<synchronous>, transform_indices = @transform_5, window_bounds = array<i64: 1, 64>}, {pipeline_mode = #tpu.pipeline_mode<synchronous>, transform_indices = @transform_6, window_bounds = array<i64: 5, 64, 64>}, {pipeline_mode = #tpu.pipeline_mode<synchronous>, transform_indices = @transform_7, window_bounds = array<i64: 1, 64>}, {pipeline_mode = #tpu.pipeline_mode<synchronous>, transform_indices = @transform_8, window_bounds = array<i64: 5, 64, 8>}, {pipeline_mode = #tpu.pipeline_mode<synchronous>, transform_indices = @transform_9, window_bounds = array<i64: 1, 8>}, {transform_indices = @transform_10, window_bounds = array<i64: 1, 16, 8>}]} {
    %c0 = arith.constant 0 : index
    %c0_0 = arith.constant 0 : index
    %c0_1 = arith.constant 0 : index
    %0 = vector.load %arg1[%c0, %c0_0, %c0_1] : memref<1x16x32xf32, #tpu.memory_space<vmem>>, vector<1x16x32xf32>
    %1 = vector.shape_cast %0 : vector<1x16x32xf32> to vector<16x32xf32>
    %c0_2 = arith.constant 0 : index
    %c0_3 = arith.constant 0 : index
    %c0_4 = arith.constant 0 : index
    %2 = vector.load %arg2[%c0_2, %c0_3, %c0_4] : memref<1x16x1xf32, #tpu.memory_space<vmem>>, vector<1x16x1xf32>
    %3 = vector.shape_cast %2 : vector<1x16x1xf32> to vector<16x1xf32>
    %c0_5 = arith.constant 0 : index
    %c0_6 = arith.constant 0 : index
    %4 = vector.load %arg3[%c0_5, %c0_6] : memref<32x8xf32, #tpu.memory_space<vmem>>, vector<32x8xf32>
    %cst = arith.constant dense<0.000000e+00> : vector<16x8xf32>
    %5 = tpu.matmul %1, %4, %cst {dimension_numbers = #tpu.dot_dimension_numbers<[1], [0], [0], [1], [0, 0, 1, 1], [], []>} : vector<16x32xf32>, vector<32x8xf32>, vector<16x8xf32> -> vector<16x8xf32>
    %c0_7 = arith.constant 0 : index
    %c0_8 = arith.constant 0 : index
    %6 = vector.load %arg4[%c0_7, %c0_8] : memref<1x8xf32, #tpu.memory_space<vmem>>, vector<1x8xf32>
    %7 = vector.broadcast %6 : vector<1x8xf32> to vector<16x8xf32>
    %8 = arith.addf %5, %7 : vector<16x8xf32>
    %cst_9 = arith.constant 0.000000e+00 : f32
    %9 = vector.broadcast %cst_9 : f32 to vector<20x8xf32>
    %c0_10 = arith.constant 0 : index
    %c0_11 = arith.constant 0 : index
    %10 = vector.load %arg12[%c0_10, %c0_11] : memref<20x8xf32, #tpu.memory_space<vmem>>, vector<20x8xf32>
    tpu.vector_store %arg12[%c0_10, %c0_11], %9 {strides = array<i32>} : memref<20x8xf32, #tpu.memory_space<vmem>>, vector<20x8xf32>,
    %c2 = arith.constant 2 : index
    %c0_12 = arith.constant 0 : index
    %11 = vector.load %arg12[%c2, %c0_12] : memref<20x8xf32, #tpu.memory_space<vmem>>, vector<16x8xf32>
    tpu.vector_store %arg12[%c2, %c0_12], %8 {strides = array<i32>} : memref<20x8xf32, #tpu.memory_space<vmem>>, vector<16x8xf32>,
    %cst_13 = arith.constant 0.000000e+00 : f32
    %12 = vector.broadcast %cst_13 : f32 to vector<16x64xf32>
    %c0_14 = arith.constant 0 : index
    %c0_15 = arith.constant 0 : index
    %c0_16 = arith.constant 0 : index
    %13 = vector.load %arg5[%c0_14, %c0_15, %c0_16] : memref<5x8x64xf32, #tpu.memory_space<vmem>>, vector<1x8x64xf32>
    %14 = vector.shape_cast %13 : vector<1x8x64xf32> to vector<8x64xf32>
    %c0_17 = arith.constant 0 : index
    %c0_18 = arith.constant 0 : index
    %15 = vector.load %arg12[%c0_17, %c0_18] : memref<20x8xf32, #tpu.memory_space<vmem>>, vector<16x8xf32>
    %cst_19 = arith.constant dense<0.000000e+00> : vector<16x64xf32>
    %16 = tpu.matmul %15, %14, %cst_19 {dimension_numbers = #tpu.dot_dimension_numbers<[1], [0], [0], [1], [0, 0, 1, 1], [], []>} : vector<16x8xf32>, vector<8x64xf32>, vector<16x64xf32> -> vector<16x64xf32>
    %17 = arith.addf %12, %16 : vector<16x64xf32>
    %c1 = arith.constant 1 : index
    %c0_20 = arith.constant 0 : index
    %c0_21 = arith.constant 0 : index
    %18 = vector.load %arg5[%c1, %c0_20, %c0_21] : memref<5x8x64xf32, #tpu.memory_space<vmem>>, vector<1x8x64xf32>
    %19 = vector.shape_cast %18 : vector<1x8x64xf32> to vector<8x64xf32>
    %c1_22 = arith.constant 1 : index
    %c0_23 = arith.constant 0 : index
    %20 = vector.load %arg12[%c1_22, %c0_23] : memref<20x8xf32, #tpu.memory_space<vmem>>, vector<16x8xf32>
    %cst_24 = arith.constant dense<0.000000e+00> : vector<16x64xf32>
    %21 = tpu.matmul %20, %19, %cst_24 {dimension_numbers = #tpu.dot_dimension_numbers<[1], [0], [0], [1], [0, 0, 1, 1], [], []>} : vector<16x8xf32>, vector<8x64xf32>, vector<16x64xf32> -> vector<16x64xf32>
    %22 = arith.addf %17, %21 : vector<16x64xf32>
    %c2_25 = arith.constant 2 : index
    %c0_26 = arith.constant 0 : index
    %c0_27 = arith.constant 0 : index
    %23 = vector.load %arg5[%c2_25, %c0_26, %c0_27] : memref<5x8x64xf32, #tpu.memory_space<vmem>>, vector<1x8x64xf32>
    %24 = vector.shape_cast %23 : vector<1x8x64xf32> to vector<8x64xf32>
    %c2_28 = arith.constant 2 : index
    %c0_29 = arith.constant 0 : index
    %25 = vector.load %arg12[%c2_28, %c0_29] : memref<20x8xf32, #tpu.memory_space<vmem>>, vector<16x8xf32>
    %cst_30 = arith.constant dense<0.000000e+00> : vector<16x64xf32>
    %26 = tpu.matmul %25, %24, %cst_30 {dimension_numbers = #tpu.dot_dimension_numbers<[1], [0], [0], [1], [0, 0, 1, 1], [], []>} : vector<16x8xf32>, vector<8x64xf32>, vector<16x64xf32> -> vector<16x64xf32>
    %27 = arith.addf %22, %26 : vector<16x64xf32>
    %c3 = arith.constant 3 : index
    %c0_31 = arith.constant 0 : index
    %c0_32 = arith.constant 0 : index
    %28 = vector.load %arg5[%c3, %c0_31, %c0_32] : memref<5x8x64xf32, #tpu.memory_space<vmem>>, vector<1x8x64xf32>
    %29 = vector.shape_cast %28 : vector<1x8x64xf32> to vector<8x64xf32>
    %c3_33 = arith.constant 3 : index
    %c0_34 = arith.constant 0 : index
    %30 = vector.load %arg12[%c3_33, %c0_34] : memref<20x8xf32, #tpu.memory_space<vmem>>, vector<16x8xf32>
    %cst_35 = arith.constant dense<0.000000e+00> : vector<16x64xf32>
    %31 = tpu.matmul %30, %29, %cst_35 {dimension_numbers = #tpu.dot_dimension_numbers<[1], [0], [0], [1], [0, 0, 1, 1], [], []>} : vector<16x8xf32>, vector<8x64xf32>, vector<16x64xf32> -> vector<16x64xf32>
    %32 = arith.addf %27, %31 : vector<16x64xf32>
    %c4 = arith.constant 4 : index
    %c0_36 = arith.constant 0 : index
    %c0_37 = arith.constant 0 : index
    %33 = vector.load %arg5[%c4, %c0_36, %c0_37] : memref<5x8x64xf32, #tpu.memory_space<vmem>>, vector<1x8x64xf32>
    %34 = vector.shape_cast %33 : vector<1x8x64xf32> to vector<8x64xf32>
    %c4_38 = arith.constant 4 : index
    %c0_39 = arith.constant 0 : index
    %35 = vector.load %arg12[%c4_38, %c0_39] : memref<20x8xf32, #tpu.memory_space<vmem>>, vector<16x8xf32>
    %cst_40 = arith.constant dense<0.000000e+00> : vector<16x64xf32>
    %36 = tpu.matmul %35, %34, %cst_40 {dimension_numbers = #tpu.dot_dimension_numbers<[1], [0], [0], [1], [0, 0, 1, 1], [], []>} : vector<16x8xf32>, vector<8x64xf32>, vector<16x64xf32> -> vector<16x64xf32>
    %37 = arith.addf %32, %36 : vector<16x64xf32>
    %c0_41 = arith.constant 0 : index
    %c0_42 = arith.constant 0 : index
    %38 = vector.load %arg6[%c0_41, %c0_42] : memref<1x64xf32, #tpu.memory_space<vmem>>, vector<1x64xf32>
    %39 = vector.broadcast %38 : vector<1x64xf32> to vector<16x64xf32>
    %40 = arith.addf %37, %39 : vector<16x64xf32>
    %41 = math.tanh %40 : vector<16x64xf32>
    %cst_43 = arith.constant 0.000000e+00 : f32
    %42 = vector.broadcast %cst_43 : f32 to vector<20x64xf32>
    %c0_44 = arith.constant 0 : index
    %c0_45 = arith.constant 0 : index
    %43 = vector.load %arg13[%c0_44, %c0_45] : memref<20x64xf32, #tpu.memory_space<vmem>>, vector<20x64xf32>
    tpu.vector_store %arg13[%c0_44, %c0_45], %42 {strides = array<i32>} : memref<20x64xf32, #tpu.memory_space<vmem>>, vector<20x64xf32>,
    %c2_46 = arith.constant 2 : index
    %c0_47 = arith.constant 0 : index
    %44 = vector.load %arg13[%c2_46, %c0_47] : memref<20x64xf32, #tpu.memory_space<vmem>>, vector<16x64xf32>
    tpu.vector_store %arg13[%c2_46, %c0_47], %41 {strides = array<i32>} : memref<20x64xf32, #tpu.memory_space<vmem>>, vector<16x64xf32>,
    %cst_48 = arith.constant 0.000000e+00 : f32
    %45 = vector.broadcast %cst_48 : f32 to vector<16x64xf32>
    %c0_49 = arith.constant 0 : index
    %c0_50 = arith.constant 0 : index
    %c0_51 = arith.constant 0 : index
    %46 = vector.load %arg7[%c0_49, %c0_50, %c0_51] : memref<5x64x64xf32, #tpu.memory_space<vmem>>, vector<1x64x64xf32>
    %47 = vector.shape_cast %46 : vector<1x64x64xf32> to vector<64x64xf32>
    %c0_52 = arith.constant 0 : index
    %c0_53 = arith.constant 0 : index
    %48 = vector.load %arg13[%c0_52, %c0_53] : memref<20x64xf32, #tpu.memory_space<vmem>>, vector<16x64xf32>
    %cst_54 = arith.constant dense<0.000000e+00> : vector<16x64xf32>
    %49 = tpu.matmul %48, %47, %cst_54 {dimension_numbers = #tpu.dot_dimension_numbers<[1], [0], [0], [1], [0, 0, 1, 1], [], []>} : vector<16x64xf32>, vector<64x64xf32>, vector<16x64xf32> -> vector<16x64xf32>
    %50 = arith.addf %45, %49 : vector<16x64xf32>
    %c1_55 = arith.constant 1 : index
    %c0_56 = arith.constant 0 : index
    %c0_57 = arith.constant 0 : index
    %51 = vector.load %arg7[%c1_55, %c0_56, %c0_57] : memref<5x64x64xf32, #tpu.memory_space<vmem>>, vector<1x64x64xf32>
    %52 = vector.shape_cast %51 : vector<1x64x64xf32> to vector<64x64xf32>
    %c1_58 = arith.constant 1 : index
    %c0_59 = arith.constant 0 : index
    %53 = vector.load %arg13[%c1_58, %c0_59] : memref<20x64xf32, #tpu.memory_space<vmem>>, vector<16x64xf32>
    %cst_60 = arith.constant dense<0.000000e+00> : vector<16x64xf32>
    %54 = tpu.matmul %53, %52, %cst_60 {dimension_numbers = #tpu.dot_dimension_numbers<[1], [0], [0], [1], [0, 0, 1, 1], [], []>} : vector<16x64xf32>, vector<64x64xf32>, vector<16x64xf32> -> vector<16x64xf32>
    %55 = arith.addf %50, %54 : vector<16x64xf32>
    %c2_61 = arith.constant 2 : index
    %c0_62 = arith.constant 0 : index
    %c0_63 = arith.constant 0 : index
    %56 = vector.load %arg7[%c2_61, %c0_62, %c0_63] : memref<5x64x64xf32, #tpu.memory_space<vmem>>, vector<1x64x64xf32>
    %57 = vector.shape_cast %56 : vector<1x64x64xf32> to vector<64x64xf32>
    %c2_64 = arith.constant 2 : index
    %c0_65 = arith.constant 0 : index
    %58 = vector.load %arg13[%c2_64, %c0_65] : memref<20x64xf32, #tpu.memory_space<vmem>>, vector<16x64xf32>
    %cst_66 = arith.constant dense<0.000000e+00> : vector<16x64xf32>
    %59 = tpu.matmul %58, %57, %cst_66 {dimension_numbers = #tpu.dot_dimension_numbers<[1], [0], [0], [1], [0, 0, 1, 1], [], []>} : vector<16x64xf32>, vector<64x64xf32>, vector<16x64xf32> -> vector<16x64xf32>
    %60 = arith.addf %55, %59 : vector<16x64xf32>
    %c3_67 = arith.constant 3 : index
    %c0_68 = arith.constant 0 : index
    %c0_69 = arith.constant 0 : index
    %61 = vector.load %arg7[%c3_67, %c0_68, %c0_69] : memref<5x64x64xf32, #tpu.memory_space<vmem>>, vector<1x64x64xf32>
    %62 = vector.shape_cast %61 : vector<1x64x64xf32> to vector<64x64xf32>
    %c3_70 = arith.constant 3 : index
    %c0_71 = arith.constant 0 : index
    %63 = vector.load %arg13[%c3_70, %c0_71] : memref<20x64xf32, #tpu.memory_space<vmem>>, vector<16x64xf32>
    %cst_72 = arith.constant dense<0.000000e+00> : vector<16x64xf32>
    %64 = tpu.matmul %63, %62, %cst_72 {dimension_numbers = #tpu.dot_dimension_numbers<[1], [0], [0], [1], [0, 0, 1, 1], [], []>} : vector<16x64xf32>, vector<64x64xf32>, vector<16x64xf32> -> vector<16x64xf32>
    %65 = arith.addf %60, %64 : vector<16x64xf32>
    %c4_73 = arith.constant 4 : index
    %c0_74 = arith.constant 0 : index
    %c0_75 = arith.constant 0 : index
    %66 = vector.load %arg7[%c4_73, %c0_74, %c0_75] : memref<5x64x64xf32, #tpu.memory_space<vmem>>, vector<1x64x64xf32>
    %67 = vector.shape_cast %66 : vector<1x64x64xf32> to vector<64x64xf32>
    %c4_76 = arith.constant 4 : index
    %c0_77 = arith.constant 0 : index
    %68 = vector.load %arg13[%c4_76, %c0_77] : memref<20x64xf32, #tpu.memory_space<vmem>>, vector<16x64xf32>
    %cst_78 = arith.constant dense<0.000000e+00> : vector<16x64xf32>
    %69 = tpu.matmul %68, %67, %cst_78 {dimension_numbers = #tpu.dot_dimension_numbers<[1], [0], [0], [1], [0, 0, 1, 1], [], []>} : vector<16x64xf32>, vector<64x64xf32>, vector<16x64xf32> -> vector<16x64xf32>
    %70 = arith.addf %65, %69 : vector<16x64xf32>
    %c0_79 = arith.constant 0 : index
    %c0_80 = arith.constant 0 : index
    %71 = vector.load %arg8[%c0_79, %c0_80] : memref<1x64xf32, #tpu.memory_space<vmem>>, vector<1x64xf32>
    %72 = vector.broadcast %71 : vector<1x64xf32> to vector<16x64xf32>
    %73 = arith.addf %70, %72 : vector<16x64xf32>
    %74 = math.tanh %73 : vector<16x64xf32>
    %cst_81 = arith.constant 0.000000e+00 : f32
    %75 = vector.broadcast %cst_81 : f32 to vector<20x64xf32>
    %c0_82 = arith.constant 0 : index
    %c0_83 = arith.constant 0 : index
    %76 = vector.load %arg13[%c0_82, %c0_83] : memref<20x64xf32, #tpu.memory_space<vmem>>, vector<20x64xf32>
    tpu.vector_store %arg13[%c0_82, %c0_83], %75 {strides = array<i32>} : memref<20x64xf32, #tpu.memory_space<vmem>>, vector<20x64xf32>,
    %c2_84 = arith.constant 2 : index
    %c0_85 = arith.constant 0 : index
    %77 = vector.load %arg13[%c2_84, %c0_85] : memref<20x64xf32, #tpu.memory_space<vmem>>, vector<16x64xf32>
    tpu.vector_store %arg13[%c2_84, %c0_85], %74 {strides = array<i32>} : memref<20x64xf32, #tpu.memory_space<vmem>>, vector<16x64xf32>,
    %cst_86 = arith.constant 0.000000e+00 : f32
    %78 = vector.broadcast %cst_86 : f32 to vector<16x8xf32>
    %c0_87 = arith.constant 0 : index
    %c0_88 = arith.constant 0 : index
    %c0_89 = arith.constant 0 : index
    %79 = vector.load %arg9[%c0_87, %c0_88, %c0_89] : memref<5x64x8xf32, #tpu.memory_space<vmem>>, vector<1x64x8xf32>
    %80 = vector.shape_cast %79 : vector<1x64x8xf32> to vector<64x8xf32>
    %c0_90 = arith.constant 0 : index
    %c0_91 = arith.constant 0 : index
    %81 = vector.load %arg13[%c0_90, %c0_91] : memref<20x64xf32, #tpu.memory_space<vmem>>, vector<16x64xf32>
    %cst_92 = arith.constant dense<0.000000e+00> : vector<16x8xf32>
    %82 = tpu.matmul %81, %80, %cst_92 {dimension_numbers = #tpu.dot_dimension_numbers<[1], [0], [0], [1], [0, 0, 1, 1], [], []>} : vector<16x64xf32>, vector<64x8xf32>, vector<16x8xf32> -> vector<16x8xf32>
    %83 = arith.addf %78, %82 : vector<16x8xf32>
    %c1_93 = arith.constant 1 : index
    %c0_94 = arith.constant 0 : index
    %c0_95 = arith.constant 0 : index
    %84 = vector.load %arg9[%c1_93, %c0_94, %c0_95] : memref<5x64x8xf32, #tpu.memory_space<vmem>>, vector<1x64x8xf32>
    %85 = vector.shape_cast %84 : vector<1x64x8xf32> to vector<64x8xf32>
    %c1_96 = arith.constant 1 : index
    %c0_97 = arith.constant 0 : index
    %86 = vector.load %arg13[%c1_96, %c0_97] : memref<20x64xf32, #tpu.memory_space<vmem>>, vector<16x64xf32>
    %cst_98 = arith.constant dense<0.000000e+00> : vector<16x8xf32>
    %87 = tpu.matmul %86, %85, %cst_98 {dimension_numbers = #tpu.dot_dimension_numbers<[1], [0], [0], [1], [0, 0, 1, 1], [], []>} : vector<16x64xf32>, vector<64x8xf32>, vector<16x8xf32> -> vector<16x8xf32>
    %88 = arith.addf %83, %87 : vector<16x8xf32>
    %c2_99 = arith.constant 2 : index
    %c0_100 = arith.constant 0 : index
    %c0_101 = arith.constant 0 : index
    %89 = vector.load %arg9[%c2_99, %c0_100, %c0_101] : memref<5x64x8xf32, #tpu.memory_space<vmem>>, vector<1x64x8xf32>
    %90 = vector.shape_cast %89 : vector<1x64x8xf32> to vector<64x8xf32>
    %c2_102 = arith.constant 2 : index
    %c0_103 = arith.constant 0 : index
    %91 = vector.load %arg13[%c2_102, %c0_103] : memref<20x64xf32, #tpu.memory_space<vmem>>, vector<16x64xf32>
    %cst_104 = arith.constant dense<0.000000e+00> : vector<16x8xf32>
    %92 = tpu.matmul %91, %90, %cst_104 {dimension_numbers = #tpu.dot_dimension_numbers<[1], [0], [0], [1], [0, 0, 1, 1], [], []>} : vector<16x64xf32>, vector<64x8xf32>, vector<16x8xf32> -> vector<16x8xf32>
    %93 = arith.addf %88, %92 : vector<16x8xf32>
    %c3_105 = arith.constant 3 : index
    %c0_106 = arith.constant 0 : index
    %c0_107 = arith.constant 0 : index
    %94 = vector.load %arg9[%c3_105, %c0_106, %c0_107] : memref<5x64x8xf32, #tpu.memory_space<vmem>>, vector<1x64x8xf32>
    %95 = vector.shape_cast %94 : vector<1x64x8xf32> to vector<64x8xf32>
    %c3_108 = arith.constant 3 : index
    %c0_109 = arith.constant 0 : index
    %96 = vector.load %arg13[%c3_108, %c0_109] : memref<20x64xf32, #tpu.memory_space<vmem>>, vector<16x64xf32>
    %cst_110 = arith.constant dense<0.000000e+00> : vector<16x8xf32>
    %97 = tpu.matmul %96, %95, %cst_110 {dimension_numbers = #tpu.dot_dimension_numbers<[1], [0], [0], [1], [0, 0, 1, 1], [], []>} : vector<16x64xf32>, vector<64x8xf32>, vector<16x8xf32> -> vector<16x8xf32>
    %98 = arith.addf %93, %97 : vector<16x8xf32>
    %c4_111 = arith.constant 4 : index
    %c0_112 = arith.constant 0 : index
    %c0_113 = arith.constant 0 : index
    %99 = vector.load %arg9[%c4_111, %c0_112, %c0_113] : memref<5x64x8xf32, #tpu.memory_space<vmem>>, vector<1x64x8xf32>
    %100 = vector.shape_cast %99 : vector<1x64x8xf32> to vector<64x8xf32>
    %c4_114 = arith.constant 4 : index
    %c0_115 = arith.constant 0 : index
    %101 = vector.load %arg13[%c4_114, %c0_115] : memref<20x64xf32, #tpu.memory_space<vmem>>, vector<16x64xf32>
    %cst_116 = arith.constant dense<0.000000e+00> : vector<16x8xf32>
    %102 = tpu.matmul %101, %100, %cst_116 {dimension_numbers = #tpu.dot_dimension_numbers<[1], [0], [0], [1], [0, 0, 1, 1], [], []>} : vector<16x64xf32>, vector<64x8xf32>, vector<16x8xf32> -> vector<16x8xf32>
    %103 = arith.addf %98, %102 : vector<16x8xf32>
    %c0_117 = arith.constant 0 : index
    %c0_118 = arith.constant 0 : index
    %104 = vector.load %arg10[%c0_117, %c0_118] : memref<1x8xf32, #tpu.memory_space<vmem>>, vector<1x8xf32>
    %105 = vector.broadcast %104 : vector<1x8xf32> to vector<16x8xf32>
    %106 = arith.addf %103, %105 : vector<16x8xf32>
    %107 = arith.addf %8, %106 : vector<16x8xf32>
    %108 = vector.broadcast %3 : vector<16x1xf32> to vector<16x8xf32>
    %109 = arith.mulf %107, %108 : vector<16x8xf32>
    %c0_119 = arith.constant 0 : index
    %c0_120 = arith.constant 0 : index
    %c0_121 = arith.constant 0 : index
    %110 = vector.load %arg11[%c0_119, %c0_120, %c0_121] : memref<1x16x8xf32, #tpu.memory_space<vmem>>, vector<1x16x8xf32>
    %111 = vector.shape_cast %110 : vector<1x16x8xf32> to vector<16x8xf32>
    %112 = vector.shape_cast %109 : vector<16x8xf32> to vector<1x16x8xf32>
    tpu.vector_store %arg11[%c0_119, %c0_120, %c0_121], %112 {strides = array<i32>} : memref<1x16x8xf32, #tpu.memory_space<vmem>>, vector<1x16x8xf32>,
    return
  }
  func.func @transform_0(%arg0: i32) -> (i32, i32, i32) {
    %c0_i32 = arith.constant 0 : i32
    %c0_i32_0 = arith.constant 0 : i32
    %c0_i32_1 = arith.constant 0 : i32
    return %arg0, %c0_i32, %c0_i32_0 : i32, i32, i32
  }
  func.func @transform_1(%arg0: i32) -> (i32, i32, i32) {
    %c0_i32 = arith.constant 0 : i32
    %c0_i32_0 = arith.constant 0 : i32
    %c0_i32_1 = arith.constant 0 : i32
    return %arg0, %c0_i32, %c0_i32_0 : i32, i32, i32
  }
  func.func @transform_2(%arg0: i32) -> (i32, i32) {
    %c0_i32 = arith.constant 0 : i32
    %c0_i32_0 = arith.constant 0 : i32
    %c0_i32_1 = arith.constant 0 : i32
    return %c0_i32, %c0_i32_0 : i32, i32
  }
  func.func @transform_3(%arg0: i32) -> (i32, i32) {
    %c0_i32 = arith.constant 0 : i32
    %c0_i32_0 = arith.constant 0 : i32
    %c0_i32_1 = arith.constant 0 : i32
    return %c0_i32, %c0_i32_0 : i32, i32
  }
  func.func @transform_4(%arg0: i32) -> (i32, i32, i32) {
    %c0_i32 = arith.constant 0 : i32
    %c0_i32_0 = arith.constant 0 : i32
    %c0_i32_1 = arith.constant 0 : i32
    %c0_i32_2 = arith.constant 0 : i32
    return %c0_i32, %c0_i32_0, %c0_i32_1 : i32, i32, i32
  }
  func.func @transform_5(%arg0: i32) -> (i32, i32) {
    %c0_i32 = arith.constant 0 : i32
    %c0_i32_0 = arith.constant 0 : i32
    %c0_i32_1 = arith.constant 0 : i32
    return %c0_i32, %c0_i32_0 : i32, i32
  }
  func.func @transform_6(%arg0: i32) -> (i32, i32, i32) {
    %c0_i32 = arith.constant 0 : i32
    %c0_i32_0 = arith.constant 0 : i32
    %c0_i32_1 = arith.constant 0 : i32
    %c0_i32_2 = arith.constant 0 : i32
    return %c0_i32, %c0_i32_0, %c0_i32_1 : i32, i32, i32
  }
  func.func @transform_7(%arg0: i32) -> (i32, i32) {
    %c0_i32 = arith.constant 0 : i32
    %c0_i32_0 = arith.constant 0 : i32
    %c0_i32_1 = arith.constant 0 : i32
    return %c0_i32, %c0_i32_0 : i32, i32
  }
  func.func @transform_8(%arg0: i32) -> (i32, i32, i32) {
    %c0_i32 = arith.constant 0 : i32
    %c0_i32_0 = arith.constant 0 : i32
    %c0_i32_1 = arith.constant 0 : i32
    %c0_i32_2 = arith.constant 0 : i32
    return %c0_i32, %c0_i32_0, %c0_i32_1 : i32, i32, i32
  }
  func.func @transform_9(%arg0: i32) -> (i32, i32) {
    %c0_i32 = arith.constant 0 : i32
    %c0_i32_0 = arith.constant 0 : i32
    %c0_i32_1 = arith.constant 0 : i32
    return %c0_i32, %c0_i32_0 : i32, i32
  }
  func.func @transform_10(%arg0: i32) -> (i32, i32, i32) {
    %c0_i32 = arith.constant 0 : i32
    %c0_i32_0 = arith.constant 0 : i32
    %c0_i32_1 = arith.constant 0 : i32
    return %arg0, %c0_i32, %c0_i32_0 : i32, i32, i32
  }
}

</mosaic_0001>

<bundles_post_ra>
// kernel: ne.22
= control target key start
LH: loop header
LB: loop body
LE: loop exit
PB: predicated region body
PF: predicated region fallthrough
CT: control target
= control target key end

     0   :  { %v16_v2 = vmov 0   ;;  %s41_s0 = inlined_call_operand.vmem [shape: f32[2,8], index: 0, kind: input, shape index: {}, may-alias: {0,1}]   ;;  %s42_s1 = inlined_call_operand.vmem [shape: f32[2,8], index: 1, kind: input, shape index: {}, may-alias: {0,1}]   ;;  %s43_s2 = inlined_call_operand.vmem [shape: pred[2,8], index: 2, kind: output, shape index: {}]  }
   0x1   :  { %v3_v0 = vld [vmem:[%s41_s0] sm:$0x3] }
   0x2   :  { %v4_v1 = vld [vmem:[%s42_s1] sm:$0x3] }
   0x3   :  { %vm7_vm0 = vcmp.ne.f32.partialorder %v3_v0, %v4_v1 }
   0x4   :  { %v8_v3 = vsel %vm7_vm0, 1, %v16_v2 }
   0x5   :  { %v10_v4 = vpack.c.b16 0, %v8_v3 }
   0x7   :  { %v11_v5 = vpack.c.b8 0, %v10_v4 }
   0x9   :  { %14 = vst [vmem:[%s43_s2] sm:$0x1] %v11_v5 }

// kernel: custom-call.17
= control target key start
LH: loop header
LB: loop body
LE: loop exit
PB: predicated region body
PF: predicated region fallthrough
CT: control target
= control target key end

     0   :  { %s6_s0 = inlined_call_operand.vmem [shape: u32[2,8], index: 0, kind: output, shape index: {}]  }

// kernel: squeeze.21
= control target key start
LH: loop header
LB: loop body
LE: loop exit
PB: predicated region body
PF: predicated region fallthrough
CT: control target
= control target key end

     0   :  { %vm7_vm0 = vcmask 64512   ;;  %s39_s0 = inlined_call_operand.vmem [shape: f32[16], index: 0, kind: input, shape index: {}]   ;;  %s40_s1 = inlined_call_operand.vmem [shape: f32[2,8], index: 1, kind: output, shape index: {}]  }
   0x1   :  { %v4_v0 = vld [vmem:[%s39_s0] sm:$0x1]  ;;  %s22_s0 = smov 120  }
   0x2   :  { %5 = vst [vmem:[#allocation1] sm:$0x1] %v4_v0 }
   0x9   :  { %v9_v1 = vld [vmem:[#allocation1] sm:$0x1]  }
   0xa   :  { %v6_v2 = vld [vmem:[#allocation1] sm:$0x1]   ;;  %10 = vrot.lane.b32.xlu0 %v9_v1, %s22_s0 }
   0xb   :  { %8 = vst.msk [vmem:[#allocation0] sm:$0x1] %vm7_vm0, %v6_v2  }
  0x7c   :  { %v11_v3 = vpop.permute.xlu0 %10  }
  0x7d   :  { %14 = vst.msk [vmem:[#allocation0 + $0x1] sm:$0x1] %vm7_vm0, %v11_v3  }
  0x84   :  { %v17_v4 = vld [vmem:[#allocation0] sm:$0x3] }
  0x85   :  { %20 = vst [vmem:[%s40_s1] sm:$0x3] %v17_v4 }

// kernel: fastspeech2_forward.5
= control target key start
LH: loop header
LB: loop body
LE: loop exit
PB: predicated region body
PF: predicated region fallthrough
CT: control target
= control target key end

     0   :  { %s1393_s18 = smov 0   ;;  %s1658_s0 = inlined_call_operand.vmem [shape: f32[2,8,32], index: 0, kind: input, shape index: {}]   ;;  %s1659_s1 = inlined_call_operand.vmem [shape: f32[2,1,8], index: 1, kind: input, shape index: {}]   ;;  %s1660_s2 = inlined_call_operand.vmem [shape: f32[2,8,1], index: 2, kind: input, shape index: {}]   ;;  %s1661_s3 = inlined_call_operand.vmem [shape: f32[32,96], index: 3, kind: input, shape index: {}]   ;;  %s1662_s4 = inlined_call_operand.vmem [shape: f32[1,96], index: 4, kind: input, shape index: {}]   ;;  %s1663_s5 = inlined_call_operand.vmem [shape: f32[32,32], index: 5, kind: input, shape index: {}]   ;;  %s1664_s6 = inlined_call_operand.vmem [shape: f32[1,32], index: 6, kind: input, shape index: {}]   ;;  %s1665_s7 = inlined_call_operand.vmem [shape: f32[1,32], index: 7, kind: input, shape index: {}]   ;;  %s1666_s8 = inlined_call_operand.vmem [shape: f32[1,32], index: 8, kind: input, shape index: {}]   ;;  %s1667_s9 = inlined_call_operand.vmem [shape: f32[9,32,64], index: 9, kind: input, shape index: {}]   ;;  %s1668_s10 = inlined_call_operand.vmem [shape: f32[1,64], index: 10, kind: input, shape index: {}]   ;;  %s1669_s11 = inlined_call_operand.vmem [shape: f32[64,32], index: 11, kind: input, shape index: {}]   ;;  %s1670_s12 = inlined_call_operand.vmem [shape: f32[1,32], index: 12, kind: input, shape index: {}]   ;;  %s1671_s13 = inlined_call_operand.vmem [shape: f32[1,32], index: 13, kind: input, shape index: {}]   ;;  %s1672_s14 = inlined_call_operand.vmem [shape: f32[1,32], index: 14, kind: input, shape index: {}]   ;;  %s1673_s15 = inlined_call_operand.vmem [shape: f32[2,8,32], index: 15, kind: output, shape index: {}]  }
   0x1 LB: > { %s1196_s19 = sadd.s32 4294967295, %s1302_s18   ;;  %p1200_p0 = scmp.ge.s32.totalorder %s1302_s18, 1  ;;  %s1302_s18 = sphi %s1393_s18, %s25_s18  }
   0x2   : > { %p453_p1 = scmp.lt.s32.totalorder %s1302_s18, 3 }
   0x4   : > { %p454_p2 = pnand %p1200_p0, %p453_p1 }
   0x5   : > { %p506_p3 = scmp.lt.s32.totalorder (!%p454_p2), %s1196_s19, 1  ;;  %s1304_s21 = smov (!%p454_p2), 96  }
   0x6   : > { %457 = sbr.rel (%p454_p2) target bundleno = 1853 (0x73d), region = 80  ;;  %s1305_s22 = smov (!%p454_p2), 112  }
   0x7   : > { %s1306_s23 = smov (!%p454_p2), 80   ;;  %s1308_s27 = smov (!%p454_p2), 48  }
   0xb   : > { %v528_v0 = vld [vmem:[%s1661_s3 + $0x18] sm:$0xff]  ;;  %v527_v1 = vld [vmem:[%s1661_s3 + $0x10] sm:$0xff]  ;;  %v526_v2 = vld [vmem:[%s1661_s3 + $0x8] sm:$0xff]  ;;  %s1675_s19 = smov (!%p506_p3, %s1196_s19), 1  ;;  %vm533_vm0 = vcmask 261120   ;;  %vm564_vm1 = vcmask 130048  }
   0xc   : > { %549 = vmatpush.msra.mxu0 %v528_v0  ;;  %v525_v3 = vld [vmem:[%s1661_s3] sm:$0xff]  ;;  %s1416_s28 = sshll.u32 %s1675_s19, 3  ;;  %s512_s26 = scalar_lea.vmem %s1659_s1, %s1675_s19  ;;  %vm590_vm2 = vcmask 64512   ;;  %v701_v39 = vld [vmem:[%s1663_s5 + $0x18] sm:$0xff]  ;;  %v700_v40 = vld [vmem:[%s1663_s5 + $0x10] sm:$0xff]  ;;  %v1310_v52 = vmov 32.0  }
   0xd   : > { %s509_s16 = scalar_lea.vmem %s1658_s0, %s1416_s28  ;;  %v1274_v5 = vld [vmem:[%s1662_s4] ss:$0 sm:$0xff]  ;;  %s1307_s19 = smov 64   ;;  %v699_v41 = vld [vmem:[%s1663_s5 + $0x8] sm:$0xff]  ;;  %v1311_v54 = vmov 0   ;;  %vm1063_vm7 = vcmask 523264  }
   0xe   : > { %550 = vmatpush.msra.mxu0 %v527_v1  ;;  %v1422_v4 = vld [vmem:[%s509_s16] sm:$0xff]  ;;  %s516_s29 = scalar_lea.vmem %s1660_s2, %s1416_s28  ;;  %1273 = vset.pattern.permute.xlu0 %v1311_v54  ;;  %v1240_v54 = vld [vmem:[%s1667_s9 + $0xd0] sm:$0xff] }
   0xf   : > { %v522_v12 = vld [vmem:[%s512_s26] sm:$0x1] }
  0x10   : > { %551 = vmatpush.msra.mxu0 %v526_v2  ;;  %v523_v13 = vmul.f32 -1e+09, %v522_v12  ;;  %v698_v44 = vld [vmem:[%s1663_s5] sm:$0xff]  ;;  %v1312_v2 = vmov 0.0   ;;  %v1235_v12 = vld [vmem:[%s1667_s9 + $0xb0] sm:$0xff] }
  0x11   : > { %v1275_v47 = vld [vmem:[%s1664_s6] ss:$0 sm:$0xff]  ;;  %775 = vst.msk [vmem:[#allocation2] sm:$0xff] %vm533_vm0, %v1312_v2 }
  0x12   : > { %552 = vmatpush.msra.mxu0 %v525_v3  ;;  %v559_v14 = vperm.slane %v523_v13, 0  ;;  %v524_v53 = vld [vmem:[%s516_s29] sm:$0xff]  ;;  %776 = vst.msk [vmem:[#allocation2 + $0x8] sm:$0xff] %vm533_vm0, %v1312_v2  ;;  %v1215_v3 = vld [vmem:[%s1667_s9 + $0x38] sm:$0xff]  ;;  %v1213_v13 = vld [vmem:[%s1667_s9 + $0x28] sm:$0xff] }
  0x13   : > { %1204 = vmatmul.msk.f32.vlgmr.msra.gmra.mxu0 %vm533_vm0, %v1422_v4  ;;  %v1058_v2 = vld [vmem:[%s1669_s11 + $0x38] sm:$0xff] }
  0x90   : > { %v554_v6 = vpop.f32.mrf.mxu0 }
  0x91   : > { %v555_v7 = vadd.f32 %v1274_v5, %v554_v6  ;;  %v1226_v5 = vld [vmem:[%s1667_s9 + $0x78] sm:$0xff] }
  0x93   : > { %562 = vrot.lane.b32.xlu0 %v555_v7, %s1304_s21  ;;  %v557_v8 = vmul.f32 0.25, %v555_v7 }
  0x95   : > { %628 = vrot.lane.b32.xlu1 %v557_v8, %s1305_s22  ;;  %s1309_s22 = smov 16  }
  0x9b   : > { %630 = vrot.lane.b32.xlu0 %v555_v7, %s1306_s23 }
 0x105   : > { %v563_v9 = vpop.permute.xlu0 %562 }
 0x106   : > { %1205 = vmatpush.xpose.msk.msra.mxu1 %vm564_vm1, %v563_v9  ;;  %v780_v9 = vld [vmem:[%s1667_s9 + $0x10] sm:$0xff] }
 0x107   : > { %v629_v11 = vpop.permute.xlu1 %628 }
 0x109   : > { %1206 = vmatmul.msk.f32.vlgmr.msra.gmra.mxu1 %vm564_vm1, %v557_v8  ;;  %v1214_v8 = vld [vmem:[%s1667_s9 + $0x30] sm:$0xff] }
 0x10a   : > { %721 = vmatpush.msrb.mxu1 %v701_v39 }
 0x10c   : > { %722 = vmatpush.msrb.mxu1 %v700_v40  ;;  %v1276_v40 = vld [vmem:[%s1665_s7] ss:$0 sm:$0xff] }
 0x10d   : > { %v631_v10 = vpop.permute.xlu0 %630 }
 0x10e   : > { %1208 = vmatpush.xpose.msk.msra.mxu3 %vm564_vm1, %v631_v10  ;;  %723 = vmatpush.msrb.mxu1 %v699_v41 }
 0x110   : > { %724 = vmatpush.msrb.mxu1 %v698_v44 }
 0x111   : > { %1209 = vmatmul.msk.f32.vlgmr.msra.gmra.mxu3 %vm564_vm1, %v629_v11  ;;  %v1225_v11 = vld [vmem:[%s1667_s9 + $0x70] sm:$0xff] }
 0x112   : > { %804 = vmatpush.msrb.mxu3 %v1215_v3  ;;  %886 = vmatpush.msra.mxu1 %v1226_v5  ;;  %v1057_v3 = vld [vmem:[%s1669_s11 + $0x30] sm:$0xff]  ;;  %v1055_v5 = vld [vmem:[%s1669_s11 + $0x20] sm:$0xff] }
 0x114   : > { %805 = vmatpush.msrb.mxu3 %v1214_v8  ;;  %887 = vmatpush.msra.mxu1 %v1225_v11  ;;  %v1052_v8 = vld [vmem:[%s1669_s11 + $0x8] sm:$0xff] }
 0x116   : > { %806 = vmatpush.msrb.mxu3 %v1213_v13 }
 0x186   : > { %v587_v15 = vpop.f32.mrf.mxu1 }
 0x187   : > { %v588_v16 = vadd.f32 %v587_v15, %v559_v14  ;;  %v1224_v15 = vld [vmem:[%s1667_s9 + $0x68] sm:$0xff] }
 0x188   : > { %888 = vmatpush.msra.mxu1 %v1224_v15 }
 0x189   : > { %v591_v17 = vsel %vm590_vm2, %v588_v16, -inf }
 0x18a   : > { %592 = vmax.xlane.f32.xlu1 %v591_v17 }
 0x194   : > { %v653_v18 = vpop.f32.mrf.mxu3 }
 0x195   : > { %v654_v19 = vadd.f32 %v653_v18, %v559_v14  ;;  %v779_v14 = vld [vmem:[%s1667_s9 + $0x8] sm:$0xff]  ;;  %v1212_v18 = vld [vmem:[%s1667_s9 + $0x20] sm:$0xff] }
 0x196   : > { %807 = vmatpush.msrb.mxu3 %v1212_v18 }
 0x197   : > { %v656_v20 = vsel %vm590_vm2, %v654_v19, -inf }
 0x198   : > { %657 = vmax.xlane.f32.xlu2 %v656_v20  ;;  %v1223_v20 = vld [vmem:[%s1667_s9 + $0x60] sm:$0xff] }
 0x199   : > { %889 = vmatpush.msra.mxu1 %v1223_v20 }
 0x1fd   : > { %v593_v21 = vpop.xlane.xlu1 %592 }
 0x1fe   : > { %v594_v22 = vsub.f32 %v588_v16, %v593_v21  ;;  %v1234_v16 = vld [vmem:[%s1667_s9 + $0xa8] sm:$0xff]  ;;  %v1233_v21 = vld [vmem:[%s1667_s9 + $0xa0] sm:$0xff] }
 0x200   : > { %v595_v23 = vmul.f32 1.442695, %v594_v22  ;;  %v1221_v22 = vld [vmem:[%s1667_s9 + $0x58] sm:$0xff] }
 0x202   : > { %1282 = vpow2.f32 %v595_v23  ;;  %v1231_v23 = vld [vmem:[%s1667_s9 + $0x98] sm:$0xff] }
 0x203   : > { %916 = vmatpush.msra.mxu3 %v1231_v23 }
 0x208   : > { %v1283_v24 = vpop.eup %1282 }
 0x209   : > { %v597_v25 = vsel %vm590_vm2, %v1283_v24, 0.0 }
 0x20a   : > { %598 = vadd.xlane.f32.xlu2 %v597_v25  ;;  %v1220_v25 = vld [vmem:[%s1667_s9 + $0x50] sm:$0xff] }
 0x20b   : > { %v658_v26 = vpop.xlane.xlu2 %657 }
 0x20c   : > { %v659_v27 = vsub.f32 %v654_v19, %v658_v26  ;;  %v778_v19 = vld [vmem:[%s1667_s9] sm:$0xff]  ;;  %v1230_v26 = vld [vmem:[%s1667_s9 + $0x90] sm:$0xff] }
 0x20d   : > { %917 = vmatpush.msra.mxu3 %v1230_v26 }
 0x20e   : > { %v660_v28 = vmul.f32 1.442695, %v659_v27  ;;  %v1245_v27 = vld [vmem:[%s1667_s9 + $0xf0] sm:$0xff] }
 0x210   : > { %1284 = vpow2.f32 %v660_v28  ;;  %v1219_v28 = vld [vmem:[%s1667_s9 + $0x48] sm:$0xff] }
 0x216   : > { %v1285_v29 = vpop.eup %1284 }
 0x217   : > { %v662_v30 = vsel %vm590_vm2, %v1285_v29, 0.0 }
 0x218   : > { %663 = vadd.xlane.f32.xlu0 %v662_v30 }
 0x222   : > { %602 = vrot.lane.b32.xlu2 %v555_v7, %s1307_s19 }
 0x22a   : > { %667 = vrot.lane.b32.xlu2 %v555_v7, %s1308_s27  ;;  %v1236_v7 = vld [vmem:[%s1667_s9 + $0xb8] sm:$0xff]  ;;  %s520_s27 = scalar_lea.vmem %s1673_s15, %s1416_s28 }
 0x22b   : > { %946 = vmatpush.msrb.mxu0 %v1236_v7  ;;  %v1053_v7 = vld [vmem:[%s1669_s11 + $0x10] sm:$0xff] }
 0x22c   : > { %771 = vperm.xlu0 %1273, %v524_v53  }
 0x22d   : > { %947 = vmatpush.msrb.mxu0 %v1235_v12 }
 0x22f   : > { %948 = vmatpush.msrb.mxu0 %v1234_v16 }
 0x231   : > { %949 = vmatpush.msrb.mxu0 %v1233_v21 }
 0x233   : > { %1075 = vmatpush.msra.mxu0 %v1058_v2 }
 0x235   : > { %1076 = vmatpush.msra.mxu0 %v1057_v3 }
 0x27d   : > { %v599_v31 = vpop.xlane.xlu2 %598 }
 0x27e   : > { %1286 = vrcp.f32 %v599_v31  ;;  %v1244_v31 = vld [vmem:[%s1667_s9 + $0xe8] sm:$0xff] }
 0x284   : > { %v1287_v32 = vpop.eup %1286 }
 0x285   : > { %v603_v33 = vpop.permute.xlu2 %602  ;;  %v601_v34 = vmul.f32 %v1287_v32, %v1283_v24  ;;  %v1246_v24 = vld [vmem:[%s1667_s9 + $0xf8] sm:$0xff] }
 0x286   : > { %623 = vmatpush.msra.mxu2 %v603_v33  ;;  %v1218_v33 = vld [vmem:[%s1667_s9 + $0x40] sm:$0xff] }
 0x287   : > { %1207 = vmatmul.msk.f32.vlgmr.msra.gmra.mxu2 %vm590_vm2, %v601_v34  ;;  %v1228_v34 = vld [vmem:[%s1667_s9 + $0x80] sm:$0xff] }
 0x28b   : > { %v664_v35 = vpop.xlane.xlu0 %663 }
 0x28c   : > { %1288 = vrcp.f32 %v664_v35  ;;  %v1243_v35 = vld [vmem:[%s1667_s9 + $0xe0] sm:$0xff] }
 0x28d   : > { %v668_v36 = vpop.permute.xlu2 %667  ;;  %1290 = vrcp.f32 %v1310_v52 }
 0x28e   : > { %688 = vmatpush.msrb.mxu2 %v668_v36 }
 0x292   : > { %v1289_v37 = vpop.eup %1288 }
 0x293   : > { %v666_v38 = vmul.f32 %v1289_v37, %v1285_v29  ;;  %v1291_v55 = vpop.eup %1290  ;;  %v1229_v29 = vld [vmem:[%s1667_s9 + $0x88] sm:$0xff] }
 0x294   : > { %v736_v56 = vmul.f32 32.0, %v1291_v55  ;;  %vm740_vm3 = vweird.f32 %v1291_v55  ;;  %918 = vmatpush.msra.mxu3 %v1229_v29 }
 0x295   : > { %1210 = vmatmul.msk.f32.vlgmr.msrb.gmra.mxu2 %vm590_vm2, %v666_v38 }
 0x296   : > { %v737_v57 = vsub.f32 1.0, %v736_v56  ;;  %919 = vmatpush.msra.mxu3 %v1228_v34  ;;  %v1239_v56 = vld [vmem:[%s1667_s9 + $0xc8] sm:$0xff] }
 0x298   : > { %v738_v58 = vmul.f32 %v1291_v55, %v737_v57  ;;  %v1249_v57 = vld [vmem:[%s1667_s9 + $0x108] sm:$0xff] }
 0x29a   : > { %v739_v59 = vadd.f32 %v1291_v55, %v738_v58  ;;  %v1238_v58 = vld [vmem:[%s1667_s9 + $0xc0] sm:$0xff] }
 0x29c   : > { %v1466_v60 = vsel %vm740_vm3, %v1291_v55, %v739_v59  ;;  %v1250_v55 = vld [vmem:[%s1667_s9 + $0x110] sm:$0xff] }
 0x30a   : > { %v625_v42 = vpop.f32.mrf.mxu2 }
 0x318   : > { %v690_v43 = vpop.f32.mrf.mxu2 }
 0x319   : > { %694 = vrot.lane.b32.xlu2 %v690_v43, %s1309_s22 }
 0x373   : > { %v695_v45 = vpop.permute.xlu2 %694 }
 0x374   : > { %v697_v46 = vsel %vm564_vm1, %v625_v42, %v695_v45  ;;  %v1277_v42 = vld [vmem:[%s1666_s8] ss:$0 sm:$0xff]  ;;  %v1568_v45 = vpop.permute.xlu0 %771 }
 0x375   : > { %1211 = vmatmul.msk.f32.vlgmr.msrb.gmra.mxu1 %vm533_vm0, %v697_v46 }
 0x376   : > { %1006 = vmatpush.msrb.mxu1 %v1246_v24 }
 0x378   : > { %1007 = vmatpush.msrb.mxu1 %v1245_v27 }
 0x37a   : > { %1008 = vmatpush.msrb.mxu1 %v1244_v31 }
 0x37c   : > { %1009 = vmatpush.msrb.mxu1 %v1243_v35 }
 0x3f2   : > { %v726_v48 = vpop.f32.mrf.mxu1 }
 0x3f3   : > { %v727_v49 = vadd.f32 %v1275_v47, %v726_v48  ;;  %v1241_v48 = vld [vmem:[%s1667_s9 + $0xd8] sm:$0xff] }
 0x3f5   : > { %v729_v50 = vadd.f32 %v727_v49, %v1422_v4  ;;  %v781_v4 = vld [vmem:[%s1667_s9 + $0x18] sm:$0xff] }
 0x3f6   : > { %827 = vmatpush.msra.mxu2 %v781_v4  ;;  %v1251_v49 = vld [vmem:[%s1667_s9 + $0x118] sm:$0xff]  ;;  %v1056_v4 = vld [vmem:[%s1669_s11 + $0x28] sm:$0xff] }
 0x3f7   : > { %v732_v51 = vsel %vm533_vm0, %v729_v50, 0.0  ;;  %1077 = vmatpush.msra.mxu0 %v1056_v4 }
 0x3f8   : > { %733 = vadd.xlane.f32.xlu1 %v732_v51  ;;  %828 = vmatpush.msra.mxu2 %v780_v9  ;;  %v1051_v9 = vld [vmem:[%s1669_s11] sm:$0xff] }
 0x3f9   : > { %1078 = vmatpush.msra.mxu0 %v1055_v5 }
 0x3fa   : > { %829 = vmatpush.msra.mxu2 %v779_v14 }
 0x3fc   : > { %830 = vmatpush.msra.mxu2 %v778_v19 }
 0x3fe   : > { %856 = vmatpush.msrb.mxu2 %v1221_v22 }
 0x400   : > { %857 = vmatpush.msrb.mxu2 %v1220_v25  ;;  %v1278_v25 = vld [vmem:[%s1668_s10] ss:$0 sm:$0xff] }
 0x402   : > { %858 = vmatpush.msrb.mxu2 %v1219_v28 }
 0x404   : > { %859 = vmatpush.msrb.mxu2 %v1218_v33 }
 0x46b   : > { %v734_v61 = vpop.xlane.xlu1 %733 }
 0x46c   : > { %v742_v62 = vmul.f32 %v1466_v60, %v734_v61 }
 0x46e   : > { %v1469_v63 = vsub.f32 %v729_v50, %v742_v62  ;;  %v1248_v62 = vld [vmem:[%s1667_s9 + $0x100] sm:$0xff] }
 0x470   : > { %v744_v0 = vmul.f32 %v1469_v63, %v1469_v63 }
 0x472   : > { %v745_v1 = vsel %vm533_vm0, %v744_v0, 0.0 }
 0x473   : > { %746 = vadd.xlane.f32.xlu2 %v745_v1 }
 0x4e6   : > { %v747_v6 = vpop.xlane.xlu2 %746 }
 0x4e7   : > { %v748_v10 = vmul.f32 %v747_v6, %v1466_v60  ;;  %v1054_v6 = vld [vmem:[%s1669_s11 + $0x18] sm:$0xff] }
 0x4e8   : > { %1079 = vmatpush.msra.mxu0 %v1054_v6 }
 0x4e9   : > { %v749_v17 = vadd.f32 1e-06, %v748_v10 }
 0x4ea   : > { %1080 = vmatpush.msra.mxu0 %v1053_v7 }
 0x4eb   : > { %1292 = vrsqrt.f32 %v749_v17  ;;  %vm756_vm5 = vweird.f32 %v749_v17 }
 0x4ec   : > { %1081 = vmatpush.msra.mxu0 %v1052_v8 }
 0x4ee   : > { %1082 = vmatpush.msra.mxu0 %v1051_v9 }
 0x4f1   : > { %v1293_v30 = vpop.eup %1292 }
 0x4f2   : > { %v751_v32 = vmul.f32 %v1293_v30, %v749_v17  ;;  %vm757_vm4 = vweird.f32 %v1293_v30 }
 0x4f3   : > { %vm758_vm6 = vmor %vm756_vm5, %vm757_vm4 }
 0x4f4   : > { %v752_v36 = vmul.f32 %v1293_v30, %v751_v32 }
 0x4f6   : > { %v753_v37 = vmul.f32 0.5, %v752_v36 }
 0x4f8   : > { %v754_v38 = vsub.f32 1.5, %v753_v37 }
 0x4fa   : > { %v755_v39 = vmul.f32 %v1293_v30, %v754_v38 }
 0x4fc   : > { %v759_v41 = vsel %vm758_vm6, %v1293_v30, %v755_v39  ;;  %v1279_v30 = vld [vmem:[%s1670_s12] ss:$0 sm:$0xff] }
 0x4fd   : > { %v760_v43 = vmul.f32 %v759_v41, %v1469_v63 }
 0x4ff   : > { %v764_v44 = vmul.f32 %v1276_v40, %v760_v43 }
 0x501   : > { %v768_v46 = vadd.f32 %v1277_v42, %v764_v44 }
 0x503   : > { %v1571_v47 = vmul.f32 %v1568_v45, %v768_v46 }
 0x505   : > { %777 = vst.msk [vmem:[#allocation2 + $0x4] sm:$0xff] %vm533_vm0, %v1571_v47 }
 0x50c   : > { %v788_v50 = vld [vmem:[#allocation2 + $0x1] sm:$0xff] }
 0x50d   : > { %v782_v51 = vld [vmem:[#allocation2] sm:$0xff]  ;;  %1216 = vmatmul.msk.f32.vlgmr.msrb.gmra.mxu3 %vm533_vm0, %v788_v50  ;;  %v1020_v1 = vld [vmem:[#allocation2 + $0x8] sm:$0xff] }
 0x50e   : > { %v870_v52 = vld [vmem:[#allocation2 + $0x3] sm:$0xff]  ;;  %1217 = vmatmul.msk.f32.vlgmr.msra.gmra.mxu2 %vm533_vm0, %v782_v51  ;;  %1036 = vmatpush.msrb.mxu3 %v1251_v49  ;;  %v1280_v50 = vld [vmem:[%s1671_s13] ss:$0 sm:$0xff] }
 0x50f   : > { %v930_v53 = vld [vmem:[#allocation2 + $0x5] sm:$0xff]  ;;  %1227 = vmatmul.msk.f32.vlgmr.msra.gmra.mxu1 %vm533_vm0, %v870_v52  ;;  %976 = vmatpush.msra.mxu2 %v1241_v48 }
 0x510   : > { %1237 = vmatmul.msk.f32.vlgmr.msrb.gmra.mxu0 %vm533_vm0, %v930_v53  ;;  %1037 = vmatpush.msrb.mxu3 %v1250_v55  ;;  %v840_v59 = vld [vmem:[#allocation2 + $0x2] sm:$0xff] }
 0x511   : > { %977 = vmatpush.msra.mxu2 %v1240_v54  ;;  %v900_v61 = vld [vmem:[#allocation2 + $0x4] sm:$0xff] }
 0x512   : > { %1038 = vmatpush.msrb.mxu3 %v1249_v57  ;;  %v990_v63 = vld [vmem:[#allocation2 + $0x7] sm:$0xff] }
 0x513   : > { %978 = vmatpush.msra.mxu2 %v1239_v56  ;;  %v960_v0 = vld [vmem:[#allocation2 + $0x6] sm:$0xff] }
 0x514   : > { %1039 = vmatpush.msrb.mxu3 %v1248_v62 }
 0x515   : > { %1232 = vmatmul.msk.f32.vlgmr.msra.gmra.mxu3 %vm533_vm0, %v900_v61  ;;  %979 = vmatpush.msra.mxu2 %v1238_v58 }
 0x516   : > { %1222 = vmatmul.msk.f32.vlgmr.msrb.gmra.mxu2 %vm533_vm0, %v840_v59 }
 0x517   : > { %1247 = vmatmul.msk.f32.vlgmr.msrb.gmra.mxu1 %vm533_vm0, %v990_v63 }
 0x51d   : > { %1252 = vmatmul.msk.f32.vlgmr.msrb.gmra.mxu3 %vm533_vm0, %v1020_v1 }
 0x51e   : > { %1242 = vmatmul.msk.f32.vlgmr.msra.gmra.mxu2 %vm533_vm0, %v960_v0 }
 0x58c   : > { %v891_v13 = vpop.f32.mrf.mxu1 }
 0x58d   : > { %v951_v19 = vpop.f32.mrf.mxu0 }
 0x590   : > { %v809_v10 = vpop.f32.mrf.mxu3 }
 0x591   : > { %v832_v11 = vpop.f32.mrf.mxu2 }
 0x592   : > { %v833_v12 = vadd.f32 %v832_v11, %v809_v10 }
 0x594   : > { %v1011_v23 = vpop.f32.mrf.mxu1 }
 0x598   : > { %v921_v16 = vpop.f32.mrf.mxu3 }
 0x599   : > { %v861_v14 = vpop.f32.mrf.mxu2 }
 0x59a   : > { %v864_v15 = vadd.f32 %v861_v14, %v833_v12 }
 0x59c   : > { %v894_v17 = vadd.f32 %v891_v13, %v864_v15 }
 0x59e   : > { %v924_v18 = vadd.f32 %v921_v16, %v894_v17 }
 0x5a0   : > { %v954_v20 = vadd.f32 %v951_v19, %v924_v18  ;;  %v1041_v26 = vpop.f32.mrf.mxu3 }
 0x5a1   : > { %v981_v21 = vpop.f32.mrf.mxu2 }
 0x5a2   : > { %v984_v22 = vadd.f32 %v981_v21, %v954_v20 }
 0x5a4   : > { %v1014_v24 = vadd.f32 %v1011_v23, %v984_v22 }
 0x5a6   : > { %v1044_v27 = vadd.f32 %v1041_v26, %v1014_v24 }
 0x5a8   : > { %v1049_v28 = vadd.f32 %v1278_v25, %v1044_v27 }
 0x5aa   : > { %v1050_v29 = vmax.f32 %v1049_v28, 0.0 }
 0x5ac   : > { %1253 = vmatmul.msk.f32.vlgmr.msra.gmra.mxu0 %vm1063_vm7, %v1050_v29 }
 0x629   : > { %v1084_v31 = vpop.f32.mrf.mxu0 }
 0x62a   : > { %v1085_v32 = vadd.f32 %v1279_v30, %v1084_v31 }
 0x62c   : > { %v1087_v33 = vadd.f32 %v1085_v32, %v1571_v47 }
 0x62e   : > { %v1090_v34 = vsel %vm533_vm0, %v1087_v33, 0.0 }
 0x62f   : > { %1091 = vadd.xlane.f32.xlu1 %v1090_v34 }
 0x6a2   : > { %v1092_v35 = vpop.xlane.xlu1 %1091 }
 0x6a3   : > { %v1093_v36 = vmul.f32 %v1092_v35, %v1466_v60 }
 0x6a5   : > { %v1094_v37 = vsub.f32 %v1087_v33, %v1093_v36 }
 0x6a7   : > { %v1095_v38 = vmul.f32 %v1094_v37, %v1094_v37 }
 0x6a9   : > { %v1096_v39 = vsel %vm533_vm0, %v1095_v38, 0.0 }
 0x6aa   : > { %1097 = vadd.xlane.f32.xlu1 %v1096_v39 }
 0x71d   : > { %v1098_v40 = vpop.xlane.xlu1 %1097 }
 0x71e   : > { %v1099_v41 = vmul.f32 %v1098_v40, %v1466_v60  ;;  %v1281_v60 = vld [vmem:[%s1672_s14] ss:$0 sm:$0xff] }
 0x720   : > { %v1100_v42 = vadd.f32 1e-06, %v1099_v41 }
 0x722   : > { %1294 = vrsqrt.f32 %v1100_v42  ;;  %vm1107_vm9 = vweird.f32 %v1100_v42 }
 0x728   : > { %v1295_v43 = vpop.eup %1294 }
 0x729   : > { %v1102_v44 = vmul.f32 %v1295_v43, %v1100_v42  ;;  %vm1108_vm8 = vweird.f32 %v1295_v43 }
 0x72a   : > { %vm1109_vm10 = vmor %vm1107_vm9, %vm1108_vm8 }
 0x72b   : > { %v1103_v46 = vmul.f32 %v1295_v43, %v1102_v44 }
 0x72d   : > { %v1104_v47 = vmul.f32 0.5, %v1103_v46 }
 0x72f   : > { %v1105_v48 = vsub.f32 1.5, %v1104_v47 }
 0x731   : > { %v1106_v49 = vmul.f32 %v1295_v43, %v1105_v48 }
 0x733   : > { %v1110_v51 = vsel %vm1109_vm10, %v1295_v43, %v1106_v49 }
 0x734   : > { %v1111_v52 = vmul.f32 %v1110_v51, %v1094_v37 }
 0x736   : > { %v1115_v53 = vmul.f32 %v1280_v50, %v1111_v52 }
 0x738   : > { %v1119_v54 = vadd.f32 %v1281_v60, %v1115_v53 }
 0x73a   : > { %v1120_v55 = vmul.f32 %v1119_v54, %v1568_v45 }
 0x73c   : > { %1121 = vst.msk [vmem:[%s520_s27] sm:$0xff] %vm533_vm0, %v1120_v55 }
 0x73d PF: > { %s25_s18 = sadd.s32 1, %s1302_s18  }
 0x73e   : > { %p22_p4 = scmp.ge.s32.totalorder %s25_s18, 4  }
 0x740   :  { %24 = sbr.rel (!%p22_p4) target bundleno = 1 (0x1), region = 124 }

// kernel: fastspeech2_forward.7
= control target key start
LH: loop header
LB: loop body
LE: loop exit
PB: predicated region body
PF: predicated region fallthrough
CT: control target
= control target key end

     0   :  { %s1670_s18 = smov 0   ;;  %s1990_s0 = inlined_call_operand.vmem [shape: f32[2,16,32], index: 0, kind: input, shape index: {}]   ;;  %s1991_s1 = inlined_call_operand.vmem [shape: f32[2,1,16], index: 1, kind: input, shape index: {}]   ;;  %s1992_s2 = inlined_call_operand.vmem [shape: f32[2,16,1], index: 2, kind: input, shape index: {}]   ;;  %s1993_s3 = inlined_call_operand.vmem [shape: f32[32,96], index: 3, kind: input, shape index: {}]   ;;  %s1994_s4 = inlined_call_operand.vmem [shape: f32[1,96], index: 4, kind: input, shape index: {}]   ;;  %s1995_s5 = inlined_call_operand.vmem [shape: f32[32,32], index: 5, kind: input, shape index: {}]   ;;  %s1996_s6 = inlined_call_operand.vmem [shape: f32[1,32], index: 6, kind: input, shape index: {}]   ;;  %s1997_s7 = inlined_call_operand.vmem [shape: f32[1,32], index: 7, kind: input, shape index: {}]   ;;  %s1998_s8 = inlined_call_operand.vmem [shape: f32[1,32], index: 8, kind: input, shape index: {}]   ;;  %s1999_s9 = inlined_call_operand.vmem [shape: f32[9,32,64], index: 9, kind: input, shape index: {}]   ;;  %s2000_s10 = inlined_call_operand.vmem [shape: f32[1,64], index: 10, kind: input, shape index: {}]   ;;  %s2001_s11 = inlined_call_operand.vmem [shape: f32[64,32], index: 11, kind: input, shape index: {}]   ;;  %s2002_s12 = inlined_call_operand.vmem [shape: f32[1,32], index: 12, kind: input, shape index: {}]   ;;  %s2003_s13 = inlined_call_operand.vmem [shape: f32[1,32], index: 13, kind: input, shape index: {}]   ;;  %s2004_s14 = inlined_call_operand.vmem [shape: f32[1,32], index: 14, kind: input, shape index: {}]   ;;  %s2005_s15 = inlined_call_operand.vmem [shape: f32[2,16,32], index: 15, kind: output, shape index: {}]  }
   0x1 LB: > { %s1425_s19 = sadd.s32 4294967295, %s1579_s18   ;;  %p1429_p0 = scmp.ge.s32.totalorder %s1579_s18, 1  ;;  %s1579_s18 = sphi %s1670_s18, %s25_s18  }
   0x2   : > { %p455_p1 = scmp.lt.s32.totalorder %s1579_s18, 3 }
   0x4   : > { %p456_p2 = pnand %p1429_p0, %p455_p1 }
   0x5   : > { %p511_p3 = scmp.lt.s32.totalorder (!%p456_p2), %s1425_s19, 1  ;;  %s1581_s21 = smov (!%p456_p2), 112  }
   0x6   : > { %459 = sbr.rel (%p456_p2) target bundleno = 1914 (0x77a), region = 80  ;;  %s1582_s22 = smov (!%p456_p2), 80  }
   0x7   : > { %s1583_s23 = smov (!%p456_p2), 96   ;;  %s1585_s27 = smov (!%p456_p2), 48  }
   0xb   : > { %v538_v0 = vld [vmem:[%s1993_s3 + $0x18] sm:$0xff]  ;;  %v537_v1 = vld [vmem:[%s1993_s3 + $0x10] sm:$0xff]  ;;  %v536_v2 = vld [vmem:[%s1993_s3 + $0x8] sm:$0xff]  ;;  %s2007_s19 = smov (!%p511_p3, %s1425_s19), 1  ;;  %vm543_vm0 = vcmask 261120   ;;  %vm584_vm1 = vcmask 130048  }
   0xc   : > { %562 = vmatpush.msra.mxu0 %v538_v0  ;;  %v535_v3 = vld [vmem:[%s1993_s3] sm:$0xff]  ;;  %s1693_s28 = sshll.u32 %s2007_s19, 4  ;;  %s518_s26 = scalar_lea.vmem %s1991_s1, %s2007_s19  ;;  %vm1257_vm9 = vcmask 523264  }
   0xd   : > { %s515_s16 = scalar_lea.vmem %s1990_s0, %s1693_s28  ;;  %v1539_v6 = vld [vmem:[%s1994_s4] ss:$0 sm:$0xff]  ;;  %s1584_s19 = smov 64  }
   0xe   : > { %563 = vmatpush.msra.mxu0 %v537_v1  ;;  %v1699_v4 = vld [vmem:[%s515_s16] sm:$0xff]  ;;  %v1703_v5 = vld [vmem:[%s515_s16 + $0x8] sm:$0xff]  ;;  %s523_s29 = scalar_lea.vmem %s1992_s2, %s1693_s28 }
   0xf   : > { %v531_v20 = vld [vmem:[%s518_s26] sm:$0x1] }
  0x10   : > { %564 = vmatpush.msra.mxu0 %v536_v2  ;;  %v532_v21 = vmul.f32 -1e+09, %v531_v20 }
  0x12   : > { %565 = vmatpush.msra.mxu0 %v535_v3  ;;  %v576_v22 = vperm.slane %v532_v21, 0 }
  0x13   : > { %1436 = vmatmul.msk.f32.vlgmr.msra.gmra.mxu0 %vm543_vm0, %v1699_v4 }
  0x1b   : > { %1437 = vmatmul.msk.f32.gmra.mxu0 %vm543_vm0, %v1703_v5 }
  0x90   : > { %v567_v7 = vpop.f32.mrf.mxu0 }
  0x91   : > { %v568_v8 = vadd.f32 %v1539_v6, %v567_v7 }
  0x93   : > { %v573_v9 = vmul.f32 0.25, %v568_v8 }
  0x95   : > { %675 = vrot.lane.b32.xlu2 %v573_v9, %s1581_s21 }
  0x98   : > { %v570_v10 = vpop.f32.mrf.mxu0 }
  0x99   : > { %v571_v11 = vadd.f32 %v1539_v6, %v570_v10 }
  0x9b   : > { %681 = vrot.lane.b32.xlu1 %v571_v11, %s1582_s22  ;;  %582 = vrot.lane.b32.xlu0 %v571_v11, %s1583_s23  ;;  %v574_v12 = vmul.f32 0.25, %v571_v11  ;;  %v1710_v13 = vpack.i.bf16 %v568_v8, %v571_v11  ;;  %v784_v11 = vld [vmem:[%s1995_s5 + $0x18] sm:$0xff] }
  0x9c   : > { %807 = vmatpush.msrb.mxu0 %v784_v11 }
  0x9d   : > { %677 = vrot.lane.b32.xlu2 %v574_v12, %s1581_s21 }
  0xa3   : > { %679 = vrot.lane.b32.xlu1 %v568_v8, %s1582_s22  ;;  %580 = vrot.lane.b32.xlu0 %v568_v8, %s1583_s23  ;;  %s1586_s22 = smov 16  }
  0xef   : > { %v676_v18 = vpop.permute.xlu2 %675 }
  0xf7   : > { %v678_v19 = vpop.permute.xlu2 %677 }
 0x10d   : > { %v682_v14 = vpop.permute.xlu1 %681  ;;  %v583_v15 = vpop.permute.xlu0 %582 }
 0x10e   : > { %1438 = vmatpush.xpose.msk.msra.mxu1 %vm584_vm1, %v583_v15  ;;  %1444 = vmatpush.xpose.msk.msra.mxu3 %vm584_vm1, %v682_v14 }
 0x115   : > { %v680_v16 = vpop.permute.xlu1 %679  ;;  %v581_v17 = vpop.permute.xlu0 %580 }
 0x116   : > { %1439 = vmatpush.xpose.msk.msra.mxu1 %vm584_vm1, %v581_v17  ;;  %1445 = vmatpush.xpose.msk.msra.mxu3 %vm584_vm1, %v680_v16 }
 0x119   : > { %1440 = vmatmul.msk.f32.vlgmr.msra.gmra.mxu1 %vm584_vm1, %v573_v9  ;;  %1446 = vmatmul.msk.f32.vlgmr.msra.gmra.mxu3 %vm584_vm1, %v676_v18  ;;  %v781_v18 = vld [vmem:[%s1995_s5] sm:$0xff] }
 0x121   : > { %1441 = vmatmul.msk.f32.gmra.mxu1 %vm584_vm1, %v574_v12  ;;  %1447 = vmatmul.msk.f32.gmra.mxu3 %vm584_vm1, %v678_v19  ;;  %v783_v12 = vld [vmem:[%s1995_s5 + $0x10] sm:$0xff] }
 0x122   : > { %808 = vmatpush.msrb.mxu0 %v783_v12 }
 0x196   : > { %v612_v23 = vpop.f32.mrf.mxu1 }
 0x197   : > { %v613_v24 = vadd.f32 %v612_v23, %v576_v22  ;;  %v1540_v23 = vld [vmem:[%s1996_s6] ss:$0 sm:$0xff] }
 0x199   : > { %v618_v25 = vsel %vm584_vm1, %v613_v24, -inf }
 0x19a   : > { %619 = vmax.xlane.f32.xlu0 %v618_v25 }
 0x19c   : > { %v708_v26 = vpop.f32.mrf.mxu3 }
 0x19d   : > { %v709_v27 = vadd.f32 %v708_v26, %v576_v22 }
 0x19e   : > { %v615_v28 = vpop.f32.mrf.mxu1 }
 0x19f   : > { %v616_v29 = vadd.f32 %v615_v28, %v576_v22  ;;  %v714_v30 = vsel %vm584_vm1, %v709_v27, -inf }
 0x1a0   : > { %715 = vmax.xlane.f32.xlu2 %v714_v30 }
 0x1a1   : > { %v621_v31 = vsel %vm584_vm1, %v616_v29, -inf }
 0x1a2   : > { %622 = vmax.xlane.f32.xlu1 %v621_v31 }
 0x1a4   : > { %v711_v32 = vpop.f32.mrf.mxu3 }
 0x1a5   : > { %v712_v33 = vadd.f32 %v711_v32, %v576_v22  ;;  %v1587_v32 = vmov 32.0  }
 0x1a7   : > { %v717_v34 = vsel %vm584_vm1, %v712_v33, -inf }
 0x1a8   : > { %718 = vmax.xlane.f32.xlu2 %v717_v34 }
 0x1bb   : > { %1527 = vrot.lane.b32.xlu1 %v1710_v13, %s1584_s19 }
 0x20d   : > { %v620_v35 = vpop.xlane.xlu0 %619 }
 0x20e   : > { %v624_v36 = vsub.f32 %v613_v24, %v620_v35  ;;  %v1588_v35 = vmov 0  }
 0x20f   : > { %1537 = vset.pattern.permute.xlu1 %v1588_v35  ;;  %1536 = vset.pattern.permute.xlu2 %v1588_v35 }
 0x210   : > { %v626_v37 = vmul.f32 1.442695, %v624_v36  ;;  %1538 = vset.pattern.permute.xlu0 %v1588_v35  ;;  %v1490_v35 = vld [vmem:[%s1999_s9 + $0xe0] sm:$0xff] }
 0x212   : > { %1547 = vpow2.f32 %v626_v37 }
 0x213   : > { %v716_v38 = vpop.xlane.xlu2 %715 }
 0x214   : > { %v720_v39 = vsub.f32 %v709_v27, %v716_v38 }
 0x215   : > { %v623_v40 = vpop.xlane.xlu1 %622 }
 0x216   : > { %v722_v41 = vmul.f32 1.442695, %v720_v39  ;;  %v625_v42 = vsub.f32 %v616_v29, %v623_v40 }
 0x218   : > { %v1548_v43 = vpop.eup %1547  ;;  %1549 = vpow2.f32 %v722_v41  ;;  %v628_v44 = vmul.f32 1.442695, %v625_v42 }
 0x219   : > { %v630_v45 = vsel %vm584_vm1, %v1548_v43, 0.0 }
 0x21a   : > { %1551 = vpow2.f32 %v628_v44  ;;  %631 = vadd.xlane.f32.xlu0 %v630_v45  ;;  %v533_v45 = vld [vmem:[%s523_s29] sm:$0xff] }
 0x21b   : > { %v719_v46 = vpop.xlane.xlu2 %718 }
 0x21c   : > { %v721_v47 = vsub.f32 %v712_v33, %v719_v46 }
 0x21e   : > { %v1550_v48 = vpop.eup %1549  ;;  %v724_v49 = vmul.f32 1.442695, %v721_v47 }
 0x21f   : > { %v726_v52 = vsel %vm584_vm1, %v1550_v48, 0.0 }
 0x220   : > { %v1552_v50 = vpop.eup %1551  ;;  %1553 = vpow2.f32 %v724_v49  ;;  %v534_v49 = vld [vmem:[%s523_s29 + $0x8] sm:$0xff] }
 0x221   : > { %v633_v51 = vsel %vm584_vm1, %v1552_v50, 0.0 }
 0x222   : > { %634 = vadd.xlane.f32.xlu2 %v633_v51  ;;  %727 = vadd.xlane.f32.xlu0 %v726_v52  ;;  %v1455_v51 = vld [vmem:[%s1999_s9 + $0x38] sm:$0xff] }
 0x223   : > { %v903_v52 = vld [vmem:[%s1999_s9 + $0x18] sm:$0xff]  ;;  %931 = vmatpush.msrb.mxu1 %v1455_v51 }
 0x224   : > { %960 = vmatpush.msrb.mxu3 %v903_v52 }
 0x226   : > { %v1554_v53 = vpop.eup %1553 }
 0x227   : > { %v729_v54 = vsel %vm584_vm1, %v1554_v53, 0.0 }
 0x22a   : > { %730 = vadd.xlane.f32.xlu0 %v729_v54 }
 0x22d   : > { %v1528_v55 = vpop.permute.xlu1 %1527 }
 0x22e   : > { %v1529_v56 = vunpack.i.l.bf16 %v1528_v55  ;;  %v1530_v57 = vunpack.i.h.bf16 %v1528_v55  ;;  %v1469_v55 = vld [vmem:[%s1999_s9 + $0x78] sm:$0xff] }
 0x230   : > { %666 = vmatpush.msra.mxu2 %v1529_v56  ;;  %v1454_v56 = vld [vmem:[%s1999_s9 + $0x30] sm:$0xff] }
 0x231   : > { %932 = vmatpush.msrb.mxu1 %v1454_v56 }
 0x232   : > { %667 = vmatpush.msra.mxu2 %v1530_v57  ;;  %v902_v57 = vld [vmem:[%s1999_s9 + $0x10] sm:$0xff] }
 0x233   : > { %961 = vmatpush.msrb.mxu3 %v902_v57  ;;  %v1498_v57 = vld [vmem:[%s1999_s9 + $0x110] sm:$0xff] }
 0x23a   : > { %1532 = vrot.lane.b32.xlu2 %v1710_v13, %s1585_s27  ;;  %v782_v13 = vld [vmem:[%s1995_s5 + $0x8] sm:$0xff]  ;;  %s528_s27 = scalar_lea.vmem %s2005_s15, %s1693_s28 }
 0x23b   : > { %809 = vmatpush.msrb.mxu0 %v782_v13 }
 0x23d   : > { %810 = vmatpush.msrb.mxu0 %v781_v18  ;;  %v1493_v18 = vld [vmem:[%s1999_s9 + $0xf8] sm:$0xff] }
 0x23f   : > { %1034 = vmatpush.msra.mxu0 %v1469_v55 }
 0x28d   : > { %v632_v58 = vpop.xlane.xlu0 %631 }
 0x28e   : > { %1555 = vrcp.f32 %v632_v58 }
 0x294   : > { %v1556_v59 = vpop.eup %1555 }
 0x295   : > { %v635_v60 = vpop.xlane.xlu2 %634  ;;  %v638_v61 = vmul.f32 %v1556_v59, %v1548_v43  ;;  %v728_v62 = vpop.xlane.xlu0 %727  ;;  %v1462_v59 = vld [vmem:[%s1999_s9 + $0x50] sm:$0xff] }
 0x296   : > { %1557 = vrcp.f32 %v635_v60  ;;  %v1468_v60 = vld [vmem:[%s1999_s9 + $0x70] sm:$0xff] }
 0x297   : > { %1442 = vmatmul.msk.f32.vlgmr.msra.gmra.mxu2 %vm584_vm1, %v638_v61  ;;  %1559 = vrcp.f32 %v728_v62  ;;  %v1453_v61 = vld [vmem:[%s1999_s9 + $0x28] sm:$0xff]  ;;  %1035 = vmatpush.msra.mxu0 %v1468_v60 }
 0x298   : > { %v901_v62 = vld [vmem:[%s1999_s9 + $0x8] sm:$0xff]  ;;  %933 = vmatpush.msrb.mxu1 %v1453_v61 }
 0x299   : > { %962 = vmatpush.msrb.mxu3 %v901_v62 }
 0x29c   : > { %v1558_v63 = vpop.eup %1557 }
 0x29d   : > { %v1533_v0 = vpop.permute.xlu2 %1532  ;;  %v639_v1 = vmul.f32 %v1558_v63, %v1552_v50  ;;  %v731_v6 = vpop.xlane.xlu0 %730  ;;  %v1589_v50 = vmov 0.0   ;;  %v1461_v63 = vld [vmem:[%s1999_s9 + $0x48] sm:$0xff] }
 0x29e   : > { %v1534_v2 = vunpack.i.l.bf16 %v1533_v0  ;;  %v1535_v3 = vunpack.i.h.bf16 %v1533_v0  ;;  %v1560_v7 = vpop.eup %1559  ;;  %1561 = vrcp.f32 %v731_v6  ;;  %895 = vst.msk [vmem:[#allocation2] sm:$0xff] %vm543_vm0, %v1589_v50  ;;  %v1467_v0 = vld [vmem:[%s1999_s9 + $0x68] sm:$0xff]  ;;  %v1460_v6 = vld [vmem:[%s1999_s9 + $0x40] sm:$0xff] }
 0x29f   : > { %1443 = vmatmul.msk.f32.gmra.mxu2 %vm584_vm1, %v639_v1  ;;  %v734_v8 = vmul.f32 %v1560_v7, %v1550_v48  ;;  %1563 = vrcp.f32 %v1587_v32  ;;  %896 = vst.msk [vmem:[#allocation2 + $0x8] sm:$0xff] %vm543_vm0, %v1589_v50  ;;  %1036 = vmatpush.msra.mxu0 %v1467_v0  ;;  %v1466_v7 = vld [vmem:[%s1999_s9 + $0x60] sm:$0xff] }
 0x2a0   : > { %762 = vmatpush.msrb.mxu2 %v1534_v2  ;;  %897 = vst.msk [vmem:[#allocation2 + $0x10] sm:$0xff] %vm543_vm0, %v1589_v50  ;;  %v1452_v2 = vld [vmem:[%s1999_s9 + $0x20] sm:$0xff] }
 0x2a1   : > { %934 = vmatpush.msrb.mxu1 %v1452_v2  ;;  %1037 = vmatpush.msra.mxu0 %v1466_v7  ;;  %v1472_v32 = vld [vmem:[%s1999_s9 + $0x80] sm:$0xff] }
 0x2a2   : > { %763 = vmatpush.msrb.mxu2 %v1535_v3  ;;  %v900_v3 = vld [vmem:[%s1999_s9] sm:$0xff] }
 0x2a3   : > { %963 = vmatpush.msrb.mxu3 %v900_v3 }
 0x2a4   : > { %v1562_v9 = vpop.eup %1561 }
 0x2a5   : > { %v735_v10 = vmul.f32 %v1562_v9, %v1554_v53  ;;  %v1564_v33 = vpop.eup %1563  ;;  %v1463_v53 = vld [vmem:[%s1999_s9 + $0x58] sm:$0xff] }
 0x2a6   : > { %v829_v34 = vmul.f32 32.0, %v1564_v33  ;;  %vm833_vm2 = vweird.f32 %v1564_v33  ;;  %996 = vmatpush.msra.mxu2 %v1463_v53  ;;  %v1499_v53 = vld [vmem:[%s1999_s9 + $0x118] sm:$0xff] }
 0x2a7   : > { %1448 = vmatmul.msk.f32.vlgmr.msrb.gmra.mxu2 %vm584_vm1, %v734_v8 }
 0x2a8   : > { %v830_v36 = vsub.f32 1.0, %v829_v34  ;;  %997 = vmatpush.msra.mxu2 %v1462_v59  ;;  %v1484_v34 = vld [vmem:[%s1999_s9 + $0xc0] sm:$0xff] }
 0x2a9   : > { %v1496_v59 = vld [vmem:[%s1999_s9 + $0x100] sm:$0xff] }
 0x2aa   : > { %998 = vmatpush.msra.mxu2 %v1461_v63 }
 0x2ac   : > { %999 = vmatpush.msra.mxu2 %v1460_v6 }
 0x2af   : > { %1449 = vmatmul.msk.f32.gmra.mxu2 %vm584_vm1, %v735_v10 }
 0x31a   : > { %v669_v14 = vpop.f32.mrf.mxu2 }
 0x322   : > { %v672_v15 = vpop.f32.mrf.mxu2 }
 0x32a   : > { %v765_v16 = vpop.f32.mrf.mxu2 }
 0x32b   : > { %773 = vrot.lane.b32.xlu0 %v765_v16, %s1586_s22  ;;  %v1481_v16 = vld [vmem:[%s1999_s9 + $0xb8] sm:$0xff] }
 0x32c   : > { %1110 = vmatpush.msra.mxu3 %v1481_v16  ;;  %v1248_v16 = vld [vmem:[%s2001_s11 + $0x18] sm:$0xff] }
 0x332   : > { %v768_v17 = vpop.f32.mrf.mxu2 }
 0x333   : > { %775 = vrot.lane.b32.xlu1 %v768_v17, %s1586_s22  ;;  %v1487_v17 = vld [vmem:[%s1999_s9 + $0xd8] sm:$0xff] }
 0x334   : > { %1148 = vmatpush.msrb.mxu2 %v1487_v17  ;;  %v1247_v17 = vld [vmem:[%s2001_s11 + $0x10] sm:$0xff] }
 0x39d   : > { %v774_v19 = vpop.permute.xlu0 %773 }
 0x39e   : > { %v779_v20 = vsel %vm584_vm1, %v669_v14, %v774_v19  ;;  %v1474_v19 = vld [vmem:[%s1999_s9 + $0x90] sm:$0xff] }
 0x39f   : > { %1450 = vmatmul.msk.f32.vlgmr.msrb.gmra.mxu0 %vm543_vm0, %v779_v20  ;;  %v1480_v20 = vld [vmem:[%s1999_s9 + $0xb0] sm:$0xff] }
 0x3a0   : > { %1186 = vmatpush.msrb.mxu0 %v1493_v18  ;;  %1111 = vmatpush.msra.mxu3 %v1480_v20  ;;  %v1246_v18 = vld [vmem:[%s2001_s11 + $0x8] sm:$0xff]  ;;  %v1245_v20 = vld [vmem:[%s2001_s11] sm:$0xff] }
 0x3a5   : > { %v776_v21 = vpop.permute.xlu1 %775 }
 0x3a6   : > { %v780_v22 = vsel %vm584_vm1, %v672_v15, %v776_v21  ;;  %v1475_v15 = vld [vmem:[%s1999_s9 + $0x98] sm:$0xff] }
 0x3a7   : > { %1451 = vmatmul.msk.f32.gmra.mxu0 %vm543_vm0, %v780_v22  ;;  %1072 = vmatpush.msra.mxu1 %v1475_v15  ;;  %v1486_v22 = vld [vmem:[%s1999_s9 + $0xd0] sm:$0xff]  ;;  %v1249_v15 = vld [vmem:[%s2001_s11 + $0x20] sm:$0xff] }
 0x3a8   : > { %1149 = vmatpush.msrb.mxu2 %v1486_v22 }
 0x3a9   : > { %1073 = vmatpush.msra.mxu1 %v1474_v19 }
 0x41c   : > { %v812_v24 = vpop.f32.mrf.mxu0 }
 0x41d   : > { %v813_v25 = vadd.f32 %v1540_v23, %v812_v24  ;;  %v1473_v24 = vld [vmem:[%s1999_s9 + $0x88] sm:$0xff] }
 0x41e   : > { %1074 = vmatpush.msra.mxu1 %v1473_v24 }
 0x41f   : > { %v818_v26 = vadd.f32 %v813_v25, %v1699_v4  ;;  %v831_v4 = vmul.f32 %v1564_v33, %v830_v36 }
 0x420   : > { %1075 = vmatpush.msra.mxu1 %v1472_v32 }
 0x421   : > { %v822_v27 = vsel %vm543_vm0, %v818_v26, 0.0  ;;  %v832_v37 = vadd.f32 %v1564_v33, %v831_v4 }
 0x422   : > { %823 = vadd.xlane.f32.xlu1 %v822_v27  ;;  %v1485_v27 = vld [vmem:[%s1999_s9 + $0xc8] sm:$0xff] }
 0x423   : > { %v1761_v38 = vsel %vm833_vm2, %v1564_v33, %v832_v37  ;;  %v1478_v33 = vld [vmem:[%s1999_s9 + $0xa0] sm:$0xff]  ;;  %1150 = vmatpush.msrb.mxu2 %v1485_v27 }
 0x424   : > { %v815_v28 = vpop.f32.mrf.mxu0  ;;  %v1542_v37 = vld [vmem:[%s1998_s8] ss:$0 sm:$0xff] }
 0x425   : > { %v816_v29 = vadd.f32 %v1540_v23, %v815_v28  ;;  %v1492_v23 = vld [vmem:[%s1999_s9 + $0xf0] sm:$0xff]  ;;  %v1491_v28 = vld [vmem:[%s1999_s9 + $0xe8] sm:$0xff]  ;;  %1151 = vmatpush.msrb.mxu2 %v1484_v34 }
 0x426   : > { %1187 = vmatpush.msrb.mxu0 %v1492_v23 }
 0x427   : > { %v819_v30 = vadd.f32 %v816_v29, %v1703_v5 }
 0x428   : > { %1188 = vmatpush.msrb.mxu0 %v1491_v28 }
 0x429   : > { %v825_v31 = vsel %vm543_vm0, %v819_v30, 0.0 }
 0x42a   : > { %826 = vadd.xlane.f32.xlu2 %v825_v31  ;;  %v1541_v31 = vld [vmem:[%s1997_s7] ss:$0 sm:$0xff]  ;;  %1189 = vmatpush.msrb.mxu0 %v1490_v35 }
 0x442   : > { %885 = vperm.xlu2 %1536, %v533_v45  }
 0x495   : > { %v824_v39 = vpop.xlane.xlu1 %823 }
 0x496   : > { %v835_v5 = vmul.f32 %v1761_v38, %v824_v39 }
 0x498   : > { %v1764_v40 = vsub.f32 %v818_v26, %v835_v5  ;;  %v1479_v26 = vld [vmem:[%s1999_s9 + $0xa8] sm:$0xff] }
 0x499   : > { %1112 = vmatpush.msra.mxu3 %v1479_v26 }
 0x49a   : > { %v839_v41 = vmul.f32 %v1764_v40, %v1764_v40 }
 0x49b   : > { %1113 = vmatpush.msra.mxu3 %v1478_v33 }
 0x49c   : > { %v841_v42 = vsel %vm543_vm0, %v839_v41, 0.0 }
 0x49d   : > { %v827_v43 = vpop.xlane.xlu2 %826  ;;  %842 = vadd.xlane.f32.xlu0 %v841_v42 }
 0x49e   : > { %v836_v44 = vmul.f32 %v1761_v38, %v827_v43 }
 0x4a0   : > { %v1774_v46 = vsub.f32 %v819_v30, %v836_v44 }
 0x4a2   : > { %v840_v47 = vmul.f32 %v1774_v46, %v1774_v46 }
 0x4a4   : > { %v844_v48 = vsel %vm543_vm0, %v840_v47, 0.0 }
 0x4a5   : > { %845 = vadd.xlane.f32.xlu1 %v844_v48  ;;  %v1888_v43 = vpop.permute.xlu2 %885 }
 0x4be   : > { %890 = vperm.xlu1 %1537, %v534_v49  }
 0x510   : > { %v843_v54 = vpop.xlane.xlu0 %842 }
 0x511   : > { %v847_v58 = vmul.f32 %v843_v54, %v1761_v38 }
 0x513   : > { %v849_v1 = vadd.f32 1e-06, %v847_v58  ;;  %v1497_v58 = vld [vmem:[%s1999_s9 + $0x108] sm:$0xff] }
 0x515   : > { %1565 = vrsqrt.f32 %v849_v1  ;;  %vm857_vm4 = vweird.f32 %v849_v1 }
 0x518   : > { %v846_v8 = vpop.xlane.xlu1 %845 }
 0x519   : > { %v848_v9 = vmul.f32 %v846_v8, %v1761_v38 }
 0x51b   : > { %v1566_v10 = vpop.eup %1565  ;;  %v850_v11 = vadd.f32 1e-06, %v848_v9 }
 0x51c   : > { %v852_v12 = vmul.f32 %v1566_v10, %v849_v1  ;;  %vm858_vm3 = vweird.f32 %v1566_v10 }
 0x51d   : > { %1567 = vrsqrt.f32 %v850_v11  ;;  %vm859_vm5 = vmor %vm857_vm4, %vm858_vm3  ;;  %vm867_vm7 = vweird.f32 %v850_v11 }
 0x51e   : > { %v853_v13 = vmul.f32 %v1566_v10, %v852_v12  ;;  %v1251_v12 = vld [vmem:[%s2001_s11 + $0x30] sm:$0xff] }
 0x520   : > { %v854_v14 = vmul.f32 0.5, %v853_v13  ;;  %v1250_v13 = vld [vmem:[%s2001_s11 + $0x28] sm:$0xff] }
 0x522   : > { %v855_v21 = vsub.f32 1.5, %v854_v14 }
 0x523   : > { %v1568_v25 = vpop.eup %1567 }
 0x524   : > { %v856_v29 = vmul.f32 %v1566_v10, %v855_v21  ;;  %v862_v30 = vmul.f32 %v1568_v25, %v850_v11  ;;  %vm868_vm6 = vweird.f32 %v1568_v25  ;;  %v1252_v11 = vld [vmem:[%s2001_s11 + $0x38] sm:$0xff] }
 0x525   : > { %vm869_vm8 = vmor %vm867_vm7, %vm868_vm6 }
 0x526   : > { %v863_v36 = vmul.f32 %v1568_v25, %v862_v30  ;;  %v860_v4 = vsel %vm859_vm5, %v1566_v10, %v856_v29 }
 0x527   : > { %v871_v39 = vmul.f32 %v860_v4, %v1764_v40 }
 0x528   : > { %v864_v5 = vmul.f32 0.5, %v863_v36 }
 0x529   : > { %v876_v41 = vmul.f32 %v1541_v31, %v871_v39 }
 0x52a   : > { %v865_v42 = vsub.f32 1.5, %v864_v5 }
 0x52b   : > { %v881_v44 = vadd.f32 %v1542_v37, %v876_v41 }
 0x52c   : > { %v866_v45 = vmul.f32 %v1568_v25, %v865_v42 }
 0x52d   : > { %v1891_v47 = vmul.f32 %v1888_v43, %v881_v44 }
 0x52e   : > { %v870_v48 = vsel %vm869_vm8, %v1568_v25, %v866_v45 }
 0x52f   : > { %898 = vst.msk [vmem:[#allocation2 + $0x4] sm:$0xff] %vm543_vm0, %v1891_v47  ;;  %v872_v40 = vmul.f32 %v870_v48, %v1774_v46  ;;  %v1543_v48 = vld [vmem:[%s2000_s10] ss:$0 sm:$0xff] }
 0x530   : > { %v1896_v50 = vpop.permute.xlu1 %890 }
 0x531   : > { %v877_v49 = vmul.f32 %v1541_v31, %v872_v40 }
 0x533   : > { %v882_v51 = vadd.f32 %v1542_v37, %v877_v49 }
 0x535   : > { %v1899_v52 = vmul.f32 %v1896_v50, %v882_v51 }
 0x536   : > { %v911_v54 = vld [vmem:[#allocation2 + $0x1] sm:$0xff] }
 0x537   : > { %v904_v55 = vld [vmem:[#allocation2] sm:$0xff]  ;;  %899 = vst.msk [vmem:[#allocation2 + $0xc] sm:$0xff] %vm543_vm0, %v1899_v52  ;;  %1456 = vmatmul.msk.f32.vlgmr.msrb.gmra.mxu1 %vm543_vm0, %v911_v54 }
 0x538   : > { %v976_v56 = vld [vmem:[#allocation2 + $0x2] sm:$0xff]  ;;  %1458 = vmatmul.msk.f32.vlgmr.msrb.gmra.mxu3 %vm543_vm0, %v904_v55  ;;  %1224 = vmatpush.msrb.mxu1 %v1499_v53 }
 0x539   : > { %v1014_v46 = vld [vmem:[#allocation2 + $0x3] sm:$0xff]  ;;  %1464 = vmatmul.msk.f32.vlgmr.msra.gmra.mxu2 %vm543_vm0, %v976_v56  ;;  %1272 = vmatpush.msrb.mxu3 %v1252_v11 }
 0x53a   : > { %1470 = vmatmul.msk.f32.vlgmr.msra.gmra.mxu0 %vm543_vm0, %v1014_v46  ;;  %1225 = vmatpush.msrb.mxu1 %v1498_v57  ;;  %v1052_v0 = vld [vmem:[#allocation2 + $0x4] sm:$0xff] }
 0x53b   : > { %1273 = vmatpush.msrb.mxu3 %v1251_v12 }
 0x53c   : > { %1226 = vmatpush.msrb.mxu1 %v1497_v58 }
 0x53d   : > { %1274 = vmatpush.msrb.mxu3 %v1250_v13 }
 0x53e   : > { %v912_v60 = vld [vmem:[#allocation2 + $0x9] sm:$0xff]  ;;  %1227 = vmatpush.msrb.mxu1 %v1496_v59 }
 0x53f   : > { %v905_v61 = vld [vmem:[#allocation2 + $0x8] sm:$0xff]  ;;  %1457 = vmatmul.msk.f32.gmra.mxu1 %vm543_vm0, %v912_v60  ;;  %v1205_v10 = vld [vmem:[#allocation2 + $0x10] sm:$0xff]  ;;  %1275 = vmatpush.msrb.mxu3 %v1249_v15 }
 0x540   : > { %v977_v62 = vld [vmem:[#allocation2 + $0xa] sm:$0xff]  ;;  %1459 = vmatmul.msk.f32.gmra.mxu3 %vm543_vm0, %v905_v61 }
 0x541   : > { %v1015_v63 = vld [vmem:[#allocation2 + $0xb] sm:$0xff]  ;;  %1465 = vmatmul.msk.f32.gmra.mxu2 %vm543_vm0, %v977_v62  ;;  %1276 = vmatpush.msrb.mxu3 %v1248_v16 }
 0x542   : > { %1471 = vmatmul.msk.f32.gmra.mxu0 %vm543_vm0, %v1015_v63  ;;  %v1090_v1 = vld [vmem:[#allocation2 + $0x5] sm:$0xff]  ;;  %v1091_v7 = vld [vmem:[#allocation2 + $0xd] sm:$0xff] }
 0x543   : > { %v1128_v2 = vld [vmem:[#allocation2 + $0x6] sm:$0xff]  ;;  %v1129_v8 = vld [vmem:[#allocation2 + $0xe] sm:$0xff]  ;;  %1277 = vmatpush.msrb.mxu3 %v1247_v17 }
 0x544   : > { %v1166_v3 = vld [vmem:[#allocation2 + $0x7] sm:$0xff]  ;;  %v1167_v9 = vld [vmem:[#allocation2 + $0xf] sm:$0xff] }
 0x545   : > { %v1053_v6 = vld [vmem:[#allocation2 + $0xc] sm:$0xff]  ;;  %1278 = vmatpush.msrb.mxu3 %v1246_v18 }
 0x547   : > { %1476 = vmatmul.msk.f32.vlgmr.msra.gmra.mxu1 %vm543_vm0, %v1052_v0  ;;  %1279 = vmatpush.msrb.mxu3 %v1245_v20 }
 0x548   : > { %1482 = vmatmul.msk.f32.vlgmr.msra.gmra.mxu3 %vm543_vm0, %v1090_v1 }
 0x549   : > { %1488 = vmatmul.msk.f32.vlgmr.msrb.gmra.mxu2 %vm543_vm0, %v1128_v2 }
 0x54a   : > { %1494 = vmatmul.msk.f32.vlgmr.msrb.gmra.mxu0 %vm543_vm0, %v1166_v3 }
 0x54f   : > { %1477 = vmatmul.msk.f32.gmra.mxu1 %vm543_vm0, %v1053_v6 }
 0x550   : > { %1483 = vmatmul.msk.f32.gmra.mxu3 %vm543_vm0, %v1091_v7 }
 0x551   : > { %1489 = vmatmul.msk.f32.gmra.mxu2 %vm543_vm0, %v1129_v8 }
 0x552   : > { %1495 = vmatmul.msk.f32.gmra.mxu0 %vm543_vm0, %v1167_v9 }
 0x557   : > { %1500 = vmatmul.msk.f32.vlgmr.msrb.gmra.mxu1 %vm543_vm0, %v905_v61  ;;  %v1544_v61 = vld [vmem:[%s2002_s12] ss:$0 sm:$0xff] }
 0x55f   : > { %1501 = vmatmul.msk.f32.gmra.mxu1 %vm543_vm0, %v1205_v10 }
 0x5b4   : > { %v936_v14 = vpop.f32.mrf.mxu1 }
 0x5b7   : > { %v1039_v22 = vpop.f32.mrf.mxu0 }
 0x5bb   : > { %v965_v19 = vpop.f32.mrf.mxu3 }
 0x5bc   : > { %v1001_v21 = vpop.f32.mrf.mxu2  ;;  %v939_v23 = vpop.f32.mrf.mxu1  ;;  %v966_v24 = vadd.f32 %v965_v19, %v936_v14 }
 0x5be   : > { %v1007_v26 = vadd.f32 %v1001_v21, %v966_v24 }
 0x5bf   : > { %v1042_v29 = vpop.f32.mrf.mxu0 }
 0x5c0   : > { %v1045_v31 = vadd.f32 %v1039_v22, %v1007_v26 }
 0x5c3   : > { %v968_v25 = vpop.f32.mrf.mxu3 }
 0x5c4   : > { %v1004_v27 = vpop.f32.mrf.mxu2  ;;  %v1077_v28 = vpop.f32.mrf.mxu1  ;;  %v969_v30 = vadd.f32 %v968_v25, %v939_v23 }
 0x5c5   : > { %v1083_v32 = vadd.f32 %v1077_v28, %v1045_v31 }
 0x5c6   : > { %v1008_v34 = vadd.f32 %v1004_v27, %v969_v30  ;;  %v1545_v30 = vld [vmem:[%s2003_s13] ss:$0 sm:$0xff] }
 0x5c7   : > { %v1191_v5 = vpop.f32.mrf.mxu0 }
 0x5c8   : > { %v1046_v39 = vadd.f32 %v1042_v29, %v1008_v34 }
 0x5cb   : > { %v1115_v33 = vpop.f32.mrf.mxu3 }
 0x5cc   : > { %v1121_v35 = vadd.f32 %v1115_v33, %v1083_v32  ;;  %v1153_v36 = vpop.f32.mrf.mxu2  ;;  %v1080_v4 = vpop.f32.mrf.mxu1  ;;  %v1546_v32 = vld [vmem:[%s2004_s14] ss:$0 sm:$0xff] }
 0x5cd   : > { %v1084_v41 = vadd.f32 %v1080_v4, %v1046_v39 }
 0x5ce   : > { %v1159_v37 = vadd.f32 %v1153_v36, %v1121_v35 }
 0x5cf   : > { %v1194_v56 = vpop.f32.mrf.mxu0 }
 0x5d0   : > { %v1197_v45 = vadd.f32 %v1191_v5, %v1159_v37 }
 0x5d3   : > { %v1118_v42 = vpop.f32.mrf.mxu3 }
 0x5d4   : > { %v1122_v44 = vadd.f32 %v1118_v42, %v1084_v41  ;;  %v1229_v40 = vpop.f32.mrf.mxu1  ;;  %v1156_v51 = vpop.f32.mrf.mxu2 }
 0x5d5   : > { %v1235_v49 = vadd.f32 %v1229_v40, %v1197_v45 }
 0x5d6   : > { %v1160_v53 = vadd.f32 %v1156_v51, %v1122_v44 }
 0x5d7   : > { %v1241_v54 = vadd.f32 %v1543_v48, %v1235_v49 }
 0x5d8   : > { %v1198_v46 = vadd.f32 %v1194_v56, %v1160_v53 }
 0x5d9   : > { %v1243_v55 = vmax.f32 %v1241_v54, 0.0 }
 0x5db   : > { %1502 = vmatmul.msk.f32.vlgmr.msrb.gmra.mxu3 %vm1257_vm9, %v1243_v55 }
 0x5dc   : > { %v1232_v57 = vpop.f32.mrf.mxu1 }
 0x5dd   : > { %v1236_v58 = vadd.f32 %v1232_v57, %v1198_v46 }
 0x5df   : > { %v1242_v59 = vadd.f32 %v1543_v48, %v1236_v58 }
 0x5e1   : > { %v1244_v60 = vmax.f32 %v1242_v59, 0.0 }
 0x5e3   : > { %1503 = vmatmul.msk.f32.gmra.mxu3 %vm1257_vm9, %v1244_v60 }
 0x65e   : > { %v1281_v62 = vpop.f32.mrf.mxu3 }
 0x65f   : > { %v1282_v63 = vadd.f32 %v1544_v61, %v1281_v62 }
 0x661   : > { %v1287_v0 = vadd.f32 %v1282_v63, %v1891_v47 }
 0x663   : > { %v1291_v1 = vsel %vm543_vm0, %v1287_v0, 0.0 }
 0x664   : > { %1292 = vadd.xlane.f32.xlu0 %v1291_v1 }
 0x666   : > { %v1284_v2 = vpop.f32.mrf.mxu3 }
 0x667   : > { %v1285_v3 = vadd.f32 %v1544_v61, %v1284_v2 }
 0x669   : > { %v1288_v6 = vadd.f32 %v1285_v3, %v1899_v52 }
 0x66b   : > { %v1294_v7 = vsel %vm543_vm0, %v1288_v6, 0.0 }
 0x66c   : > { %1295 = vadd.xlane.f32.xlu0 %v1294_v7 }
 0x6d7   : > { %v1293_v8 = vpop.xlane.xlu0 %1292 }
 0x6d8   : > { %v1297_v9 = vmul.f32 %v1293_v8, %v1761_v38 }
 0x6da   : > { %v1299_v10 = vsub.f32 %v1287_v0, %v1297_v9 }
 0x6dc   : > { %v1301_v11 = vmul.f32 %v1299_v10, %v1299_v10 }
 0x6de   : > { %v1303_v12 = vsel %vm543_vm0, %v1301_v11, 0.0 }
 0x6df   : > { %1304 = vadd.xlane.f32.xlu0 %v1303_v12  ;;  %v1296_v13 = vpop.xlane.xlu0 %1295 }
 0x6e0   : > { %v1298_v47 = vmul.f32 %v1296_v13, %v1761_v38 }
 0x6e2   : > { %v1300_v14 = vsub.f32 %v1288_v6, %v1298_v47 }
 0x6e4   : > { %v1302_v15 = vmul.f32 %v1300_v14, %v1300_v14 }
 0x6e6   : > { %v1306_v16 = vsel %vm543_vm0, %v1302_v15, 0.0 }
 0x6e7   : > { %1307 = vadd.xlane.f32.xlu2 %v1306_v16 }
 0x752   : > { %v1305_v52 = vpop.xlane.xlu0 %1304 }
 0x753   : > { %v1309_v17 = vmul.f32 %v1305_v52, %v1761_v38 }
 0x755   : > { %v1311_v18 = vadd.f32 1e-06, %v1309_v17 }
 0x757   : > { %1569 = vrsqrt.f32 %v1311_v18  ;;  %vm1319_vm11 = vweird.f32 %v1311_v18 }
 0x75a   : > { %v1308_v19 = vpop.xlane.xlu2 %1307 }
 0x75b   : > { %v1310_v20 = vmul.f32 %v1308_v19, %v1761_v38 }
 0x75d   : > { %v1570_v21 = vpop.eup %1569  ;;  %v1312_v22 = vadd.f32 1e-06, %v1310_v20 }
 0x75e   : > { %v1314_v23 = vmul.f32 %v1570_v21, %v1311_v18  ;;  %vm1320_vm10 = vweird.f32 %v1570_v21 }
 0x75f   : > { %1571 = vrsqrt.f32 %v1312_v22  ;;  %vm1321_vm12 = vmor %vm1319_vm11, %vm1320_vm10  ;;  %vm1329_vm14 = vweird.f32 %v1312_v22 }
 0x760   : > { %v1315_v24 = vmul.f32 %v1570_v21, %v1314_v23 }
 0x762   : > { %v1316_v25 = vmul.f32 0.5, %v1315_v24 }
 0x764   : > { %v1317_v26 = vsub.f32 1.5, %v1316_v25 }
 0x765   : > { %v1572_v27 = vpop.eup %1571 }
 0x766   : > { %v1318_v28 = vmul.f32 %v1570_v21, %v1317_v26  ;;  %v1324_v29 = vmul.f32 %v1572_v27, %v1312_v22  ;;  %vm1330_vm13 = vweird.f32 %v1572_v27 }
 0x767   : > { %vm1331_vm15 = vmor %vm1329_vm14, %vm1330_vm13 }
 0x768   : > { %v1322_v31 = vsel %vm1321_vm12, %v1570_v21, %v1318_v28  ;;  %v1325_v38 = vmul.f32 %v1572_v27, %v1324_v29 }
 0x769   : > { %v1333_v33 = vmul.f32 %v1322_v31, %v1299_v10 }
 0x76a   : > { %v1326_v34 = vmul.f32 0.5, %v1325_v38 }
 0x76b   : > { %v1338_v35 = vmul.f32 %v1545_v30, %v1333_v33 }
 0x76c   : > { %v1327_v36 = vsub.f32 1.5, %v1326_v34 }
 0x76d   : > { %v1343_v4 = vadd.f32 %v1546_v32, %v1338_v35 }
 0x76e   : > { %v1328_v37 = vmul.f32 %v1572_v27, %v1327_v36 }
 0x76f   : > { %v1345_v39 = vmul.f32 %v1343_v4, %v1888_v43 }
 0x770   : > { %v1332_v5 = vsel %vm1331_vm15, %v1572_v27, %v1328_v37 }
 0x771   : > { %1347 = vst.msk [vmem:[%s528_s27] sm:$0xff] %vm543_vm0, %v1345_v39  ;;  %v1334_v41 = vmul.f32 %v1332_v5, %v1300_v14 }
 0x773   : > { %v1339_v42 = vmul.f32 %v1545_v30, %v1334_v41 }
 0x775   : > { %v1344_v44 = vadd.f32 %v1546_v32, %v1339_v42 }
 0x777   : > { %v1346_v45 = vmul.f32 %v1344_v44, %v1896_v50 }
 0x779   : > { %1348 = vst.msk [vmem:[%s528_s27 + $0x8] sm:$0xff] %vm543_vm0, %v1346_v45 }
 0x77a PF: > { %s25_s18 = sadd.s32 1, %s1579_s18  }
 0x77b   : > { %p22_p4 = scmp.ge.s32.totalorder %s25_s18, 4  }
 0x77d   :  { %24 = sbr.rel (!%p22_p4) target bundleno = 1 (0x1), region = 124 }

// kernel: fastspeech2_forward.8
= control target key start
LH: loop header
LB: loop body
LE: loop exit
PB: predicated region body
PF: predicated region fallthrough
CT: control target
= control target key end

     0   :  { %s2528_s0 = inlined_call_operand.vmem [shape: f32[2,16,32], index: 0, kind: input, shape index: {}]   ;;  %s2529_s1 = inlined_call_operand.vmem [shape: f32[2,1,16], index: 1, kind: input, shape index: {}]   ;;  %s2530_s2 = inlined_call_operand.vmem [shape: f32[2,16,1], index: 2, kind: input, shape index: {}]   ;;  %s2531_s3 = inlined_call_operand.vmem [shape: f32[32,96], index: 3, kind: input, shape index: {}]   ;;  %s2532_s4 = inlined_call_operand.vmem [shape: f32[1,96], index: 4, kind: input, shape index: {}]   ;;  %s2533_s5 = inlined_call_operand.vmem [shape: f32[32,32], index: 5, kind: input, shape index: {}]   ;;  %s2534_s6 = inlined_call_operand.hbm [shape: f32[1,32], index: 6, kind: input, shape index: {}]   ;;  %s2535_s7 = inlined_call_operand.hbm [shape: f32[1,32], index: 7, kind: input, shape index: {}]   ;;  %s2536_s8 = inlined_call_operand.hbm [shape: f32[1,32], index: 8, kind: input, shape index: {}]   ;;  %s2537_s9 = inlined_call_operand.vmem [shape: f32[9,32,64], index: 9, kind: input, shape index: {}]   ;;  %s2538_s10 = inlined_call_operand.hbm [shape: f32[1,64], index: 10, kind: input, shape index: {}]   ;;  %s2539_s11 = inlined_call_operand.vmem [shape: f32[64,32], index: 11, kind: input, shape index: {}]   ;;  %s2540_s12 = inlined_call_operand.hbm [shape: f32[1,32], index: 12, kind: input, shape index: {}]   ;;  %s2541_s13 = inlined_call_operand.hbm [shape: f32[1,32], index: 13, kind: input, shape index: {}]   ;;  %s2542_s14 = inlined_call_operand.hbm [shape: f32[1,32], index: 14, kind: input, shape index: {}]   ;;  %s2543_s15 = inlined_call_operand.vmem [shape: f32[2,16,32], index: 15, kind: output, shape index: {}]  }
   0x1   :  { %2544 = sst [smem:[#allocation18_spill]] %s2535_s7 }
   0x2   :  { %2545 = sst [smem:[#allocation19_spill]] %s2538_s10 }
   0x3   :  { %2546 = sst [smem:[#allocation20_spill]] %s2541_s13 }
   0x4   :  { %20 = vsyncpa [#allocation4], 0 }
   0x5   :  { %21 = vsyncpa [#allocation6], 0 }
   0x6   :  { %22 = vsyncpa [#allocation9], 0 }
   0x7   :  { %23 = vsyncpa [#allocation12], 0  ;;  %s2159_s18 = smov 0  }
   0x8 LB: > { %s2547_s7 = sld [smem:[#allocation18_spill]]  ;;  %s2168_s22 = sadd.s32 4294967295, %s2061_s18   ;;  %s2061_s18 = sphi %s2159_s18, %s29_s18  }
   0x9   : > { %p1598_p0 = scmp.ge.s32.totalorder %s2061_s18, 1  ;;  %p390_p1 = scmp.lt.s32.totalorder %s2061_s18, 3 }
   0xa   : > { %p1744_p2 = scmp.eq.s32.totalorder %s2168_s22, 0  ;;  %s2063_s24 = smov [#allocation5]  }
   0xb   : > { %p2173_p3 = pnand %p1598_p0, %p390_p1  ;;  %s425_s25 = sshll.u32 %s2063_s24, 4  ;;  %s426_s25 = int_to_ptr.vmem [resolvable:$true] %s425_s25 }
   0xc   : > { %s2549_s10 = sld [smem:[#allocation19_spill]]  ;;  %s2064_s19 = smov [#allocation8]  }
   0xd   : > { %p1722_p4 = pneg %p2173_p3  ;;  %s2550_s13 = sld [smem:[#allocation20_spill]] }
   0xe   : > { %s423_s21 = sshll.u32 %s2547_s7, 4  ;;  %s452_s20 = sshll.u32 %s2064_s19, 4  ;;  %s424_s21 = int_to_ptr.hbm [resolvable:$true] %s423_s21  ;;  %s453_s20 = int_to_ptr.vmem [resolvable:$true] %s452_s20 }
   0xf   : > { %p2187_p5 = pnand %p1744_p2, %p1722_p4  ;;  %s2065_s24 = smov [#allocation11]  }
  0x10   : > { %s479_s26 = sshll.u32 %s2065_s24, 4  ;;  %s411_s30 = sshll.u32 %s2534_s6, 4  ;;  %s480_s26 = int_to_ptr.vmem [resolvable:$true] %s479_s26  ;;  %s412_s30 = int_to_ptr.hbm [resolvable:$true] %s411_s30 }
  0x11   : > { %1728 = dma.hbm_to_vmem [thread:$0]  (!%p2187_p5), %s424_s21, 16, %s426_s25, [#allocation6]  }
  0x12   : > { %s450_s28 = sshll.u32 %s2549_s10, 4  ;;  %s435_s10 = sshll.u32 %s2536_s8, 4  ;;  %s451_s28 = int_to_ptr.hbm [resolvable:$true] %s450_s28  ;;  %s436_s10 = int_to_ptr.hbm [resolvable:$true] %s435_s10 }
  0x13   : > { %s477_s16 = sshll.u32 %s2550_s13, 4  ;;  %s2066_s13 = smov [#allocation3]   ;;  %s478_s16 = int_to_ptr.hbm [resolvable:$true] %s477_s16 }
  0x14   : > { %1734 = dma.hbm_to_vmem [thread:$0]  (!%p2187_p5), %s451_s28, 16, %s453_s20, [#allocation9]  }
  0x15   : > { %1740 = dma.hbm_to_vmem [thread:$0]  (!%p2187_p5), %s478_s16, 16, %s480_s26, [#allocation12]  }
  0x16   : > { %s413_s21 = sshll.u32 %s2066_s13, 4  ;;  %s2067_s25 = smov [#allocation7]   ;;  %s414_s21 = int_to_ptr.vmem [resolvable:$true] %s413_s21 }
  0x17   : > { %1725 = dma.hbm_to_vmem [thread:$0]  (!%p2187_p5), %s412_s30, 16, %s414_s21, [#allocation4]  }
  0x18   : > { %s437_s28 = sshll.u32 %s2067_s25, 4  ;;  %s465_s27 = sshll.u32 %s2540_s12, 4  ;;  %s438_s28 = int_to_ptr.vmem [resolvable:$true] %s437_s28  ;;  %s466_s27 = int_to_ptr.hbm [resolvable:$true] %s465_s27 }
  0x19   : > { %1731 = dma.hbm_to_vmem [thread:$0]  (!%p2187_p5), %s436_s10, 16, %s438_s28, [#allocation6]  }
  0x1a   : > { %s489_s26 = sshll.u32 %s2542_s14, 4  ;;  %s2068_s13 = smov [#allocation10]   ;;  %s490_s26 = int_to_ptr.hbm [resolvable:$true] %s489_s26 }
  0x1b   : > { %s467_s29 = sshll.u32 %s2068_s13, 4  ;;  %s2069_s30 = smov [#allocation13]   ;;  %s468_s29 = int_to_ptr.vmem [resolvable:$true] %s467_s29 }
  0x1c   : > { %1737 = dma.hbm_to_vmem [thread:$0]  (!%p2187_p5), %s466_s27, 16, %s468_s29, [#allocation9]  }
  0x1d   : > { %s491_s19 = sshll.u32 %s2069_s30, 4  ;;  %526 = sbr.rel (%p2173_p3) target bundleno = 1944 (0x798), region = 80  ;;  %s492_s19 = int_to_ptr.vmem [resolvable:$true] %s491_s19 }
  0x1e   : > { %1743 = dma.hbm_to_vmem [thread:$0]  (!%p2187_p5), %s490_s26, 16, %s492_s19, [#allocation12]  }
  0x22   : > { %2044 = dma.done.wait (%p1744_p2), [#allocation4], 16  }
  0x23   : > { %2046 = vsyncadd (%p1744_p2), [#allocation4], 4294967280 }
  0x24   : > { %2048 = dma.done.wait (%p1744_p2), [#allocation6], 32  }
  0x25   : > { %2050 = vsyncadd (%p1744_p2), [#allocation6], 4294967264 }
  0x26   : > { %2052 = dma.done.wait (%p1744_p2), [#allocation9], 32  }
  0x27   : > { %2054 = vsyncadd (%p1744_p2), [#allocation9], 4294967264 }
  0x28   : > { %2056 = dma.done.wait (%p1744_p2), [#allocation12], 32  }
  0x29   : > { %2058 = vsyncadd (%p1744_p2), [#allocation12], 4294967264  ;;  %p613_p6 = scmp.lt.s32.totalorder %s2168_s22, 1  ;;  %v640_v0 = vld [vmem:[%s2531_s3 + $0x18] sm:$0xff]  ;;  %v639_v1 = vld [vmem:[%s2531_s3 + $0x10] sm:$0xff]  ;;  %vm645_vm0 = vcmask 261120  }
  0x2a   : > { %664 = vmatpush.msra.mxu0 %v640_v0  ;;  %v638_v2 = vld [vmem:[%s2531_s3 + $0x8] sm:$0xff]  ;;  %v637_v3 = vld [vmem:[%s2531_s3] sm:$0xff]  ;;  %s2070_s30 = smov 112   ;;  %s2071_s19 = smov 80   ;;  %vm686_vm1 = vcmask 130048   ;;  %vm1359_vm9 = vcmask 523264  }
  0x2b   : > { %s2553_s22 = smov (!%p613_p6, %s2168_s22), 1  ;;  %v1795_v6 = vld [vmem:[%s2532_s4] ss:$0 sm:$0xff]  ;;  %s2072_s23 = smov 96  }
  0x2c   : > { %s2240_s10 = sshll.u32 %s2553_s22, 4  ;;  %665 = vmatpush.msra.mxu0 %v639_v1  ;;  %s620_s25 = scalar_lea.vmem %s2529_s1, %s2553_s22 }
  0x2d   : > { %s617_s26 = scalar_lea.vmem %s2528_s0, %s2240_s10  ;;  %v633_v20 = vld [vmem:[%s620_s25] sm:$0x1]  ;;  %s2073_s22 = smov 64  }
  0x2e   : > { %666 = vmatpush.msra.mxu0 %v638_v2  ;;  %v2258_v4 = vld [vmem:[%s617_s26] sm:$0xff]  ;;  %v2262_v5 = vld [vmem:[%s617_s26 + $0x8] sm:$0xff]  ;;  %v634_v21 = vmul.f32 -1e+09, %v633_v20  ;;  %s2074_s28 = smov 48   ;;  %s2075_s13 = smov 16  }
  0x2f   : > { %s625_s17 = scalar_lea.vmem %s2530_s2, %s2240_s10 }
  0x30   : > { %667 = vmatpush.msra.mxu0 %v637_v3  ;;  %v678_v22 = vperm.slane %v634_v21, 0 }
  0x31   : > { %1621 = vmatmul.msk.f32.vlgmr.msra.gmra.mxu0 %vm645_vm0, %v2258_v4 }
  0x39   : > { %1622 = vmatmul.msk.f32.gmra.mxu0 %vm645_vm0, %v2262_v5 }
  0xae   : > { %v669_v7 = vpop.f32.mrf.mxu0 }
  0xaf   : > { %v670_v8 = vadd.f32 %v1795_v6, %v669_v7 }
  0xb1   : > { %v675_v9 = vmul.f32 0.25, %v670_v8 }
  0xb3   : > { %777 = vrot.lane.b32.xlu2 %v675_v9, %s2070_s30 }
  0xb6   : > { %v672_v10 = vpop.f32.mrf.mxu0 }
  0xb7   : > { %v673_v11 = vadd.f32 %v1795_v6, %v672_v10 }
  0xb9   : > { %783 = vrot.lane.b32.xlu1 %v673_v11, %s2071_s19  ;;  %684 = vrot.lane.b32.xlu0 %v673_v11, %s2072_s23  ;;  %v676_v12 = vmul.f32 0.25, %v673_v11  ;;  %v2269_v13 = vpack.i.bf16 %v670_v8, %v673_v11  ;;  %v886_v11 = vld [vmem:[%s2533_s5 + $0x18] sm:$0xff] }
  0xba   : > { %909 = vmatpush.msrb.mxu0 %v886_v11 }
  0xbb   : > { %779 = vrot.lane.b32.xlu2 %v676_v12, %s2070_s30 }
  0xc1   : > { %781 = vrot.lane.b32.xlu1 %v670_v8, %s2071_s19  ;;  %682 = vrot.lane.b32.xlu0 %v670_v8, %s2072_s23 }
 0x10d   : > { %v778_v18 = vpop.permute.xlu2 %777 }
 0x115   : > { %v780_v19 = vpop.permute.xlu2 %779 }
 0x12b   : > { %v784_v14 = vpop.permute.xlu1 %783  ;;  %v685_v15 = vpop.permute.xlu0 %684 }
 0x12c   : > { %1623 = vmatpush.xpose.msk.msra.mxu1 %vm686_vm1, %v685_v15  ;;  %1629 = vmatpush.xpose.msk.msra.mxu3 %vm686_vm1, %v784_v14 }
 0x133   : > { %v782_v16 = vpop.permute.xlu1 %781  ;;  %v683_v17 = vpop.permute.xlu0 %682 }
 0x134   : > { %1624 = vmatpush.xpose.msk.msra.mxu1 %vm686_vm1, %v683_v17  ;;  %1630 = vmatpush.xpose.msk.msra.mxu3 %vm686_vm1, %v782_v16 }
 0x137   : > { %1625 = vmatmul.msk.f32.vlgmr.msra.gmra.mxu1 %vm686_vm1, %v675_v9  ;;  %1631 = vmatmul.msk.f32.vlgmr.msra.gmra.mxu3 %vm686_vm1, %v778_v18  ;;  %v883_v18 = vld [vmem:[%s2533_s5] sm:$0xff] }
 0x13f   : > { %1626 = vmatmul.msk.f32.gmra.mxu1 %vm686_vm1, %v676_v12  ;;  %1632 = vmatmul.msk.f32.gmra.mxu3 %vm686_vm1, %v780_v19  ;;  %v885_v12 = vld [vmem:[%s2533_s5 + $0x10] sm:$0xff] }
 0x140   : > { %910 = vmatpush.msrb.mxu0 %v885_v12 }
 0x1b4   : > { %v714_v23 = vpop.f32.mrf.mxu1 }
 0x1b5   : > { %v715_v24 = vadd.f32 %v714_v23, %v678_v22  ;;  %v1796_v23 = vld [vmem:[#allocation3] ss:$0 sm:$0xff] }
 0x1b7   : > { %v720_v25 = vsel %vm686_vm1, %v715_v24, -inf }
 0x1b8   : > { %721 = vmax.xlane.f32.xlu0 %v720_v25 }
 0x1ba   : > { %v810_v26 = vpop.f32.mrf.mxu3 }
 0x1bb   : > { %v811_v27 = vadd.f32 %v810_v26, %v678_v22 }
 0x1bc   : > { %v717_v28 = vpop.f32.mrf.mxu1 }
 0x1bd   : > { %v718_v29 = vadd.f32 %v717_v28, %v678_v22  ;;  %v816_v30 = vsel %vm686_vm1, %v811_v27, -inf }
 0x1be   : > { %817 = vmax.xlane.f32.xlu2 %v816_v30 }
 0x1bf   : > { %v723_v31 = vsel %vm686_vm1, %v718_v29, -inf }
 0x1c0   : > { %724 = vmax.xlane.f32.xlu1 %v723_v31 }
 0x1c2   : > { %v813_v32 = vpop.f32.mrf.mxu3 }
 0x1c3   : > { %v814_v33 = vadd.f32 %v813_v32, %v678_v22  ;;  %v2076_v32 = vmov 32.0  }
 0x1c5   : > { %v819_v34 = vsel %vm686_vm1, %v814_v33, -inf }
 0x1c6   : > { %820 = vmax.xlane.f32.xlu2 %v819_v34 }
 0x1d9   : > { %1783 = vrot.lane.b32.xlu1 %v2269_v13, %s2073_s22 }
 0x22b   : > { %v722_v35 = vpop.xlane.xlu0 %721 }
 0x22c   : > { %v726_v36 = vsub.f32 %v715_v24, %v722_v35  ;;  %v2077_v35 = vmov 0  }
 0x22d   : > { %1793 = vset.pattern.permute.xlu1 %v2077_v35  ;;  %1792 = vset.pattern.permute.xlu2 %v2077_v35 }
 0x22e   : > { %v728_v37 = vmul.f32 1.442695, %v726_v36  ;;  %1794 = vset.pattern.permute.xlu0 %v2077_v35  ;;  %v1675_v35 = vld [vmem:[%s2537_s9 + $0xe0] sm:$0xff] }
 0x230   : > { %1803 = vpow2.f32 %v728_v37 }
 0x231   : > { %v818_v38 = vpop.xlane.xlu2 %817 }
 0x232   : > { %v822_v39 = vsub.f32 %v811_v27, %v818_v38 }
 0x233   : > { %v725_v40 = vpop.xlane.xlu1 %724 }
 0x234   : > { %v824_v41 = vmul.f32 1.442695, %v822_v39  ;;  %v727_v42 = vsub.f32 %v718_v29, %v725_v40 }
 0x236   : > { %v1804_v43 = vpop.eup %1803  ;;  %1805 = vpow2.f32 %v824_v41  ;;  %v730_v44 = vmul.f32 1.442695, %v727_v42 }
 0x237   : > { %v732_v45 = vsel %vm686_vm1, %v1804_v43, 0.0 }
 0x238   : > { %1807 = vpow2.f32 %v730_v44  ;;  %733 = vadd.xlane.f32.xlu0 %v732_v45  ;;  %v635_v45 = vld [vmem:[%s625_s17] sm:$0xff] }
 0x239   : > { %v821_v46 = vpop.xlane.xlu2 %820 }
 0x23a   : > { %v823_v47 = vsub.f32 %v814_v33, %v821_v46 }
 0x23c   : > { %v1806_v48 = vpop.eup %1805  ;;  %v826_v49 = vmul.f32 1.442695, %v823_v47 }
 0x23d   : > { %v828_v52 = vsel %vm686_vm1, %v1806_v48, 0.0 }
 0x23e   : > { %v1808_v50 = vpop.eup %1807  ;;  %1809 = vpow2.f32 %v826_v49  ;;  %v636_v49 = vld [vmem:[%s625_s17 + $0x8] sm:$0xff] }
 0x23f   : > { %v735_v51 = vsel %vm686_vm1, %v1808_v50, 0.0 }
 0x240   : > { %736 = vadd.xlane.f32.xlu2 %v735_v51  ;;  %829 = vadd.xlane.f32.xlu0 %v828_v52  ;;  %v1640_v51 = vld [vmem:[%s2537_s9 + $0x38] sm:$0xff] }
 0x241   : > { %v1005_v52 = vld [vmem:[%s2537_s9 + $0x18] sm:$0xff]  ;;  %1033 = vmatpush.msrb.mxu1 %v1640_v51 }
 0x242   : > { %1062 = vmatpush.msrb.mxu3 %v1005_v52 }
 0x244   : > { %v1810_v53 = vpop.eup %1809 }
 0x245   : > { %v831_v54 = vsel %vm686_vm1, %v1810_v53, 0.0 }
 0x248   : > { %832 = vadd.xlane.f32.xlu0 %v831_v54 }
 0x24b   : > { %v1784_v55 = vpop.permute.xlu1 %1783 }
 0x24c   : > { %v1785_v56 = vunpack.i.l.bf16 %v1784_v55  ;;  %v1786_v57 = vunpack.i.h.bf16 %v1784_v55  ;;  %v1654_v55 = vld [vmem:[%s2537_s9 + $0x78] sm:$0xff] }
 0x24e   : > { %768 = vmatpush.msra.mxu2 %v1785_v56  ;;  %v1639_v56 = vld [vmem:[%s2537_s9 + $0x30] sm:$0xff] }
 0x24f   : > { %1034 = vmatpush.msrb.mxu1 %v1639_v56 }
 0x250   : > { %769 = vmatpush.msra.mxu2 %v1786_v57  ;;  %v1004_v57 = vld [vmem:[%s2537_s9 + $0x10] sm:$0xff] }
 0x251   : > { %1063 = vmatpush.msrb.mxu3 %v1004_v57  ;;  %v1683_v57 = vld [vmem:[%s2537_s9 + $0x110] sm:$0xff] }
 0x258   : > { %1788 = vrot.lane.b32.xlu2 %v2269_v13, %s2074_s28  ;;  %v884_v13 = vld [vmem:[%s2533_s5 + $0x8] sm:$0xff] }
 0x259   : > { %911 = vmatpush.msrb.mxu0 %v884_v13 }
 0x25b   : > { %912 = vmatpush.msrb.mxu0 %v883_v18  ;;  %v1678_v18 = vld [vmem:[%s2537_s9 + $0xf8] sm:$0xff] }
 0x25d   : > { %1136 = vmatpush.msra.mxu0 %v1654_v55 }
 0x2ab   : > { %v734_v58 = vpop.xlane.xlu0 %733 }
 0x2ac   : > { %1811 = vrcp.f32 %v734_v58 }
 0x2b2   : > { %v1812_v59 = vpop.eup %1811 }
 0x2b3   : > { %v737_v60 = vpop.xlane.xlu2 %736  ;;  %v740_v61 = vmul.f32 %v1812_v59, %v1804_v43  ;;  %v830_v62 = vpop.xlane.xlu0 %829  ;;  %v1647_v59 = vld [vmem:[%s2537_s9 + $0x50] sm:$0xff] }
 0x2b4   : > { %1813 = vrcp.f32 %v737_v60  ;;  %v1653_v60 = vld [vmem:[%s2537_s9 + $0x70] sm:$0xff] }
 0x2b5   : > { %1627 = vmatmul.msk.f32.vlgmr.msra.gmra.mxu2 %vm686_vm1, %v740_v61  ;;  %1815 = vrcp.f32 %v830_v62  ;;  %v1638_v61 = vld [vmem:[%s2537_s9 + $0x28] sm:$0xff]  ;;  %1137 = vmatpush.msra.mxu0 %v1653_v60 }
 0x2b6   : > { %v1003_v62 = vld [vmem:[%s2537_s9 + $0x8] sm:$0xff]  ;;  %1035 = vmatpush.msrb.mxu1 %v1638_v61 }
 0x2b7   : > { %1064 = vmatpush.msrb.mxu3 %v1003_v62 }
 0x2ba   : > { %v1814_v63 = vpop.eup %1813 }
 0x2bb   : > { %v1789_v0 = vpop.permute.xlu2 %1788  ;;  %v741_v1 = vmul.f32 %v1814_v63, %v1808_v50  ;;  %v833_v6 = vpop.xlane.xlu0 %832  ;;  %v2078_v50 = vmov 0.0   ;;  %v1646_v63 = vld [vmem:[%s2537_s9 + $0x48] sm:$0xff] }
 0x2bc   : > { %v1790_v2 = vunpack.i.l.bf16 %v1789_v0  ;;  %v1791_v3 = vunpack.i.h.bf16 %v1789_v0  ;;  %v1816_v7 = vpop.eup %1815  ;;  %1817 = vrcp.f32 %v833_v6  ;;  %997 = vst.msk [vmem:[#allocation2] sm:$0xff] %vm645_vm0, %v2078_v50  ;;  %v1652_v0 = vld [vmem:[%s2537_s9 + $0x68] sm:$0xff]  ;;  %v1645_v6 = vld [vmem:[%s2537_s9 + $0x40] sm:$0xff] }
 0x2bd   : > { %1628 = vmatmul.msk.f32.gmra.mxu2 %vm686_vm1, %v741_v1  ;;  %v836_v8 = vmul.f32 %v1816_v7, %v1806_v48  ;;  %1819 = vrcp.f32 %v2076_v32  ;;  %998 = vst.msk [vmem:[#allocation2 + $0x8] sm:$0xff] %vm645_vm0, %v2078_v50  ;;  %1138 = vmatpush.msra.mxu0 %v1652_v0  ;;  %v1651_v7 = vld [vmem:[%s2537_s9 + $0x60] sm:$0xff] }
 0x2be   : > { %864 = vmatpush.msrb.mxu2 %v1790_v2  ;;  %999 = vst.msk [vmem:[#allocation2 + $0x10] sm:$0xff] %vm645_vm0, %v2078_v50  ;;  %v1637_v2 = vld [vmem:[%s2537_s9 + $0x20] sm:$0xff] }
 0x2bf   : > { %1036 = vmatpush.msrb.mxu1 %v1637_v2  ;;  %1139 = vmatpush.msra.mxu0 %v1651_v7  ;;  %v1657_v32 = vld [vmem:[%s2537_s9 + $0x80] sm:$0xff] }
 0x2c0   : > { %865 = vmatpush.msrb.mxu2 %v1791_v3  ;;  %v1002_v3 = vld [vmem:[%s2537_s9] sm:$0xff] }
 0x2c1   : > { %1065 = vmatpush.msrb.mxu3 %v1002_v3 }
 0x2c2   : > { %v1818_v9 = vpop.eup %1817 }
 0x2c3   : > { %v837_v10 = vmul.f32 %v1818_v9, %v1810_v53  ;;  %v1820_v33 = vpop.eup %1819  ;;  %v1648_v53 = vld [vmem:[%s2537_s9 + $0x58] sm:$0xff] }
 0x2c4   : > { %v931_v34 = vmul.f32 32.0, %v1820_v33  ;;  %vm935_vm2 = vweird.f32 %v1820_v33  ;;  %1098 = vmatpush.msra.mxu2 %v1648_v53  ;;  %v1684_v53 = vld [vmem:[%s2537_s9 + $0x118] sm:$0xff] }
 0x2c5   : > { %1633 = vmatmul.msk.f32.vlgmr.msrb.gmra.mxu2 %vm686_vm1, %v836_v8 }
 0x2c6   : > { %v932_v36 = vsub.f32 1.0, %v931_v34  ;;  %1099 = vmatpush.msra.mxu2 %v1647_v59  ;;  %v1669_v34 = vld [vmem:[%s2537_s9 + $0xc0] sm:$0xff] }
 0x2c7   : > { %v1681_v59 = vld [vmem:[%s2537_s9 + $0x100] sm:$0xff] }
 0x2c8   : > { %1100 = vmatpush.msra.mxu2 %v1646_v63 }
 0x2ca   : > { %1101 = vmatpush.msra.mxu2 %v1645_v6 }
 0x2cd   : > { %1634 = vmatmul.msk.f32.gmra.mxu2 %vm686_vm1, %v837_v10 }
 0x338   : > { %v771_v14 = vpop.f32.mrf.mxu2 }
 0x340   : > { %v774_v15 = vpop.f32.mrf.mxu2 }
 0x348   : > { %v867_v16 = vpop.f32.mrf.mxu2 }
 0x349   : > { %875 = vrot.lane.b32.xlu0 %v867_v16, %s2075_s13  ;;  %v1666_v16 = vld [vmem:[%s2537_s9 + $0xb8] sm:$0xff] }
 0x34a   : > { %1212 = vmatpush.msra.mxu3 %v1666_v16  ;;  %v1350_v16 = vld [vmem:[%s2539_s11 + $0x18] sm:$0xff] }
 0x350   : > { %v870_v17 = vpop.f32.mrf.mxu2 }
 0x351   : > { %877 = vrot.lane.b32.xlu1 %v870_v17, %s2075_s13  ;;  %v1672_v17 = vld [vmem:[%s2537_s9 + $0xd8] sm:$0xff]  ;;  %s630_s13 = scalar_lea.vmem %s2543_s15, %s2240_s10 }
 0x352   : > { %1250 = vmatpush.msrb.mxu2 %v1672_v17  ;;  %v1349_v17 = vld [vmem:[%s2539_s11 + $0x10] sm:$0xff] }
 0x3bb   : > { %v876_v19 = vpop.permute.xlu0 %875 }
 0x3bc   : > { %v881_v20 = vsel %vm686_vm1, %v771_v14, %v876_v19  ;;  %v1659_v19 = vld [vmem:[%s2537_s9 + $0x90] sm:$0xff] }
 0x3bd   : > { %1635 = vmatmul.msk.f32.vlgmr.msrb.gmra.mxu0 %vm645_vm0, %v881_v20  ;;  %v1665_v20 = vld [vmem:[%s2537_s9 + $0xb0] sm:$0xff] }
 0x3be   : > { %1288 = vmatpush.msrb.mxu0 %v1678_v18  ;;  %1213 = vmatpush.msra.mxu3 %v1665_v20  ;;  %v1348_v18 = vld [vmem:[%s2539_s11 + $0x8] sm:$0xff]  ;;  %v1347_v20 = vld [vmem:[%s2539_s11] sm:$0xff] }
 0x3c3   : > { %v878_v21 = vpop.permute.xlu1 %877 }
 0x3c4   : > { %v882_v22 = vsel %vm686_vm1, %v774_v15, %v878_v21  ;;  %v1660_v15 = vld [vmem:[%s2537_s9 + $0x98] sm:$0xff] }
 0x3c5   : > { %1636 = vmatmul.msk.f32.gmra.mxu0 %vm645_vm0, %v882_v22  ;;  %1174 = vmatpush.msra.mxu1 %v1660_v15  ;;  %v1671_v22 = vld [vmem:[%s2537_s9 + $0xd0] sm:$0xff]  ;;  %v1351_v15 = vld [vmem:[%s2539_s11 + $0x20] sm:$0xff] }
 0x3c6   : > { %1251 = vmatpush.msrb.mxu2 %v1671_v22 }
 0x3c7   : > { %1175 = vmatpush.msra.mxu1 %v1659_v19 }
 0x43a   : > { %v914_v24 = vpop.f32.mrf.mxu0 }
 0x43b   : > { %v915_v25 = vadd.f32 %v1796_v23, %v914_v24  ;;  %v1658_v24 = vld [vmem:[%s2537_s9 + $0x88] sm:$0xff] }
 0x43c   : > { %1176 = vmatpush.msra.mxu1 %v1658_v24 }
 0x43d   : > { %v920_v26 = vadd.f32 %v915_v25, %v2258_v4  ;;  %v933_v4 = vmul.f32 %v1820_v33, %v932_v36 }
 0x43e   : > { %1177 = vmatpush.msra.mxu1 %v1657_v32 }
 0x43f   : > { %v924_v27 = vsel %vm645_vm0, %v920_v26, 0.0  ;;  %v934_v37 = vadd.f32 %v1820_v33, %v933_v4 }
 0x440   : > { %925 = vadd.xlane.f32.xlu1 %v924_v27  ;;  %v1670_v27 = vld [vmem:[%s2537_s9 + $0xc8] sm:$0xff] }
 0x441   : > { %v2317_v38 = vsel %vm935_vm2, %v1820_v33, %v934_v37  ;;  %v1663_v33 = vld [vmem:[%s2537_s9 + $0xa0] sm:$0xff]  ;;  %1252 = vmatpush.msrb.mxu2 %v1670_v27  ;;  %v1798_v37 = vld [vmem:[#allocation7] ss:$0 sm:$0xff] }
 0x442   : > { %v917_v28 = vpop.f32.mrf.mxu0 }
 0x443   : > { %v918_v29 = vadd.f32 %v1796_v23, %v917_v28  ;;  %v1677_v23 = vld [vmem:[%s2537_s9 + $0xf0] sm:$0xff]  ;;  %v1676_v28 = vld [vmem:[%s2537_s9 + $0xe8] sm:$0xff]  ;;  %1253 = vmatpush.msrb.mxu2 %v1669_v34 }
 0x444   : > { %1289 = vmatpush.msrb.mxu0 %v1677_v23 }
 0x445   : > { %v921_v30 = vadd.f32 %v918_v29, %v2262_v5 }
 0x446   : > { %1290 = vmatpush.msrb.mxu0 %v1676_v28 }
 0x447   : > { %v927_v31 = vsel %vm645_vm0, %v921_v30, 0.0 }
 0x448   : > { %928 = vadd.xlane.f32.xlu2 %v927_v31  ;;  %v1797_v31 = vld [vmem:[#allocation5] ss:$0 sm:$0xff]  ;;  %1291 = vmatpush.msrb.mxu0 %v1675_v35 }
 0x460   : > { %987 = vperm.xlu2 %1792, %v635_v45  }
 0x4b3   : > { %v926_v39 = vpop.xlane.xlu1 %925 }
 0x4b4   : > { %v937_v5 = vmul.f32 %v2317_v38, %v926_v39 }
 0x4b6   : > { %v2320_v40 = vsub.f32 %v920_v26, %v937_v5  ;;  %v1664_v26 = vld [vmem:[%s2537_s9 + $0xa8] sm:$0xff] }
 0x4b7   : > { %1214 = vmatpush.msra.mxu3 %v1664_v26 }
 0x4b8   : > { %v941_v41 = vmul.f32 %v2320_v40, %v2320_v40 }
 0x4b9   : > { %1215 = vmatpush.msra.mxu3 %v1663_v33 }
 0x4ba   : > { %v943_v42 = vsel %vm645_vm0, %v941_v41, 0.0 }
 0x4bb   : > { %v929_v43 = vpop.xlane.xlu2 %928  ;;  %944 = vadd.xlane.f32.xlu0 %v943_v42 }
 0x4bc   : > { %v938_v44 = vmul.f32 %v2317_v38, %v929_v43 }
 0x4be   : > { %v2330_v46 = vsub.f32 %v921_v30, %v938_v44 }
 0x4c0   : > { %v942_v47 = vmul.f32 %v2330_v46, %v2330_v46 }
 0x4c2   : > { %v946_v48 = vsel %vm645_vm0, %v942_v47, 0.0 }
 0x4c3   : > { %947 = vadd.xlane.f32.xlu1 %v946_v48  ;;  %v2438_v43 = vpop.permute.xlu2 %987 }
 0x4dc   : > { %992 = vperm.xlu1 %1793, %v636_v49  }
 0x52e   : > { %v945_v54 = vpop.xlane.xlu0 %944 }
 0x52f   : > { %v949_v58 = vmul.f32 %v945_v54, %v2317_v38 }
 0x531   : > { %v951_v1 = vadd.f32 1e-06, %v949_v58  ;;  %v1682_v58 = vld [vmem:[%s2537_s9 + $0x108] sm:$0xff] }
 0x533   : > { %1821 = vrsqrt.f32 %v951_v1  ;;  %vm959_vm4 = vweird.f32 %v951_v1 }
 0x536   : > { %v948_v8 = vpop.xlane.xlu1 %947 }
 0x537   : > { %v950_v9 = vmul.f32 %v948_v8, %v2317_v38 }
 0x539   : > { %v1822_v10 = vpop.eup %1821  ;;  %v952_v11 = vadd.f32 1e-06, %v950_v9 }
 0x53a   : > { %v954_v12 = vmul.f32 %v1822_v10, %v951_v1  ;;  %vm960_vm3 = vweird.f32 %v1822_v10 }
 0x53b   : > { %1823 = vrsqrt.f32 %v952_v11  ;;  %vm961_vm5 = vmor %vm959_vm4, %vm960_vm3  ;;  %vm969_vm7 = vweird.f32 %v952_v11 }
 0x53c   : > { %v955_v13 = vmul.f32 %v1822_v10, %v954_v12  ;;  %v1353_v12 = vld [vmem:[%s2539_s11 + $0x30] sm:$0xff] }
 0x53e   : > { %v956_v14 = vmul.f32 0.5, %v955_v13  ;;  %v1352_v13 = vld [vmem:[%s2539_s11 + $0x28] sm:$0xff] }
 0x540   : > { %v957_v21 = vsub.f32 1.5, %v956_v14 }
 0x541   : > { %v1824_v25 = vpop.eup %1823 }
 0x542   : > { %v958_v29 = vmul.f32 %v1822_v10, %v957_v21  ;;  %v964_v30 = vmul.f32 %v1824_v25, %v952_v11  ;;  %vm970_vm6 = vweird.f32 %v1824_v25  ;;  %v1354_v11 = vld [vmem:[%s2539_s11 + $0x38] sm:$0xff] }
 0x543   : > { %vm971_vm8 = vmor %vm969_vm7, %vm970_vm6 }
 0x544   : > { %v965_v36 = vmul.f32 %v1824_v25, %v964_v30  ;;  %v962_v4 = vsel %vm961_vm5, %v1822_v10, %v958_v29 }
 0x545   : > { %v973_v39 = vmul.f32 %v962_v4, %v2320_v40 }
 0x546   : > { %v966_v5 = vmul.f32 0.5, %v965_v36 }
 0x547   : > { %v978_v41 = vmul.f32 %v1797_v31, %v973_v39 }
 0x548   : > { %v967_v42 = vsub.f32 1.5, %v966_v5 }
 0x549   : > { %v983_v44 = vadd.f32 %v1798_v37, %v978_v41 }
 0x54a   : > { %v968_v45 = vmul.f32 %v1824_v25, %v967_v42 }
 0x54b   : > { %v2441_v47 = vmul.f32 %v2438_v43, %v983_v44 }
 0x54c   : > { %v972_v48 = vsel %vm971_vm8, %v1824_v25, %v968_v45 }
 0x54d   : > { %1000 = vst.msk [vmem:[#allocation2 + $0x4] sm:$0xff] %vm645_vm0, %v2441_v47  ;;  %v974_v40 = vmul.f32 %v972_v48, %v2330_v46  ;;  %v1799_v48 = vld [vmem:[#allocation8] ss:$0 sm:$0xff] }
 0x54e   : > { %v2446_v50 = vpop.permute.xlu1 %992 }
 0x54f   : > { %v979_v49 = vmul.f32 %v1797_v31, %v974_v40 }
 0x551   : > { %v984_v51 = vadd.f32 %v1798_v37, %v979_v49 }
 0x553   : > { %v2449_v52 = vmul.f32 %v2446_v50, %v984_v51 }
 0x554   : > { %v1013_v54 = vld [vmem:[#allocation2 + $0x1] sm:$0xff] }
 0x555   : > { %v1006_v55 = vld [vmem:[#allocation2] sm:$0xff]  ;;  %1001 = vst.msk [vmem:[#allocation2 + $0xc] sm:$0xff] %vm645_vm0, %v2449_v52  ;;  %1641 = vmatmul.msk.f32.vlgmr.msrb.gmra.mxu1 %vm645_vm0, %v1013_v54 }
 0x556   : > { %v1078_v56 = vld [vmem:[#allocation2 + $0x2] sm:$0xff]  ;;  %1643 = vmatmul.msk.f32.vlgmr.msrb.gmra.mxu3 %vm645_vm0, %v1006_v55  ;;  %1326 = vmatpush.msrb.mxu1 %v1684_v53 }
 0x557   : > { %v1116_v46 = vld [vmem:[#allocation2 + $0x3] sm:$0xff]  ;;  %1649 = vmatmul.msk.f32.vlgmr.msra.gmra.mxu2 %vm645_vm0, %v1078_v56  ;;  %1374 = vmatpush.msrb.mxu3 %v1354_v11 }
 0x558   : > { %1655 = vmatmul.msk.f32.vlgmr.msra.gmra.mxu0 %vm645_vm0, %v1116_v46  ;;  %1327 = vmatpush.msrb.mxu1 %v1683_v57  ;;  %v1154_v0 = vld [vmem:[#allocation2 + $0x4] sm:$0xff] }
 0x559   : > { %1375 = vmatpush.msrb.mxu3 %v1353_v12 }
 0x55a   : > { %1328 = vmatpush.msrb.mxu1 %v1682_v58 }
 0x55b   : > { %1376 = vmatpush.msrb.mxu3 %v1352_v13 }
 0x55c   : > { %v1014_v60 = vld [vmem:[#allocation2 + $0x9] sm:$0xff]  ;;  %1329 = vmatpush.msrb.mxu1 %v1681_v59 }
 0x55d   : > { %v1007_v61 = vld [vmem:[#allocation2 + $0x8] sm:$0xff]  ;;  %1642 = vmatmul.msk.f32.gmra.mxu1 %vm645_vm0, %v1014_v60  ;;  %v1307_v10 = vld [vmem:[#allocation2 + $0x10] sm:$0xff]  ;;  %1377 = vmatpush.msrb.mxu3 %v1351_v15 }
 0x55e   : > { %v1079_v62 = vld [vmem:[#allocation2 + $0xa] sm:$0xff]  ;;  %1644 = vmatmul.msk.f32.gmra.mxu3 %vm645_vm0, %v1007_v61 }
 0x55f   : > { %v1117_v63 = vld [vmem:[#allocation2 + $0xb] sm:$0xff]  ;;  %1650 = vmatmul.msk.f32.gmra.mxu2 %vm645_vm0, %v1079_v62  ;;  %1378 = vmatpush.msrb.mxu3 %v1350_v16 }
 0x560   : > { %1656 = vmatmul.msk.f32.gmra.mxu0 %vm645_vm0, %v1117_v63  ;;  %v1192_v1 = vld [vmem:[#allocation2 + $0x5] sm:$0xff]  ;;  %v1193_v7 = vld [vmem:[#allocation2 + $0xd] sm:$0xff] }
 0x561   : > { %v1230_v2 = vld [vmem:[#allocation2 + $0x6] sm:$0xff]  ;;  %v1231_v8 = vld [vmem:[#allocation2 + $0xe] sm:$0xff]  ;;  %1379 = vmatpush.msrb.mxu3 %v1349_v17 }
 0x562   : > { %v1268_v3 = vld [vmem:[#allocation2 + $0x7] sm:$0xff]  ;;  %v1269_v9 = vld [vmem:[#allocation2 + $0xf] sm:$0xff] }
 0x563   : > { %v1155_v6 = vld [vmem:[#allocation2 + $0xc] sm:$0xff]  ;;  %1380 = vmatpush.msrb.mxu3 %v1348_v18 }
 0x565   : > { %1661 = vmatmul.msk.f32.vlgmr.msra.gmra.mxu1 %vm645_vm0, %v1154_v0  ;;  %1381 = vmatpush.msrb.mxu3 %v1347_v20 }
 0x566   : > { %1667 = vmatmul.msk.f32.vlgmr.msra.gmra.mxu3 %vm645_vm0, %v1192_v1 }
 0x567   : > { %1673 = vmatmul.msk.f32.vlgmr.msrb.gmra.mxu2 %vm645_vm0, %v1230_v2 }
 0x568   : > { %1679 = vmatmul.msk.f32.vlgmr.msrb.gmra.mxu0 %vm645_vm0, %v1268_v3 }
 0x56d   : > { %1662 = vmatmul.msk.f32.gmra.mxu1 %vm645_vm0, %v1155_v6 }
 0x56e   : > { %1668 = vmatmul.msk.f32.gmra.mxu3 %vm645_vm0, %v1193_v7 }
 0x56f   : > { %1674 = vmatmul.msk.f32.gmra.mxu2 %vm645_vm0, %v1231_v8 }
 0x570   : > { %1680 = vmatmul.msk.f32.gmra.mxu0 %vm645_vm0, %v1269_v9 }
 0x575   : > { %1685 = vmatmul.msk.f32.vlgmr.msrb.gmra.mxu1 %vm645_vm0, %v1007_v61  ;;  %v1800_v61 = vld [vmem:[#allocation10] ss:$0 sm:$0xff] }
 0x57d   : > { %1686 = vmatmul.msk.f32.gmra.mxu1 %vm645_vm0, %v1307_v10 }
 0x5d2   : > { %v1038_v14 = vpop.f32.mrf.mxu1 }
 0x5d5   : > { %v1141_v22 = vpop.f32.mrf.mxu0 }
 0x5d9   : > { %v1067_v19 = vpop.f32.mrf.mxu3 }
 0x5da   : > { %v1103_v21 = vpop.f32.mrf.mxu2  ;;  %v1041_v23 = vpop.f32.mrf.mxu1  ;;  %v1068_v24 = vadd.f32 %v1067_v19, %v1038_v14 }
 0x5dc   : > { %v1109_v26 = vadd.f32 %v1103_v21, %v1068_v24 }
 0x5dd   : > { %v1144_v29 = vpop.f32.mrf.mxu0 }
 0x5de   : > { %v1147_v31 = vadd.f32 %v1141_v22, %v1109_v26 }
 0x5e1   : > { %v1070_v25 = vpop.f32.mrf.mxu3 }
 0x5e2   : > { %v1106_v27 = vpop.f32.mrf.mxu2  ;;  %v1179_v28 = vpop.f32.mrf.mxu1  ;;  %v1071_v30 = vadd.f32 %v1070_v25, %v1041_v23 }
 0x5e3   : > { %v1185_v32 = vadd.f32 %v1179_v28, %v1147_v31 }
 0x5e4   : > { %v1110_v34 = vadd.f32 %v1106_v27, %v1071_v30  ;;  %v1801_v30 = vld [vmem:[#allocation11] ss:$0 sm:$0xff] }
 0x5e5   : > { %v1293_v5 = vpop.f32.mrf.mxu0 }
 0x5e6   : > { %v1148_v39 = vadd.f32 %v1144_v29, %v1110_v34 }
 0x5e9   : > { %v1217_v33 = vpop.f32.mrf.mxu3 }
 0x5ea   : > { %v1223_v35 = vadd.f32 %v1217_v33, %v1185_v32  ;;  %v1255_v36 = vpop.f32.mrf.mxu2  ;;  %v1182_v4 = vpop.f32.mrf.mxu1  ;;  %v1802_v33 = vld [vmem:[#allocation13] ss:$0 sm:$0xff] }
 0x5eb   : > { %v1186_v41 = vadd.f32 %v1182_v4, %v1148_v39 }
 0x5ec   : > { %v1261_v37 = vadd.f32 %v1255_v36, %v1223_v35 }
 0x5ed   : > { %v1296_v56 = vpop.f32.mrf.mxu0 }
 0x5ee   : > { %v1299_v45 = vadd.f32 %v1293_v5, %v1261_v37 }
 0x5f1   : > { %v1220_v42 = vpop.f32.mrf.mxu3 }
 0x5f2   : > { %v1224_v44 = vadd.f32 %v1220_v42, %v1186_v41  ;;  %v1331_v40 = vpop.f32.mrf.mxu1  ;;  %v1258_v51 = vpop.f32.mrf.mxu2 }
 0x5f3   : > { %v1337_v49 = vadd.f32 %v1331_v40, %v1299_v45 }
 0x5f4   : > { %v1262_v53 = vadd.f32 %v1258_v51, %v1224_v44 }
 0x5f5   : > { %v1343_v54 = vadd.f32 %v1799_v48, %v1337_v49 }
 0x5f6   : > { %v1300_v46 = vadd.f32 %v1296_v56, %v1262_v53 }
 0x5f7   : > { %v1345_v55 = vmax.f32 %v1343_v54, 0.0 }
 0x5f9   : > { %1687 = vmatmul.msk.f32.vlgmr.msrb.gmra.mxu3 %vm1359_vm9, %v1345_v55 }
 0x5fa   : > { %v1334_v57 = vpop.f32.mrf.mxu1 }
 0x5fb   : > { %v1338_v58 = vadd.f32 %v1334_v57, %v1300_v46 }
 0x5fd   : > { %v1344_v59 = vadd.f32 %v1799_v48, %v1338_v58 }
 0x5ff   : > { %v1346_v60 = vmax.f32 %v1344_v59, 0.0 }
 0x601   : > { %1688 = vmatmul.msk.f32.gmra.mxu3 %vm1359_vm9, %v1346_v60 }
 0x67c   : > { %v1383_v62 = vpop.f32.mrf.mxu3 }
 0x67d   : > { %v1384_v63 = vadd.f32 %v1800_v61, %v1383_v62 }
 0x67f   : > { %v1389_v0 = vadd.f32 %v1384_v63, %v2441_v47 }
 0x681   : > { %v1393_v1 = vsel %vm645_vm0, %v1389_v0, 0.0 }
 0x682   : > { %1394 = vadd.xlane.f32.xlu0 %v1393_v1 }
 0x684   : > { %v1386_v2 = vpop.f32.mrf.mxu3 }
 0x685   : > { %v1387_v3 = vadd.f32 %v1800_v61, %v1386_v2 }
 0x687   : > { %v1390_v6 = vadd.f32 %v1387_v3, %v2449_v52 }
 0x689   : > { %v1396_v7 = vsel %vm645_vm0, %v1390_v6, 0.0 }
 0x68a   : > { %1397 = vadd.xlane.f32.xlu0 %v1396_v7 }
 0x6f5   : > { %v1395_v8 = vpop.xlane.xlu0 %1394 }
 0x6f6   : > { %v1399_v9 = vmul.f32 %v1395_v8, %v2317_v38 }
 0x6f8   : > { %v1401_v10 = vsub.f32 %v1389_v0, %v1399_v9 }
 0x6fa   : > { %v1403_v11 = vmul.f32 %v1401_v10, %v1401_v10 }
 0x6fc   : > { %v1405_v12 = vsel %vm645_vm0, %v1403_v11, 0.0 }
 0x6fd   : > { %1406 = vadd.xlane.f32.xlu0 %v1405_v12  ;;  %v1398_v13 = vpop.xlane.xlu0 %1397 }
 0x6fe   : > { %v1400_v47 = vmul.f32 %v1398_v13, %v2317_v38 }
 0x700   : > { %v1402_v14 = vsub.f32 %v1390_v6, %v1400_v47 }
 0x702   : > { %v1404_v15 = vmul.f32 %v1402_v14, %v1402_v14 }
 0x704   : > { %v1408_v16 = vsel %vm645_vm0, %v1404_v15, 0.0 }
 0x705   : > { %1409 = vadd.xlane.f32.xlu2 %v1408_v16 }
 0x770   : > { %v1407_v52 = vpop.xlane.xlu0 %1406 }
 0x771   : > { %v1411_v17 = vmul.f32 %v1407_v52, %v2317_v38 }
 0x773   : > { %v1413_v18 = vadd.f32 1e-06, %v1411_v17 }
 0x775   : > { %1825 = vrsqrt.f32 %v1413_v18  ;;  %vm1421_vm11 = vweird.f32 %v1413_v18 }
 0x778   : > { %v1410_v19 = vpop.xlane.xlu2 %1409 }
 0x779   : > { %v1412_v20 = vmul.f32 %v1410_v19, %v2317_v38 }
 0x77b   : > { %v1826_v21 = vpop.eup %1825  ;;  %v1414_v22 = vadd.f32 1e-06, %v1412_v20 }
 0x77c   : > { %v1416_v23 = vmul.f32 %v1826_v21, %v1413_v18  ;;  %vm1422_vm10 = vweird.f32 %v1826_v21 }
 0x77d   : > { %1827 = vrsqrt.f32 %v1414_v22  ;;  %vm1423_vm12 = vmor %vm1421_vm11, %vm1422_vm10  ;;  %vm1431_vm14 = vweird.f32 %v1414_v22 }
 0x77e   : > { %v1417_v24 = vmul.f32 %v1826_v21, %v1416_v23 }
 0x780   : > { %v1418_v25 = vmul.f32 0.5, %v1417_v24 }
 0x782   : > { %v1419_v26 = vsub.f32 1.5, %v1418_v25 }
 0x783   : > { %v1828_v27 = vpop.eup %1827 }
 0x784   : > { %v1420_v28 = vmul.f32 %v1826_v21, %v1419_v26  ;;  %v1426_v29 = vmul.f32 %v1828_v27, %v1414_v22  ;;  %vm1432_vm13 = vweird.f32 %v1828_v27 }
 0x785   : > { %vm1433_vm15 = vmor %vm1431_vm14, %vm1432_vm13 }
 0x786   : > { %v1424_v31 = vsel %vm1423_vm12, %v1826_v21, %v1420_v28  ;;  %v1427_v32 = vmul.f32 %v1828_v27, %v1426_v29 }
 0x787   : > { %v1435_v34 = vmul.f32 %v1424_v31, %v1401_v10 }
 0x788   : > { %v1428_v38 = vmul.f32 0.5, %v1427_v32 }
 0x789   : > { %v1440_v35 = vmul.f32 %v1801_v30, %v1435_v34 }
 0x78a   : > { %v1429_v36 = vsub.f32 1.5, %v1428_v38 }
 0x78b   : > { %v1445_v4 = vadd.f32 %v1802_v33, %v1440_v35 }
 0x78c   : > { %v1430_v37 = vmul.f32 %v1828_v27, %v1429_v36 }
 0x78d   : > { %v1447_v39 = vmul.f32 %v1445_v4, %v2438_v43 }
 0x78e   : > { %v1434_v5 = vsel %vm1433_vm15, %v1828_v27, %v1430_v37 }
 0x78f   : > { %1449 = vst.msk [vmem:[%s630_s13] sm:$0xff] %vm645_vm0, %v1447_v39  ;;  %v1436_v41 = vmul.f32 %v1434_v5, %v1402_v14 }
 0x791   : > { %v1441_v42 = vmul.f32 %v1801_v30, %v1436_v41 }
 0x793   : > { %v1446_v44 = vadd.f32 %v1802_v33, %v1441_v42 }
 0x795   : > { %v1448_v45 = vmul.f32 %v1446_v44, %v2446_v50 }
 0x797   : > { %1450 = vst.msk [vmem:[%s630_s13 + $0x8] sm:$0xff] %vm645_vm0, %v1448_v45 }
 0x798 PF: > { %s29_s18 = sadd.s32 1, %s2061_s18  }
 0x799   : > { %p26_p7 = scmp.ge.s32.totalorder %s29_s18, 4  }
 0x79b   :  { %28 = sbr.rel (!%p26_p7) target bundleno = 8 (0x8), region = 153 }
 0x7a0   :  { %1472 = vsyncpa [#allocation4], 1 }
 0x7a1   :  { %1474 = vsyncpa [#allocation4 + $0x1], 1 }
 0x7a2   :  { %1475 = vsyncpa [#allocation6], 1 }
 0x7a3   :  { %1476 = vsyncpa [#allocation9], 1 }
 0x7a4   :  { %1477 = vsyncpa [#allocation12], 1 }

// kernel: fastspeech2_forward.9
= control target key start
LH: loop header
LB: loop body
LE: loop exit
PB: predicated region body
PF: predicated region fallthrough
CT: control target
= control target key end

     0   :  { %s1330_s13 = smov 0   ;;  %s1697_s0 = inlined_call_operand.vmem [shape: f32[2,16,32], index: 0, kind: input, shape index: {}]   ;;  %s1698_s1 = inlined_call_operand.vmem [shape: f32[2,16,1], index: 1, kind: input, shape index: {}]   ;;  %s1699_s2 = inlined_call_operand.vmem [shape: f32[32,8], index: 2, kind: input, shape index: {}]   ;;  %s1700_s3 = inlined_call_operand.vmem [shape: f32[1,8], index: 3, kind: input, shape index: {}]   ;;  %s1701_s4 = inlined_call_operand.vmem [shape: f32[5,8,64], index: 4, kind: input, shape index: {}]   ;;  %s1702_s5 = inlined_call_operand.vmem [shape: f32[1,64], index: 5, kind: input, shape index: {}]   ;;  %s1703_s6 = inlined_call_operand.vmem [shape: f32[5,64,64], index: 6, kind: input, shape index: {}]   ;;  %s1704_s7 = inlined_call_operand.vmem [shape: f32[1,64], index: 7, kind: input, shape index: {}]   ;;  %s1705_s8 = inlined_call_operand.vmem [shape: f32[5,64,8], index: 8, kind: input, shape index: {}]   ;;  %s1706_s9 = inlined_call_operand.vmem [shape: f32[1,8], index: 9, kind: input, shape index: {}]   ;;  %s1707_s10 = inlined_call_operand.vmem [shape: f32[2,16,8], index: 10, kind: output, shape index: {}]  }
   0x1 LB: > { %s1126_s14 = sadd.s32 4294967295, %s1271_s13   ;;  %p1130_p0 = scmp.ge.s32.totalorder %s1271_s13, 1  ;;  %s1271_s13 = sphi %s1330_s13, %s20_s13  }
   0x2   : > { %p322_p1 = scmp.lt.s32.totalorder %s1271_s13, 3 }
   0x4   : > { %p323_p2 = pnand %p1130_p0, %p322_p1 }
   0x5   : > { %p365_p3 = scmp.lt.s32.totalorder (!%p323_p2), %s1126_s14, 1 }
   0x6   : > { %326 = sbr.rel (%p323_p2) target bundleno = 652 (0x28c), region = 60 }
   0xb   : > { %v387_v0 = vld [vmem:[%s1699_s2 + $0x18] sm:$0xff]  ;;  %v386_v1 = vld [vmem:[%s1699_s2 + $0x10] sm:$0xff]  ;;  %v385_v2 = vld [vmem:[%s1699_s2 + $0x8] sm:$0xff]  ;;  %s1709_s14 = smov (!%p365_p3, %s1126_s14), 1  ;;  %vm392_vm0 = vcmask 261120   ;;  %vm422_vm1 = vcmask 64512  }
   0xc   : > { %411 = vmatpush.msra.mxu0 %v387_v0  ;;  %v384_v3 = vld [vmem:[%s1699_s2] sm:$0xff]  ;;  %s1350_s23 = sshll.u32 %s1709_s14, 4  ;;  %v1273_v6 = vmov 0.0   ;;  %vm425_vm2 = vcmask 60416   ;;  %v1139_v7 = vld [vmem:[%s1701_s4 + $0x8] sm:$0xff]  ;;  %v1144_v9 = vld [vmem:[%s1701_s4 + $0x10] sm:$0xff] }
   0xd   : > { %s369_s26 = scalar_lea.vmem %s1697_s0, %s1350_s23  ;;  %423 = vst.msk [vmem:[#allocation2] sm:$0xff] %vm422_vm1, %v1273_v6  ;;  %v429_v8 = vld [vmem:[%s1701_s4] sm:$0xff]  ;;  %457 = vmatpush.msra.mxu1 %v1139_v7  ;;  %519 = vmatpush.msra.mxu3 %v1144_v9  ;;  %v1147_v11 = vld [vmem:[%s1701_s4 + $0x18] sm:$0xff]  ;;  %vm607_vm3 = vcmask 523264   ;;  %v1159_v30 = vld [vmem:[%s1703_s6 + $0x70] sm:$0xff]  ;;  %vm610_vm4 = vcmask 519168   ;;  %s374_s25 = scalar_lea.vmem %s1698_s1, %s1350_s23 }
   0xe   : > { %412 = vmatpush.msra.mxu0 %v386_v1  ;;  %v380_v4 = vld [vmem:[%s369_s26] sm:$0xff]  ;;  %v381_v5 = vld [vmem:[%s369_s26 + $0x8] sm:$0xff]  ;;  %424 = vst.msk [vmem:[#allocation2 + $0x8] sm:$0xff] %vm422_vm1, %v1273_v6  ;;  %486 = vmatpush.msra.mxu2 %v429_v8  ;;  %v1160_v27 = vld [vmem:[%s1703_s6 + $0x78] sm:$0xff]  ;;  %s379_s30 = scalar_lea.vmem %s1707_s10, %s1350_s23 }
   0xf   : > { %426 = vst.msk [vmem:[#allocation2 + $0x10] sm:$0xf] %vm425_vm2, %v1273_v6  ;;  %v1150_v10 = vld [vmem:[%s1701_s4 + $0x20] sm:$0xff]  ;;  %554 = vmatpush.msrb.mxu1 %v1147_v11  ;;  %v621_v28 = vld [vmem:[%s1703_s6 + $0x38] sm:$0xff]  ;;  %649 = vmatpush.msrb.mxu3 %v1160_v27  ;;  %v620_v31 = vld [vmem:[%s1703_s6 + $0x30] sm:$0xff] }
  0x10   : > { %413 = vmatpush.msra.mxu0 %v385_v2  ;;  %589 = vmatpush.msrb.mxu2 %v1150_v10  ;;  %v1253_v12 = vld [vmem:[%s1700_s3] ss:$0 sm:$0xff]  ;;  %608 = vst.msk [vmem:[#allocation3] sm:$0xff] %vm607_vm3, %v1273_v6  ;;  %v1172_v29 = vld [vmem:[%s1703_s6 + $0xb8] sm:$0xff]  ;;  %v1171_v32 = vld [vmem:[%s1703_s6 + $0xb0] sm:$0xff] }
  0x11   : > { %609 = vst.msk [vmem:[#allocation3 + $0x8] sm:$0xff] %vm607_vm3, %v1273_v6  ;;  %650 = vmatpush.msrb.mxu3 %v1159_v30  ;;  %v1158_v34 = vld [vmem:[%s1703_s6 + $0x68] sm:$0xff]  ;;  %v1157_v37 = vld [vmem:[%s1703_s6 + $0x60] sm:$0xff]  ;;  %v1156_v40 = vld [vmem:[%s1703_s6 + $0x58] sm:$0xff] }
  0x12   : > { %414 = vmatpush.msra.mxu0 %v384_v3  ;;  %v619_v35 = vld [vmem:[%s1703_s6 + $0x28] sm:$0xff]  ;;  %v618_v38 = vld [vmem:[%s1703_s6 + $0x20] sm:$0xff]  ;;  %611 = vst.msk [vmem:[#allocation3 + $0x10] sm:$0xf] %vm610_vm4, %v1273_v6  ;;  %v617_v41 = vld [vmem:[%s1703_s6 + $0x18] sm:$0xff] }
  0x13   : > { %1137 = vmatmul.msk.f32.vlgmr.msra.gmra.mxu0 %vm392_vm0, %v380_v4  ;;  %v1170_v36 = vld [vmem:[%s1703_s6 + $0xa8] sm:$0xff]  ;;  %651 = vmatpush.msrb.mxu3 %v1158_v34  ;;  %v1169_v39 = vld [vmem:[%s1703_s6 + $0xa0] sm:$0xff]  ;;  %v1168_v42 = vld [vmem:[%s1703_s6 + $0x98] sm:$0xff] }
  0x14   : > { %678 = vmatpush.msrb.mxu0 %v621_v28  ;;  %v1182_v43 = vld [vmem:[%s1703_s6 + $0xf8] sm:$0xff]  ;;  %v1155_v45 = vld [vmem:[%s1703_s6 + $0x50] sm:$0xff]  ;;  %v1154_v50 = vld [vmem:[%s1703_s6 + $0x48] sm:$0xff] }
  0x15   : > { %652 = vmatpush.msrb.mxu3 %v1157_v37  ;;  %v616_v46 = vld [vmem:[%s1703_s6 + $0x10] sm:$0xff]  ;;  %v615_v51 = vld [vmem:[%s1703_s6 + $0x8] sm:$0xff]  ;;  %v1153_v54 = vld [vmem:[%s1703_s6 + $0x40] sm:$0xff] }
  0x16   : > { %679 = vmatpush.msrb.mxu0 %v620_v31  ;;  %v1167_v47 = vld [vmem:[%s1703_s6 + $0x90] sm:$0xff]  ;;  %v1166_v52 = vld [vmem:[%s1703_s6 + $0x88] sm:$0xff]  ;;  %v614_v55 = vld [vmem:[%s1703_s6] sm:$0xff] }
  0x17   : > { %653 = vmatpush.msrb.mxu3 %v1156_v40  ;;  %v1181_v48 = vld [vmem:[%s1703_s6 + $0xf0] sm:$0xff]  ;;  %v1180_v53 = vld [vmem:[%s1703_s6 + $0xe8] sm:$0xff]  ;;  %v1165_v56 = vld [vmem:[%s1703_s6 + $0x80] sm:$0xff] }
  0x18   : > { %680 = vmatpush.msrb.mxu0 %v619_v35  ;;  %v1179_v57 = vld [vmem:[%s1703_s6 + $0xe0] sm:$0xff]  ;;  %v1192_v58 = vld [vmem:[%s1703_s6 + $0x138] sm:$0xff]  ;;  %v1191_v60 = vld [vmem:[%s1703_s6 + $0x130] sm:$0xff] }
  0x19   : > { %654 = vmatpush.msrb.mxu3 %v1155_v45  ;;  %v1178_v59 = vld [vmem:[%s1703_s6 + $0xd8] sm:$0xff]  ;;  %v1177_v61 = vld [vmem:[%s1703_s6 + $0xd0] sm:$0xff]  ;;  %v1190_v63 = vld [vmem:[%s1703_s6 + $0x128] sm:$0xff] }
  0x1a   : > { %681 = vmatpush.msrb.mxu0 %v618_v38  ;;  %v1176_v1 = vld [vmem:[%s1703_s6 + $0xc8] sm:$0xff]  ;;  %v1189_v4 = vld [vmem:[%s1703_s6 + $0x120] sm:$0xff]  ;;  %v1188_v8 = vld [vmem:[%s1703_s6 + $0x118] sm:$0xff] }
  0x1b   : > { %1138 = vmatmul.msk.f32.gmra.mxu0 %vm392_vm0, %v381_v5  ;;  %655 = vmatpush.msrb.mxu3 %v1154_v50  ;;  %v1175_v5 = vld [vmem:[%s1703_s6 + $0xc0] sm:$0xff]  ;;  %v1187_v9 = vld [vmem:[%s1703_s6 + $0x110] sm:$0xff]  ;;  %v839_v40 = vld [vmem:[%s1705_s8 + $0x38] sm:$0xff] }
  0x1c   : > { %682 = vmatpush.msrb.mxu0 %v617_v41  ;;  %v1254_v11 = vld [vmem:[%s1702_s5] ss:$0 sm:$0xff]  ;;  %v1214_v41 = vld [vmem:[%s1705_s8 + $0xb8] sm:$0xff]  ;;  %v837_v45 = vld [vmem:[%s1705_s8 + $0x28] sm:$0xff] }
  0x1d   : > { %656 = vmatpush.msrb.mxu3 %v1153_v54  ;;  %v1198_v50 = vld [vmem:[%s1705_s8 + $0x58] sm:$0xff] }
  0x1e   : > { %683 = vmatpush.msrb.mxu0 %v616_v46  ;;  %v1212_v46 = vld [vmem:[%s1705_s8 + $0xa8] sm:$0xff] }
  0x20   : > { %684 = vmatpush.msrb.mxu0 %v615_v51  ;;  %v1224_v51 = vld [vmem:[%s1705_s8 + $0xf8] sm:$0xff] }
  0x22   : > { %685 = vmatpush.msrb.mxu0 %v614_v55  ;;  %v1197_v55 = vld [vmem:[%s1705_s8 + $0x50] sm:$0xff] }
  0x90   : > { %v416_v13 = vpop.f32.mrf.mxu0 }
  0x91   : > { %v1379_v14 = vadd.f32 %v1253_v12, %v416_v13  ;;  %v1186_v13 = vld [vmem:[%s1703_s6 + $0x108] sm:$0xff] }
  0x93   : > { %427 = vst.msk [vmem:[#allocation2 + $0x2] sm:$0xff] %vm422_vm1, %v1379_v14 }
  0x98   : > { %v419_v15 = vpop.f32.mrf.mxu0 }
  0x99   : > { %v1383_v16 = vadd.f32 %v1253_v12, %v419_v15 }
  0x9a   : > { %v434_v17 = vld [vmem:[#allocation2 + $0x1] sm:$0xff] }
  0x9b   : > { %v430_v18 = vld [vmem:[#allocation2] sm:$0xff]  ;;  %428 = vst.msk [vmem:[#allocation2 + $0xa] sm:$0xff] %vm422_vm1, %v1383_v16  ;;  %1140 = vmatmul.msk.f32.vlgmr.msra.gmra.mxu1 %vm422_vm1, %v434_v17 }
  0x9c   : > { %v496_v19 = vld [vmem:[#allocation2 + $0x2] sm:$0xff]  ;;  %1142 = vmatmul.msk.f32.vlgmr.msra.gmra.mxu2 %vm422_vm1, %v430_v18  ;;  %718 = vmatpush.msra.mxu1 %v1172_v29 }
  0x9d   : > { %1145 = vmatmul.msk.f32.vlgmr.msra.gmra.mxu3 %vm422_vm1, %v496_v19  ;;  %760 = vmatpush.msra.mxu2 %v1182_v43  ;;  %v1185_v18 = vld [vmem:[%s1703_s6 + $0x100] sm:$0xff]  ;;  %v1213_v43 = vld [vmem:[%s1705_s8 + $0xb0] sm:$0xff] }
  0x9e   : > { %719 = vmatpush.msra.mxu1 %v1171_v32  ;;  %802 = vmatpush.msra.mxu3 %v1192_v58  ;;  %v1209_v58 = vld [vmem:[%s1705_s8 + $0x90] sm:$0xff] }
  0x9f   : > { %761 = vmatpush.msra.mxu2 %v1181_v48  ;;  %v836_v48 = vld [vmem:[%s1705_s8 + $0x20] sm:$0xff] }
  0xa0   : > { %720 = vmatpush.msra.mxu1 %v1170_v36  ;;  %803 = vmatpush.msra.mxu3 %v1191_v60  ;;  %v1222_v60 = vld [vmem:[%s1705_s8 + $0xe8] sm:$0xff] }
  0xa1   : > { %762 = vmatpush.msra.mxu2 %v1180_v53  ;;  %v1210_v53 = vld [vmem:[%s1705_s8 + $0x98] sm:$0xff] }
  0xa2   : > { %v435_v20 = vld [vmem:[#allocation2 + $0x9] sm:$0xff]  ;;  %721 = vmatpush.msra.mxu1 %v1169_v39  ;;  %804 = vmatpush.msra.mxu3 %v1190_v63  ;;  %v1202_v39 = vld [vmem:[%s1705_s8 + $0x78] sm:$0xff]  ;;  %v1195_v63 = vld [vmem:[%s1705_s8 + $0x40] sm:$0xff] }
  0xa3   : > { %v431_v21 = vld [vmem:[#allocation2 + $0x8] sm:$0xff]  ;;  %1141 = vmatmul.msk.f32.gmra.mxu1 %vm422_vm1, %v435_v20  ;;  %763 = vmatpush.msra.mxu2 %v1179_v57  ;;  %v834_v57 = vld [vmem:[%s1705_s8 + $0x10] sm:$0xff] }
  0xa4   : > { %v497_v22 = vld [vmem:[#allocation2 + $0xa] sm:$0xff]  ;;  %1143 = vmatmul.msk.f32.gmra.mxu2 %vm422_vm1, %v431_v21  ;;  %722 = vmatpush.msra.mxu1 %v1168_v42 }
  0xa5   : > { %1146 = vmatmul.msk.f32.gmra.mxu3 %vm422_vm1, %v497_v22  ;;  %v531_v23 = vld [vmem:[#allocation2 + $0x3] sm:$0xff]  ;;  %v532_v25 = vld [vmem:[#allocation2 + $0xb] sm:$0xff]  ;;  %764 = vmatpush.msra.mxu2 %v1178_v59 }
  0xa6   : > { %v566_v24 = vld [vmem:[#allocation2 + $0x4] sm:$0xff]  ;;  %v567_v26 = vld [vmem:[#allocation2 + $0xc] sm:$0xff]  ;;  %723 = vmatpush.msra.mxu1 %v1167_v47  ;;  %805 = vmatpush.msra.mxu3 %v1189_v4  ;;  %v1234_v4 = vld [vmem:[%s1705_s8 + $0x138] sm:$0xff] }
  0xa7   : > { %765 = vmatpush.msra.mxu2 %v1177_v61  ;;  %867 = vmatpush.msra.mxu0 %v1202_v39  ;;  %v838_v42 = vld [vmem:[%s1705_s8 + $0x30] sm:$0xff]  ;;  %v1199_v47 = vld [vmem:[%s1705_s8 + $0x60] sm:$0xff]  ;;  %v1196_v59 = vld [vmem:[%s1705_s8 + $0x48] sm:$0xff] }
  0xa8   : > { %724 = vmatpush.msra.mxu1 %v1166_v52  ;;  %806 = vmatpush.msra.mxu3 %v1188_v8  ;;  %v835_v52 = vld [vmem:[%s1705_s8 + $0x18] sm:$0xff]  ;;  %v833_v61 = vld [vmem:[%s1705_s8 + $0x8] sm:$0xff]  ;;  %v1233_v8 = vld [vmem:[%s1705_s8 + $0x130] sm:$0xff] }
  0xa9   : > { %766 = vmatpush.msra.mxu2 %v1176_v1  ;;  %v832_v1 = vld [vmem:[%s1705_s8] sm:$0xff] }
  0xaa   : > { %725 = vmatpush.msra.mxu1 %v1165_v56  ;;  %807 = vmatpush.msra.mxu3 %v1187_v9  ;;  %v1223_v56 = vld [vmem:[%s1705_s8 + $0xf0] sm:$0xff] }
  0xab   : > { %1148 = vmatmul.msk.f32.vlgmr.msrb.gmra.mxu1 %vm422_vm1, %v531_v23  ;;  %767 = vmatpush.msra.mxu2 %v1175_v5 }
  0xac   : > { %1151 = vmatmul.msk.f32.vlgmr.msrb.gmra.mxu2 %vm422_vm1, %v566_v24  ;;  %808 = vmatpush.msra.mxu3 %v1186_v13 }
  0xad   : > { %896 = vmatpush.msrb.mxu1 %v839_v40  ;;  %936 = vmatpush.msrb.mxu2 %v1214_v41  ;;  %v382_v40 = vld [vmem:[%s374_s25] sm:$0xff]  ;;  %v383_v41 = vld [vmem:[%s374_s25 + $0x8] sm:$0xff] }
  0xae   : > { %809 = vmatpush.msra.mxu3 %v1185_v18  ;;  %v1231_v18 = vld [vmem:[%s1705_s8 + $0x120] sm:$0xff] }
  0xaf   : > { %897 = vmatpush.msrb.mxu1 %v838_v42  ;;  %937 = vmatpush.msrb.mxu2 %v1213_v43 }
  0xb1   : > { %898 = vmatpush.msrb.mxu1 %v837_v45  ;;  %938 = vmatpush.msrb.mxu2 %v1212_v46 }
  0xb3   : > { %1149 = vmatmul.msk.f32.gmra.mxu1 %vm422_vm1, %v532_v25 }
  0xb4   : > { %1152 = vmatmul.msk.f32.gmra.mxu2 %vm422_vm1, %v567_v26  ;;  %899 = vmatpush.msrb.mxu1 %v836_v48 }
  0xb6   : > { %900 = vmatpush.msrb.mxu1 %v835_v52 }
  0xb8   : > { %901 = vmatpush.msrb.mxu1 %v834_v57 }
  0xba   : > { %902 = vmatpush.msrb.mxu1 %v833_v61  ;;  %v1256_v61 = vld [vmem:[%s1706_s9] ss:$0 sm:$0xff] }
  0xbc   : > { %903 = vmatpush.msrb.mxu1 %v832_v1 }
 0x118   : > { %v459_v33 = vpop.f32.mrf.mxu1 }
 0x11f   : > { %v488_v44 = vpop.f32.mrf.mxu2 }
 0x120   : > { %v462_v49 = vpop.f32.mrf.mxu1  ;;  %v489_v0 = vadd.f32 %v488_v44, %v459_v33  ;;  %v521_v2 = vpop.f32.mrf.mxu3  ;;  %v1200_v44 = vld [vmem:[%s1705_s8 + $0x68] sm:$0xff] }
 0x122   : > { %v527_v7 = vadd.f32 %v521_v2, %v489_v0  ;;  %v1221_v0 = vld [vmem:[%s1705_s8 + $0xe0] sm:$0xff] }
 0x123   : > { %v1207_v2 = vld [vmem:[%s1705_s8 + $0x80] sm:$0xff] }
 0x127   : > { %v491_v62 = vpop.f32.mrf.mxu2 }
 0x128   : > { %v556_v3 = vpop.f32.mrf.mxu1  ;;  %v492_v15 = vadd.f32 %v491_v62, %v462_v49  ;;  %v524_v20 = vpop.f32.mrf.mxu3  ;;  %v1211_v49 = vld [vmem:[%s1705_s8 + $0xa0] sm:$0xff]  ;;  %v1208_v62 = vld [vmem:[%s1705_s8 + $0x88] sm:$0xff] }
 0x129   : > { %v562_v10 = vadd.f32 %v556_v3, %v527_v7  ;;  %939 = vmatpush.msrb.mxu2 %v1211_v49  ;;  %v1220_v3 = vld [vmem:[%s1705_s8 + $0xd8] sm:$0xff]  ;;  %v1219_v7 = vld [vmem:[%s1705_s8 + $0xd0] sm:$0xff] }
 0x12a   : > { %v528_v22 = vadd.f32 %v524_v20, %v492_v15  ;;  %v1230_v20 = vld [vmem:[%s1705_s8 + $0x118] sm:$0xff] }
 0x12b   : > { %940 = vmatpush.msrb.mxu2 %v1210_v53 }
 0x12d   : > { %941 = vmatpush.msrb.mxu2 %v1209_v58 }
 0x12f   : > { %v591_v12 = vpop.f32.mrf.mxu2  ;;  %942 = vmatpush.msrb.mxu2 %v1208_v62 }
 0x130   : > { %v597_v17 = vadd.f32 %v591_v12, %v562_v10  ;;  %v559_v21 = vpop.f32.mrf.mxu1  ;;  %v1218_v10 = vld [vmem:[%s1705_s8 + $0xc8] sm:$0xff] }
 0x131   : > { %v563_v23 = vadd.f32 %v559_v21, %v528_v22  ;;  %943 = vmatpush.msrb.mxu2 %v1207_v2  ;;  %v1229_v21 = vld [vmem:[%s1705_s8 + $0x110] sm:$0xff] }
 0x132   : > { %v603_v19 = vadd.f32 %v1254_v11, %v597_v17  ;;  %v1217_v17 = vld [vmem:[%s1705_s8 + $0xc0] sm:$0xff] }
 0x134   : > { %1257 = vtanh.f32 %v603_v19 }
 0x137   : > { %v594_v24 = vpop.f32.mrf.mxu2 }
 0x138   : > { %v598_v25 = vadd.f32 %v594_v24, %v563_v23  ;;  %v1255_v23 = vld [vmem:[%s1704_s7] ss:$0 sm:$0xff] }
 0x13a   : > { %v1258_v26 = vpop.eup %1257  ;;  %v604_v27 = vadd.f32 %v1254_v11, %v598_v25  ;;  %v1232_v11 = vld [vmem:[%s1705_s8 + $0x128] sm:$0xff] }
 0x13b   : > { %612 = vst.msk [vmem:[#allocation3 + $0x2] sm:$0xff] %vm607_vm3, %v1258_v26  ;;  %v1228_v26 = vld [vmem:[%s1705_s8 + $0x108] sm:$0xff] }
 0x13c   : > { %1259 = vtanh.f32 %v604_v27 }
 0x142   : > { %v1260_v28 = vpop.eup %1259  ;;  %v633_v29 = vld [vmem:[#allocation3 + $0x1] sm:$0xff] }
 0x143   : > { %v622_v30 = vld [vmem:[#allocation3] sm:$0xff]  ;;  %613 = vst.msk [vmem:[#allocation3 + $0xa] sm:$0xff] %vm607_vm3, %v1260_v28  ;;  %1161 = vmatmul.msk.f32.vlgmr.msrb.gmra.mxu3 %vm607_vm3, %v633_v29  ;;  %v1227_v29 = vld [vmem:[%s1705_s8 + $0x100] sm:$0xff] }
 0x144   : > { %v702_v31 = vld [vmem:[#allocation3 + $0x2] sm:$0xff]  ;;  %1163 = vmatmul.msk.f32.vlgmr.msrb.gmra.mxu0 %vm607_vm3, %v622_v30  ;;  %978 = vmatpush.msrb.mxu3 %v1224_v51 }
 0x145   : > { %1173 = vmatmul.msk.f32.vlgmr.msra.gmra.mxu1 %vm607_vm3, %v702_v31 }
 0x146   : > { %979 = vmatpush.msrb.mxu3 %v1223_v56 }
 0x148   : > { %980 = vmatpush.msrb.mxu3 %v1222_v60 }
 0x14a   : > { %v634_v32 = vld [vmem:[#allocation3 + $0x9] sm:$0xff]  ;;  %981 = vmatpush.msrb.mxu3 %v1221_v0 }
 0x14b   : > { %v623_v33 = vld [vmem:[#allocation3 + $0x8] sm:$0xff]  ;;  %1162 = vmatmul.msk.f32.gmra.mxu3 %vm607_vm3, %v634_v32 }
 0x14c   : > { %v703_v34 = vld [vmem:[#allocation3 + $0xa] sm:$0xff]  ;;  %1164 = vmatmul.msk.f32.gmra.mxu0 %vm607_vm3, %v623_v33  ;;  %982 = vmatpush.msrb.mxu3 %v1220_v3 }
 0x14d   : > { %v744_v35 = vld [vmem:[#allocation3 + $0x3] sm:$0xff]  ;;  %1174 = vmatmul.msk.f32.gmra.mxu1 %vm607_vm3, %v703_v34  ;;  %v745_v37 = vld [vmem:[#allocation3 + $0xb] sm:$0xff]  ;;  %v1274_v34 = vmov 0  }
 0x14e   : > { %v786_v36 = vld [vmem:[#allocation3 + $0x4] sm:$0xff]  ;;  %1183 = vmatmul.msk.f32.vlgmr.msra.gmra.mxu2 %vm607_vm3, %v744_v35  ;;  %v787_v38 = vld [vmem:[#allocation3 + $0xc] sm:$0xff]  ;;  %983 = vmatpush.msrb.mxu3 %v1219_v7 }
 0x14f   : > { %827 = vst.msk [vmem:[#allocation3] sm:$0xff] %vm607_vm3, %v1273_v6  ;;  %1252 = vset.pattern.permute.xlu0 %v1274_v34 }
 0x150   : > { %828 = vst.msk [vmem:[#allocation3 + $0x8] sm:$0xff] %vm607_vm3, %v1273_v6  ;;  %984 = vmatpush.msrb.mxu3 %v1218_v10  ;;  %1047 = vperm.xlu0 %1252, %v382_v40  }
 0x151   : > { %829 = vst.msk [vmem:[#allocation3 + $0x10] sm:$0xf] %vm610_vm4, %v1273_v6  ;;  %v1201_v6 = vld [vmem:[%s1705_s8 + $0x70] sm:$0xff] }
 0x152   : > { %868 = vmatpush.msra.mxu0 %v1201_v6  ;;  %985 = vmatpush.msrb.mxu3 %v1217_v17 }
 0x153   : > { %1193 = vmatmul.msk.f32.vlgmr.msra.gmra.mxu3 %vm607_vm3, %v786_v36 }
 0x154   : > { %869 = vmatpush.msra.mxu0 %v1200_v44 }
 0x156   : > { %1184 = vmatmul.msk.f32.gmra.mxu2 %vm607_vm3, %v745_v37  ;;  %870 = vmatpush.msra.mxu0 %v1199_v47 }
 0x158   : > { %871 = vmatpush.msra.mxu0 %v1198_v50  ;;  %1052 = vperm.xlu0 %1252, %v383_v41  }
 0x15a   : > { %872 = vmatpush.msra.mxu0 %v1197_v55 }
 0x15b   : > { %1194 = vmatmul.msk.f32.gmra.mxu3 %vm607_vm3, %v787_v38 }
 0x15c   : > { %873 = vmatpush.msra.mxu0 %v1196_v59 }
 0x15e   : > { %874 = vmatpush.msra.mxu0 %v1195_v63 }
 0x160   : > { %1020 = vmatpush.msrb.mxu0 %v1234_v4 }
 0x162   : > { %1021 = vmatpush.msrb.mxu0 %v1233_v8 }
 0x164   : > { %1022 = vmatpush.msrb.mxu0 %v1232_v11 }
 0x166   : > { %1023 = vmatpush.msrb.mxu0 %v1231_v18 }
 0x168   : > { %1024 = vmatpush.msrb.mxu0 %v1230_v20 }
 0x16a   : > { %1025 = vmatpush.msrb.mxu0 %v1229_v21 }
 0x16c   : > { %1026 = vmatpush.msrb.mxu0 %v1228_v26 }
 0x16e   : > { %1027 = vmatpush.msrb.mxu0 %v1227_v29 }
 0x1c1   : > { %v687_v5 = vpop.f32.mrf.mxu0 }
 0x1c2   : > { %v727_v13 = vpop.f32.mrf.mxu1  ;;  %v1048_v3 = vpop.permute.xlu0 %1047 }
 0x1c6   : > { %v658_v54 = vpop.f32.mrf.mxu3 }
 0x1c7   : > { %v688_v12 = vadd.f32 %v687_v5, %v658_v54 }
 0x1c9   : > { %v733_v19 = vadd.f32 %v727_v13, %v688_v12  ;;  %v690_v24 = vpop.f32.mrf.mxu0 }
 0x1ca   : > { %v730_v31 = vpop.f32.mrf.mxu1 }
 0x1ce   : > { %v661_v9 = vpop.f32.mrf.mxu3 }
 0x1cf   : > { %v691_v27 = vadd.f32 %v690_v24, %v661_v9 }
 0x1d1   : > { %v769_v15 = vpop.f32.mrf.mxu2  ;;  %v734_v33 = vadd.f32 %v730_v31, %v691_v27 }
 0x1d2   : > { %v775_v22 = vadd.f32 %v769_v15, %v733_v19  ;;  %v1053_v15 = vpop.permute.xlu0 %1052 }
 0x1d6   : > { %v811_v25 = vpop.f32.mrf.mxu3 }
 0x1d7   : > { %v817_v28 = vadd.f32 %v811_v25, %v775_v22 }
 0x1d9   : > { %v823_v30 = vadd.f32 %v1255_v23, %v817_v28  ;;  %v772_v32 = vpop.f32.mrf.mxu2 }
 0x1da   : > { %v776_v35 = vadd.f32 %v772_v32, %v734_v33 }
 0x1db   : > { %1261 = vtanh.f32 %v823_v30 }
 0x1de   : > { %v814_v36 = vpop.f32.mrf.mxu3 }
 0x1df   : > { %v818_v37 = vadd.f32 %v814_v36, %v776_v35 }
 0x1e1   : > { %v1262_v38 = vpop.eup %1261  ;;  %v824_v39 = vadd.f32 %v1255_v23, %v818_v37 }
 0x1e2   : > { %830 = vst.msk [vmem:[#allocation3 + $0x2] sm:$0xff] %vm607_vm3, %v1262_v38 }
 0x1e3   : > { %1263 = vtanh.f32 %v824_v39 }
 0x1e9   : > { %v1264_v6 = vpop.eup %1263  ;;  %v851_v42 = vld [vmem:[#allocation3 + $0x1] sm:$0xff] }
 0x1ea   : > { %v840_v43 = vld [vmem:[#allocation3] sm:$0xff]  ;;  %831 = vst.msk [vmem:[#allocation3 + $0xa] sm:$0xff] %vm607_vm3, %v1264_v6  ;;  %1203 = vmatmul.msk.f32.vlgmr.msra.gmra.mxu0 %vm607_vm3, %v851_v42 }
 0x1eb   : > { %v920_v44 = vld [vmem:[#allocation3 + $0x2] sm:$0xff]  ;;  %1205 = vmatmul.msk.f32.vlgmr.msrb.gmra.mxu1 %vm607_vm3, %v840_v43 }
 0x1ec   : > { %1215 = vmatmul.msk.f32.vlgmr.msrb.gmra.mxu2 %vm607_vm3, %v920_v44 }
 0x1f1   : > { %v852_v45 = vld [vmem:[#allocation3 + $0x9] sm:$0xff] }
 0x1f2   : > { %v841_v46 = vld [vmem:[#allocation3 + $0x8] sm:$0xff]  ;;  %1204 = vmatmul.msk.f32.gmra.mxu0 %vm607_vm3, %v852_v45 }
 0x1f3   : > { %v921_v47 = vld [vmem:[#allocation3 + $0xa] sm:$0xff]  ;;  %1206 = vmatmul.msk.f32.gmra.mxu1 %vm607_vm3, %v841_v46 }
 0x1f4   : > { %v962_v48 = vld [vmem:[#allocation3 + $0x3] sm:$0xff]  ;;  %1216 = vmatmul.msk.f32.gmra.mxu2 %vm607_vm3, %v921_v47  ;;  %v963_v50 = vld [vmem:[#allocation3 + $0xb] sm:$0xff] }
 0x1f5   : > { %1225 = vmatmul.msk.f32.vlgmr.msrb.gmra.mxu3 %vm607_vm3, %v962_v48  ;;  %v1004_v49 = vld [vmem:[#allocation3 + $0x4] sm:$0xff]  ;;  %v1005_v51 = vld [vmem:[#allocation3 + $0xc] sm:$0xff] }
 0x1fa   : > { %1235 = vmatmul.msk.f32.vlgmr.msrb.gmra.mxu0 %vm607_vm3, %v1004_v49 }
 0x1fd   : > { %1226 = vmatmul.msk.f32.gmra.mxu3 %vm607_vm3, %v963_v50 }
 0x202   : > { %1236 = vmatmul.msk.f32.gmra.mxu0 %vm607_vm3, %v1005_v51 }
 0x267   : > { %v876_v52 = vpop.f32.mrf.mxu0 }
 0x268   : > { %v905_v53 = vpop.f32.mrf.mxu1 }
 0x269   : > { %v906_v56 = vadd.f32 %v905_v53, %v876_v52 }
 0x26f   : > { %v879_v54 = vpop.f32.mrf.mxu0  ;;  %v945_v55 = vpop.f32.mrf.mxu2 }
 0x270   : > { %v951_v57 = vadd.f32 %v945_v55, %v906_v56  ;;  %v908_v62 = vpop.f32.mrf.mxu1 }
 0x271   : > { %v909_v1 = vadd.f32 %v908_v62, %v879_v54 }
 0x277   : > { %v1029_v60 = vpop.f32.mrf.mxu0  ;;  %v948_v0 = vpop.f32.mrf.mxu2 }
 0x278   : > { %v987_v58 = vpop.f32.mrf.mxu3  ;;  %v952_v4 = vadd.f32 %v948_v0, %v909_v1 }
 0x279   : > { %v993_v59 = vadd.f32 %v987_v58, %v951_v57 }
 0x27b   : > { %v1035_v63 = vadd.f32 %v1029_v60, %v993_v59 }
 0x27d   : > { %v1041_v2 = vadd.f32 %v1256_v61, %v1035_v63 }
 0x27f   : > { %v1043_v5 = vadd.f32 %v1041_v2, %v1379_v14  ;;  %v1032_v10 = vpop.f32.mrf.mxu0 }
 0x280   : > { %v990_v7 = vpop.f32.mrf.mxu3 }
 0x281   : > { %v1055_v8 = vmul.f32 %v1048_v3, %v1043_v5  ;;  %v994_v9 = vadd.f32 %v990_v7, %v952_v4 }
 0x283   : > { %1057 = vst.msk [vmem:[%s379_s30] sm:$0xff] %vm422_vm1, %v1055_v8  ;;  %v1036_v11 = vadd.f32 %v1032_v10, %v994_v9 }
 0x285   : > { %v1042_v12 = vadd.f32 %v1256_v61, %v1036_v11 }
 0x287   : > { %v1044_v13 = vadd.f32 %v1042_v12, %v1383_v16 }
 0x289   : > { %v1056_v17 = vmul.f32 %v1053_v15, %v1044_v13 }
 0x28b   : > { %1058 = vst.msk [vmem:[%s379_s30 + $0x8] sm:$0xff] %vm422_vm1, %v1056_v17 }
 0x28c PF: > { %s20_s13 = sadd.s32 1, %s1271_s13  }
 0x28d   : > { %p17_p4 = scmp.ge.s32.totalorder %s20_s13, 4  }
 0x28f   :  { %19 = sbr.rel (!%p17_p4) target bundleno = 1 (0x1), region = 105 }

</bundles_post_ra>
